<compile_context>
chip_gen: v6e
topology: v6e:2x2x1
jax: 0.10.0
libtpu: 0.0.40
codegen_flags: <defaults>
</compile_context>

<pallas_src>
import functools
import math

import jax
import jax.numpy as jnp
from jax.experimental import pallas as pl
from jax.experimental.pallas import tpu as pltpu


# ----------------------------------------------------------------------------
# Fused MHA kernel: one grid step per batch element.
# ----------------------------------------------------------------------------
def fused_mha_kernel(xq_ref, xk_ref, xv_ref,
                     wq_ref, bq_ref, wk_ref, bk_ref, wv_ref, bv_ref,
                     wo_ref, bo_ref, *rest, num_heads, scale, use_mask):
    # xq/xk/xv_ref: (1, S, D) f32 ; w*_ref: (D, D) bf16 ; b*_ref: (1, D) f32
    # optional mask_ref: (S, S) f32 ; o_ref: (1, S, D) f32
    if use_mask:
        mask_ref, o_ref = rest
    else:
        (o_ref,) = rest

    S = xq_ref.shape[1]
    D = xq_ref.shape[2]
    Dh = D // num_heads
    bf16 = jnp.bfloat16

    xq = xq_ref[0].astype(bf16)
    xk = xk_ref[0].astype(bf16)
    xv = xv_ref[0].astype(bf16)

    # Projections: bf16 MXU, f32 accumulation, f32 bias add.
    q = jnp.dot(xq, wq_ref[...], preferred_element_type=jnp.float32) + bq_ref[...]
    k = jnp.dot(xk, wk_ref[...], preferred_element_type=jnp.float32) + bk_ref[...]
    v = jnp.dot(xv, wv_ref[...], preferred_element_type=jnp.float32) + bv_ref[...]

    # Fold 1/sqrt(Dh) into q (cheaper than scaling the H*S*S score tensor).
    q = (q * scale).astype(bf16)
    k = k.astype(bf16)
    v = v.astype(bf16)

    if use_mask:
        neg_mask = mask_ref[...] == 0.0          # (S, S), hoisted out of head loop

    # Per-head attention.  Heads are static lane-offset slices of the [S, D]
    # activations (D stays the last / lane dim; no 3-D reshape or transpose).
    ctx_heads = []
    for h in range(num_heads):                   # static unroll (H = 8)
        sl = slice(h * Dh, (h + 1) * Dh)
        qh, kh, vh = q[:, sl], k[:, sl], v[:, sl]          # (S, Dh) bf16
        s = jnp.einsum("qd,kd->qk", qh, kh,
                       preferred_element_type=jnp.float32)  # (S, S) f32
        if use_mask:
            s = jnp.where(neg_mask, -1e9, s)
        m = jnp.max(s, axis=-1, keepdims=True)
        p = jnp.exp(s - m)
        denom = jnp.sum(p, axis=-1, keepdims=True)
        p = p * pl.reciprocal(denom, approx=True)           # EUP, not VALU divide
        ctx_heads.append(jnp.dot(p.astype(bf16), vh,
                                 preferred_element_type=jnp.float32))  # (S, Dh)

    # Combine heads back into the lane-dense [S, D] slab and project.
    ctx = jnp.concatenate(ctx_heads, axis=-1).astype(bf16)   # (S, D)
    out = jnp.dot(ctx, wo_ref[...], preferred_element_type=jnp.float32) + bo_ref[...]
    o_ref[0] = out.astype(o_ref.dtype)


def multi_head_attention(xq, xk, xv, params, mask=None, *, num_heads):
    """Full fused MHA forward.

    xq/xk/xv: [B, S, D] f32.  params = (wq, bq, wk, bk, wv, bv, wo, bo) with
    weights stored pre-transposed vs. nn.Linear (W is [in, out]) and biases
    [1, D].  mask: None or broadcastable to (S, S) (0 -> masked).
    """
    wq, bq, wk, bk, wv, bv, wo, bo = params
    B, S, D = xq.shape
    assert D % num_heads == 0 and D % 128 == 0, (D, num_heads)
    Dh = D // num_heads
    scale = 1.0 / math.sqrt(Dh)

    # Cast weights to bf16 once (halves weight DMA, full MXU rate); biases f32.
    wq_b, wk_b, wv_b, wo_b = (w.astype(jnp.bfloat16) for w in (wq, wk, wv, wo))

    use_mask = mask is not None

    x_spec = pl.BlockSpec((1, S, D), lambda b: (b, 0, 0))
    w_spec = pl.BlockSpec((D, D), lambda b: (0, 0))       # grid-invariant, resident
    b_spec = pl.BlockSpec((1, D), lambda b: (0, 0))

    operands = [xq, xk, xv, wq_b, bq, wk_b, bk, wv_b, bv, wo_b, bo]
    in_specs = [x_spec, x_spec, x_spec,
                w_spec, b_spec, w_spec, b_spec, w_spec, b_spec, w_spec, b_spec]
    if use_mask:
        mask2d = jnp.broadcast_to(jnp.asarray(mask, jnp.float32), (S, S))
        operands.append(mask2d)
        in_specs.append(pl.BlockSpec((S, S), lambda b: (0, 0)))   # single resident copy

    kernel = functools.partial(fused_mha_kernel, num_heads=num_heads,
                               scale=scale, use_mask=use_mask)
    out = pl.pallas_call(
        kernel,
        out_shape=jax.ShapeDtypeStruct((B, S, D), jnp.float32),
        grid_spec=pltpu.PrefetchScalarGridSpec(
            num_scalar_prefetch=0,
            grid=(B,),
            in_specs=in_specs,
            out_specs=pl.BlockSpec((1, S, D), lambda b: (b, 0, 0)),
        ),
        compiler_params=pltpu.CompilerParams(
            dimension_semantics=("parallel",)),
    )(*operands)
    return out


# ----------------------------------------------------------------------------
# Pure-JAX reference (same bf16-MXU / f32-accumulate strategy, exact division)
# ----------------------------------------------------------------------------
def ref_mha(xq, xk, xv, mask, params, *, num_heads):
    wq, bq, wk, bk, wv, bv, wo, bo = params
    B, S, D = xq.shape
    Dh = D // num_heads
    bf = jnp.bfloat16

    def lin(x, w, b):
        return jnp.dot(x.astype(bf), w.astype(bf),
                       preferred_element_type=jnp.float32) + b

    q = lin(xq.reshape(B * S, D), wq, bq) * (1.0 / math.sqrt(Dh))
    k = lin(xk.reshape(B * S, D), wk, bk)
    v = lin(xv.reshape(B * S, D), wv, bv)

    def split(t):
        return t.astype(bf).reshape(B, S, num_heads, Dh).transpose(0, 2, 1, 3)

    qh, kh, vh = split(q), split(k), split(v)
    scores = jnp.einsum("bhqd,bhkd->bhqk", qh, kh,
                        preferred_element_type=jnp.float32)
    if mask is not None:
        mb = jnp.broadcast_to(jnp.asarray(mask, jnp.float32), (S, S))
        scores = jnp.where(mb[None, None, :, :] == 0.0, -1e9, scores)
    p = jax.nn.softmax(scores, axis=-1)
    ctx = jnp.einsum("bhqk,bhkd->bhqd", p.astype(bf), vh,
                     preferred_element_type=jnp.float32)
    ctx = ctx.astype(bf).transpose(0, 2, 1, 3).reshape(B * S, D)
    out = jnp.dot(ctx, wo.astype(bf), preferred_element_type=jnp.float32) + bo
    return out.reshape(B, S, D)


if __name__ == "__main__":
    # Small shapes consistent with the module (d_model/num_heads fixed by spec).
    d_model, num_heads = 512, 8
    batch, seq = 2, 8

    key = jax.random.PRNGKey(0)
    keys = jax.random.split(key, 12)
    bound = 1.0 / math.sqrt(d_model)     # PyTorch nn.Linear default init range

    def mk_linear(kw, kb):
        w = jax.random.uniform(kw, (d_model, d_model), jnp.float32, -bound, bound)
        b = jax.random.uniform(kb, (1, d_model), jnp.float32, -bound, bound)
        return w, b

    wq, bq = mk_linear(keys[0], keys[1])
    wk, bk = mk_linear(keys[2], keys[3])
    wv, bv = mk_linear(keys[4], keys[5])
    wo, bo = mk_linear(keys[6], keys[7])
    params = (wq, bq, wk, bk, wv, bv, wo, bo)

    xq = jax.random.normal(keys[8], (batch, seq, d_model), jnp.float32)
    xk = jax.random.normal(keys[9], (batch, seq, d_model), jnp.float32)
    xv = jax.random.normal(keys[10], (batch, seq, d_model), jnp.float32)
    mask = jnp.tril(jnp.ones((seq, seq), jnp.float32))   # causal mask (mask==0 -> -1e9)

    # Masked (causal) path.
    out = multi_head_attention(xq, xk, xv, params, mask, num_heads=num_heads)
    jax.block_until_ready(out)
    ref = ref_mha(xq, xk, xv, mask, params, num_heads=num_heads)
    assert out.shape == (batch, seq, d_model)
    assert jnp.allclose(out, ref, atol=5e-3, rtol=5e-3), \
        float(jnp.max(jnp.abs(out - ref)))

    # mask=None path (no mask operand compiled in at all).
    out_nm = multi_head_attention(xq, xk, xv, params, None, num_heads=num_heads)
    jax.block_until_ready(out_nm)
    ref_nm = ref_mha(xq, xk, xv, None, params, num_heads=num_heads)
    assert jnp.allclose(out_nm, ref_nm, atol=5e-3, rtol=5e-3), \
        float(jnp.max(jnp.abs(out_nm - ref_nm)))

    print("KERNEL_OK")
</pallas_src>

<mosaic_0001>
module attributes {stable_mosaic.version = 11 : i64} {
  func.func @fused_mha_kernel(%arg0: i32, %arg1: memref<1x8x512xf32, #tpu.memory_space<vmem>>, %arg2: memref<1x8x512xf32, #tpu.memory_space<vmem>>, %arg3: memref<1x8x512xf32, #tpu.memory_space<vmem>>, %arg4: memref<512x512xbf16, #tpu.memory_space<vmem>>, %arg5: memref<1x512xf32, #tpu.memory_space<vmem>>, %arg6: memref<512x512xbf16, #tpu.memory_space<vmem>>, %arg7: memref<1x512xf32, #tpu.memory_space<vmem>>, %arg8: memref<512x512xbf16, #tpu.memory_space<vmem>>, %arg9: memref<1x512xf32, #tpu.memory_space<vmem>>, %arg10: memref<512x512xbf16, #tpu.memory_space<vmem>>, %arg11: memref<1x512xf32, #tpu.memory_space<vmem>>, %arg12: memref<8x8xf32, #tpu.memory_space<vmem>>, %arg13: memref<1x8x512xf32, #tpu.memory_space<vmem>>) attributes {dimension_semantics = [#tpu.dimension_semantics<parallel>], iteration_bounds = array<i64: 2>, scalar_prefetch = 0 : i64, scratch_operands = 0 : i64, tpu.core_type = #tpu.core_type<tc>, window_params = [{transform_indices = @transform_0, window_bounds = array<i64: 1, 8, 512>}, {transform_indices = @transform_1, window_bounds = array<i64: 1, 8, 512>}, {transform_indices = @transform_2, window_bounds = array<i64: 1, 8, 512>}, {pipeline_mode = #tpu.pipeline_mode<synchronous>, transform_indices = @transform_3, window_bounds = array<i64: 512, 512>}, {pipeline_mode = #tpu.pipeline_mode<synchronous>, transform_indices = @transform_4, window_bounds = array<i64: 1, 512>}, {pipeline_mode = #tpu.pipeline_mode<synchronous>, transform_indices = @transform_5, window_bounds = array<i64: 512, 512>}, {pipeline_mode = #tpu.pipeline_mode<synchronous>, transform_indices = @transform_6, window_bounds = array<i64: 1, 512>}, {pipeline_mode = #tpu.pipeline_mode<synchronous>, transform_indices = @transform_7, window_bounds = array<i64: 512, 512>}, {pipeline_mode = #tpu.pipeline_mode<synchronous>, transform_indices = @transform_8, window_bounds = array<i64: 1, 512>}, {pipeline_mode = #tpu.pipeline_mode<synchronous>, transform_indices = @transform_9, window_bounds = array<i64: 512, 512>}, {pipeline_mode = #tpu.pipeline_mode<synchronous>, transform_indices = @transform_10, window_bounds = array<i64: 1, 512>}, {pipeline_mode = #tpu.pipeline_mode<synchronous>, transform_indices = @transform_11, window_bounds = array<i64: 8, 8>}, {transform_indices = @transform_12, window_bounds = array<i64: 1, 8, 512>}]} {
    %c0 = arith.constant 0 : index
    %c0_0 = arith.constant 0 : index
    %c0_1 = arith.constant 0 : index
    %0 = vector.load %arg1[%c0, %c0_0, %c0_1] : memref<1x8x512xf32, #tpu.memory_space<vmem>>, vector<1x8x512xf32>
    %1 = vector.shape_cast %0 : vector<1x8x512xf32> to vector<8x512xf32>
    %2 = arith.truncf %1 : vector<8x512xf32> to vector<8x512xbf16>
    %c0_2 = arith.constant 0 : index
    %c0_3 = arith.constant 0 : index
    %c0_4 = arith.constant 0 : index
    %3 = vector.load %arg2[%c0_2, %c0_3, %c0_4] : memref<1x8x512xf32, #tpu.memory_space<vmem>>, vector<1x8x512xf32>
    %4 = vector.shape_cast %3 : vector<1x8x512xf32> to vector<8x512xf32>
    %5 = arith.truncf %4 : vector<8x512xf32> to vector<8x512xbf16>
    %c0_5 = arith.constant 0 : index
    %c0_6 = arith.constant 0 : index
    %c0_7 = arith.constant 0 : index
    %6 = vector.load %arg3[%c0_5, %c0_6, %c0_7] : memref<1x8x512xf32, #tpu.memory_space<vmem>>, vector<1x8x512xf32>
    %7 = vector.shape_cast %6 : vector<1x8x512xf32> to vector<8x512xf32>
    %8 = arith.truncf %7 : vector<8x512xf32> to vector<8x512xbf16>
    %c0_8 = arith.constant 0 : index
    %c0_9 = arith.constant 0 : index
    %9 = vector.load %arg4[%c0_8, %c0_9] : memref<512x512xbf16, #tpu.memory_space<vmem>>, vector<512x512xbf16>
    %cst = arith.constant dense<0.000000e+00> : vector<8x512xf32>
    %10 = tpu.matmul %2, %9, %cst {dimension_numbers = #tpu.dot_dimension_numbers<[1], [0], [0], [1], [0, 0, 1, 1], [], []>} : vector<8x512xbf16>, vector<512x512xbf16>, vector<8x512xf32> -> vector<8x512xf32>
    %c0_10 = arith.constant 0 : index
    %c0_11 = arith.constant 0 : index
    %11 = vector.load %arg5[%c0_10, %c0_11] : memref<1x512xf32, #tpu.memory_space<vmem>>, vector<1x512xf32>
    %12 = vector.broadcast %11 : vector<1x512xf32> to vector<8x512xf32>
    %13 = arith.addf %10, %12 : vector<8x512xf32>
    %c0_12 = arith.constant 0 : index
    %c0_13 = arith.constant 0 : index
    %14 = vector.load %arg6[%c0_12, %c0_13] : memref<512x512xbf16, #tpu.memory_space<vmem>>, vector<512x512xbf16>
    %cst_14 = arith.constant dense<0.000000e+00> : vector<8x512xf32>
    %15 = tpu.matmul %5, %14, %cst_14 {dimension_numbers = #tpu.dot_dimension_numbers<[1], [0], [0], [1], [0, 0, 1, 1], [], []>} : vector<8x512xbf16>, vector<512x512xbf16>, vector<8x512xf32> -> vector<8x512xf32>
    %c0_15 = arith.constant 0 : index
    %c0_16 = arith.constant 0 : index
    %16 = vector.load %arg7[%c0_15, %c0_16] : memref<1x512xf32, #tpu.memory_space<vmem>>, vector<1x512xf32>
    %17 = vector.broadcast %16 : vector<1x512xf32> to vector<8x512xf32>
    %18 = arith.addf %15, %17 : vector<8x512xf32>
    %c0_17 = arith.constant 0 : index
    %c0_18 = arith.constant 0 : index
    %19 = vector.load %arg8[%c0_17, %c0_18] : memref<512x512xbf16, #tpu.memory_space<vmem>>, vector<512x512xbf16>
    %cst_19 = arith.constant dense<0.000000e+00> : vector<8x512xf32>
    %20 = tpu.matmul %8, %19, %cst_19 {dimension_numbers = #tpu.dot_dimension_numbers<[1], [0], [0], [1], [0, 0, 1, 1], [], []>} : vector<8x512xbf16>, vector<512x512xbf16>, vector<8x512xf32> -> vector<8x512xf32>
    %c0_20 = arith.constant 0 : index
    %c0_21 = arith.constant 0 : index
    %21 = vector.load %arg9[%c0_20, %c0_21] : memref<1x512xf32, #tpu.memory_space<vmem>>, vector<1x512xf32>
    %22 = vector.broadcast %21 : vector<1x512xf32> to vector<8x512xf32>
    %23 = arith.addf %20, %22 : vector<8x512xf32>
    %cst_22 = arith.constant 1.250000e-01 : f32
    %24 = vector.broadcast %cst_22 : f32 to vector<8x512xf32>
    %25 = arith.mulf %13, %24 : vector<8x512xf32>
    %26 = arith.truncf %25 : vector<8x512xf32> to vector<8x512xbf16>
    %27 = arith.truncf %18 : vector<8x512xf32> to vector<8x512xbf16>
    %28 = arith.truncf %23 : vector<8x512xf32> to vector<8x512xbf16>
    %c0_23 = arith.constant 0 : index
    %c0_24 = arith.constant 0 : index
    %29 = vector.load %arg12[%c0_23, %c0_24] : memref<8x8xf32, #tpu.memory_space<vmem>>, vector<8x8xf32>
    %cst_25 = arith.constant 0.000000e+00 : f32
    %30 = vector.broadcast %cst_25 : f32 to vector<8x8xf32>
    %31 = arith.cmpf oeq, %29, %30 : vector<8x8xf32>
    %32 = vector.extract_strided_slice %26 {offsets = [0, 0], sizes = [8, 64], strides = [1, 1]} : vector<8x512xbf16> to vector<8x64xbf16>
    %33 = vector.extract_strided_slice %27 {offsets = [0, 0], sizes = [8, 64], strides = [1, 1]} : vector<8x512xbf16> to vector<8x64xbf16>
    %34 = vector.extract_strided_slice %28 {offsets = [0, 0], sizes = [8, 64], strides = [1, 1]} : vector<8x512xbf16> to vector<8x64xbf16>
    "tpu.trace_start"() <{level = 10 : i32, message = "qd,kd->qk"}> : () -> ()
    %cst_26 = arith.constant dense<0.000000e+00> : vector<8x8xf32>
    %35 = tpu.matmul %32, %33, %cst_26 {dimension_numbers = #tpu.dot_dimension_numbers<[1], [1], [0], [0], [0, 0, 1, 0], [], []>} : vector<8x64xbf16>, vector<8x64xbf16>, vector<8x8xf32> -> vector<8x8xf32>
    %cst_27 = arith.constant -1.000000e+09 : f32
    "tpu.trace_stop"() : () -> ()
    %36 = vector.broadcast %cst_27 : f32 to vector<8x8xf32>
    %37 = arith.select %31, %36, %35 : vector<8x8xi1>, vector<8x8xf32>
    %cst_28 = arith.constant dense<0xFF800000> : vector<8xf32>
    %38 = vector.multi_reduction <maximumf>, %37, %cst_28 [1] : vector<8x8xf32> to vector<8xf32>
    %39 = vector.shape_cast %38 : vector<8xf32> to vector<8x1xf32>
    %40 = vector.broadcast %39 : vector<8x1xf32> to vector<8x8xf32>
    %41 = arith.subf %37, %40 : vector<8x8xf32>
    %42 = math.exp %41 : vector<8x8xf32>
    %cst_29 = arith.constant dense<0.000000e+00> : vector<8xf32>
    %43 = vector.multi_reduction <add>, %42, %cst_29 [1] : vector<8x8xf32> to vector<8xf32>
    %44 = vector.shape_cast %43 : vector<8xf32> to vector<8x1xf32>
    %45 = tpu.reciprocal %44 {approx = true} : vector<8x1xf32> -> vector<8x1xf32>
    %46 = vector.broadcast %45 : vector<8x1xf32> to vector<8x8xf32>
    %47 = arith.mulf %42, %46 : vector<8x8xf32>
    %48 = arith.truncf %47 : vector<8x8xf32> to vector<8x8xbf16>
    %cst_30 = arith.constant dense<0.000000e+00> : vector<8x64xf32>
    %49 = tpu.matmul %48, %34, %cst_30 {dimension_numbers = #tpu.dot_dimension_numbers<[1], [0], [0], [1], [0, 0, 1, 1], [], []>} : vector<8x8xbf16>, vector<8x64xbf16>, vector<8x64xf32> -> vector<8x64xf32>
    %50 = vector.extract_strided_slice %26 {offsets = [0, 64], sizes = [8, 64], strides = [1, 1]} : vector<8x512xbf16> to vector<8x64xbf16>
    %51 = vector.extract_strided_slice %27 {offsets = [0, 64], sizes = [8, 64], strides = [1, 1]} : vector<8x512xbf16> to vector<8x64xbf16>
    %52 = vector.extract_strided_slice %28 {offsets = [0, 64], sizes = [8, 64], strides = [1, 1]} : vector<8x512xbf16> to vector<8x64xbf16>
    "tpu.trace_start"() <{level = 10 : i32, message = "qd,kd->qk"}> : () -> ()
    %cst_31 = arith.constant dense<0.000000e+00> : vector<8x8xf32>
    %53 = tpu.matmul %50, %51, %cst_31 {dimension_numbers = #tpu.dot_dimension_numbers<[1], [1], [0], [0], [0, 0, 1, 0], [], []>} : vector<8x64xbf16>, vector<8x64xbf16>, vector<8x8xf32> -> vector<8x8xf32>
    %cst_32 = arith.constant -1.000000e+09 : f32
    "tpu.trace_stop"() : () -> ()
    %54 = vector.broadcast %cst_32 : f32 to vector<8x8xf32>
    %55 = arith.select %31, %54, %53 : vector<8x8xi1>, vector<8x8xf32>
    %cst_33 = arith.constant dense<0xFF800000> : vector<8xf32>
    %56 = vector.multi_reduction <maximumf>, %55, %cst_33 [1] : vector<8x8xf32> to vector<8xf32>
    %57 = vector.shape_cast %56 : vector<8xf32> to vector<8x1xf32>
    %58 = vector.broadcast %57 : vector<8x1xf32> to vector<8x8xf32>
    %59 = arith.subf %55, %58 : vector<8x8xf32>
    %60 = math.exp %59 : vector<8x8xf32>
    %cst_34 = arith.constant dense<0.000000e+00> : vector<8xf32>
    %61 = vector.multi_reduction <add>, %60, %cst_34 [1] : vector<8x8xf32> to vector<8xf32>
    %62 = vector.shape_cast %61 : vector<8xf32> to vector<8x1xf32>
    %63 = tpu.reciprocal %62 {approx = true} : vector<8x1xf32> -> vector<8x1xf32>
    %64 = vector.broadcast %63 : vector<8x1xf32> to vector<8x8xf32>
    %65 = arith.mulf %60, %64 : vector<8x8xf32>
    %66 = arith.truncf %65 : vector<8x8xf32> to vector<8x8xbf16>
    %cst_35 = arith.constant dense<0.000000e+00> : vector<8x64xf32>
    %67 = tpu.matmul %66, %52, %cst_35 {dimension_numbers = #tpu.dot_dimension_numbers<[1], [0], [0], [1], [0, 0, 1, 1], [], []>} : vector<8x8xbf16>, vector<8x64xbf16>, vector<8x64xf32> -> vector<8x64xf32>
    %68 = vector.extract_strided_slice %26 {offsets = [0, 128], sizes = [8, 64], strides = [1, 1]} : vector<8x512xbf16> to vector<8x64xbf16>
    %69 = vector.extract_strided_slice %27 {offsets = [0, 128], sizes = [8, 64], strides = [1, 1]} : vector<8x512xbf16> to vector<8x64xbf16>
    %70 = vector.extract_strided_slice %28 {offsets = [0, 128], sizes = [8, 64], strides = [1, 1]} : vector<8x512xbf16> to vector<8x64xbf16>
    "tpu.trace_start"() <{level = 10 : i32, message = "qd,kd->qk"}> : () -> ()
    %cst_36 = arith.constant dense<0.000000e+00> : vector<8x8xf32>
    %71 = tpu.matmul %68, %69, %cst_36 {dimension_numbers = #tpu.dot_dimension_numbers<[1], [1], [0], [0], [0, 0, 1, 0], [], []>} : vector<8x64xbf16>, vector<8x64xbf16>, vector<8x8xf32> -> vector<8x8xf32>
    %cst_37 = arith.constant -1.000000e+09 : f32
    "tpu.trace_stop"() : () -> ()
    %72 = vector.broadcast %cst_37 : f32 to vector<8x8xf32>
    %73 = arith.select %31, %72, %71 : vector<8x8xi1>, vector<8x8xf32>
    %cst_38 = arith.constant dense<0xFF800000> : vector<8xf32>
    %74 = vector.multi_reduction <maximumf>, %73, %cst_38 [1] : vector<8x8xf32> to vector<8xf32>
    %75 = vector.shape_cast %74 : vector<8xf32> to vector<8x1xf32>
    %76 = vector.broadcast %75 : vector<8x1xf32> to vector<8x8xf32>
    %77 = arith.subf %73, %76 : vector<8x8xf32>
    %78 = math.exp %77 : vector<8x8xf32>
    %cst_39 = arith.constant dense<0.000000e+00> : vector<8xf32>
    %79 = vector.multi_reduction <add>, %78, %cst_39 [1] : vector<8x8xf32> to vector<8xf32>
    %80 = vector.shape_cast %79 : vector<8xf32> to vector<8x1xf32>
    %81 = tpu.reciprocal %80 {approx = true} : vector<8x1xf32> -> vector<8x1xf32>
    %82 = vector.broadcast %81 : vector<8x1xf32> to vector<8x8xf32>
    %83 = arith.mulf %78, %82 : vector<8x8xf32>
    %84 = arith.truncf %83 : vector<8x8xf32> to vector<8x8xbf16>
    %cst_40 = arith.constant dense<0.000000e+00> : vector<8x64xf32>
    %85 = tpu.matmul %84, %70, %cst_40 {dimension_numbers = #tpu.dot_dimension_numbers<[1], [0], [0], [1], [0, 0, 1, 1], [], []>} : vector<8x8xbf16>, vector<8x64xbf16>, vector<8x64xf32> -> vector<8x64xf32>
    %86 = vector.extract_strided_slice %26 {offsets = [0, 192], sizes = [8, 64], strides = [1, 1]} : vector<8x512xbf16> to vector<8x64xbf16>
    %87 = vector.extract_strided_slice %27 {offsets = [0, 192], sizes = [8, 64], strides = [1, 1]} : vector<8x512xbf16> to vector<8x64xbf16>
    %88 = vector.extract_strided_slice %28 {offsets = [0, 192], sizes = [8, 64], strides = [1, 1]} : vector<8x512xbf16> to vector<8x64xbf16>
    "tpu.trace_start"() <{level = 10 : i32, message = "qd,kd->qk"}> : () -> ()
    %cst_41 = arith.constant dense<0.000000e+00> : vector<8x8xf32>
    %89 = tpu.matmul %86, %87, %cst_41 {dimension_numbers = #tpu.dot_dimension_numbers<[1], [1], [0], [0], [0, 0, 1, 0], [], []>} : vector<8x64xbf16>, vector<8x64xbf16>, vector<8x8xf32> -> vector<8x8xf32>
    %cst_42 = arith.constant -1.000000e+09 : f32
    "tpu.trace_stop"() : () -> ()
    %90 = vector.broadcast %cst_42 : f32 to vector<8x8xf32>
    %91 = arith.select %31, %90, %89 : vector<8x8xi1>, vector<8x8xf32>
    %cst_43 = arith.constant dense<0xFF800000> : vector<8xf32>
    %92 = vector.multi_reduction <maximumf>, %91, %cst_43 [1] : vector<8x8xf32> to vector<8xf32>
    %93 = vector.shape_cast %92 : vector<8xf32> to vector<8x1xf32>
    %94 = vector.broadcast %93 : vector<8x1xf32> to vector<8x8xf32>
    %95 = arith.subf %91, %94 : vector<8x8xf32>
    %96 = math.exp %95 : vector<8x8xf32>
    %cst_44 = arith.constant dense<0.000000e+00> : vector<8xf32>
    %97 = vector.multi_reduction <add>, %96, %cst_44 [1] : vector<8x8xf32> to vector<8xf32>
    %98 = vector.shape_cast %97 : vector<8xf32> to vector<8x1xf32>
    %99 = tpu.reciprocal %98 {approx = true} : vector<8x1xf32> -> vector<8x1xf32>
    %100 = vector.broadcast %99 : vector<8x1xf32> to vector<8x8xf32>
    %101 = arith.mulf %96, %100 : vector<8x8xf32>
    %102 = arith.truncf %101 : vector<8x8xf32> to vector<8x8xbf16>
    %cst_45 = arith.constant dense<0.000000e+00> : vector<8x64xf32>
    %103 = tpu.matmul %102, %88, %cst_45 {dimension_numbers = #tpu.dot_dimension_numbers<[1], [0], [0], [1], [0, 0, 1, 1], [], []>} : vector<8x8xbf16>, vector<8x64xbf16>, vector<8x64xf32> -> vector<8x64xf32>
    %104 = vector.extract_strided_slice %26 {offsets = [0, 256], sizes = [8, 64], strides = [1, 1]} : vector<8x512xbf16> to vector<8x64xbf16>
    %105 = vector.extract_strided_slice %27 {offsets = [0, 256], sizes = [8, 64], strides = [1, 1]} : vector<8x512xbf16> to vector<8x64xbf16>
    %106 = vector.extract_strided_slice %28 {offsets = [0, 256], sizes = [8, 64], strides = [1, 1]} : vector<8x512xbf16> to vector<8x64xbf16>
    "tpu.trace_start"() <{level = 10 : i32, message = "qd,kd->qk"}> : () -> ()
    %cst_46 = arith.constant dense<0.000000e+00> : vector<8x8xf32>
    %107 = tpu.matmul %104, %105, %cst_46 {dimension_numbers = #tpu.dot_dimension_numbers<[1], [1], [0], [0], [0, 0, 1, 0], [], []>} : vector<8x64xbf16>, vector<8x64xbf16>, vector<8x8xf32> -> vector<8x8xf32>
    %cst_47 = arith.constant -1.000000e+09 : f32
    "tpu.trace_stop"() : () -> ()
    %108 = vector.broadcast %cst_47 : f32 to vector<8x8xf32>
    %109 = arith.select %31, %108, %107 : vector<8x8xi1>, vector<8x8xf32>
    %cst_48 = arith.constant dense<0xFF800000> : vector<8xf32>
    %110 = vector.multi_reduction <maximumf>, %109, %cst_48 [1] : vector<8x8xf32> to vector<8xf32>
    %111 = vector.shape_cast %110 : vector<8xf32> to vector<8x1xf32>
    %112 = vector.broadcast %111 : vector<8x1xf32> to vector<8x8xf32>
    %113 = arith.subf %109, %112 : vector<8x8xf32>
    %114 = math.exp %113 : vector<8x8xf32>
    %cst_49 = arith.constant dense<0.000000e+00> : vector<8xf32>
    %115 = vector.multi_reduction <add>, %114, %cst_49 [1] : vector<8x8xf32> to vector<8xf32>
    %116 = vector.shape_cast %115 : vector<8xf32> to vector<8x1xf32>
    %117 = tpu.reciprocal %116 {approx = true} : vector<8x1xf32> -> vector<8x1xf32>
    %118 = vector.broadcast %117 : vector<8x1xf32> to vector<8x8xf32>
    %119 = arith.mulf %114, %118 : vector<8x8xf32>
    %120 = arith.truncf %119 : vector<8x8xf32> to vector<8x8xbf16>
    %cst_50 = arith.constant dense<0.000000e+00> : vector<8x64xf32>
    %121 = tpu.matmul %120, %106, %cst_50 {dimension_numbers = #tpu.dot_dimension_numbers<[1], [0], [0], [1], [0, 0, 1, 1], [], []>} : vector<8x8xbf16>, vector<8x64xbf16>, vector<8x64xf32> -> vector<8x64xf32>
    %122 = vector.extract_strided_slice %26 {offsets = [0, 320], sizes = [8, 64], strides = [1, 1]} : vector<8x512xbf16> to vector<8x64xbf16>
    %123 = vector.extract_strided_slice %27 {offsets = [0, 320], sizes = [8, 64], strides = [1, 1]} : vector<8x512xbf16> to vector<8x64xbf16>
    %124 = vector.extract_strided_slice %28 {offsets = [0, 320], sizes = [8, 64], strides = [1, 1]} : vector<8x512xbf16> to vector<8x64xbf16>
    "tpu.trace_start"() <{level = 10 : i32, message = "qd,kd->qk"}> : () -> ()
    %cst_51 = arith.constant dense<0.000000e+00> : vector<8x8xf32>
    %125 = tpu.matmul %122, %123, %cst_51 {dimension_numbers = #tpu.dot_dimension_numbers<[1], [1], [0], [0], [0, 0, 1, 0], [], []>} : vector<8x64xbf16>, vector<8x64xbf16>, vector<8x8xf32> -> vector<8x8xf32>
    %cst_52 = arith.constant -1.000000e+09 : f32
    "tpu.trace_stop"() : () -> ()
    %126 = vector.broadcast %cst_52 : f32 to vector<8x8xf32>
    %127 = arith.select %31, %126, %125 : vector<8x8xi1>, vector<8x8xf32>
    %cst_53 = arith.constant dense<0xFF800000> : vector<8xf32>
    %128 = vector.multi_reduction <maximumf>, %127, %cst_53 [1] : vector<8x8xf32> to vector<8xf32>
    %129 = vector.shape_cast %128 : vector<8xf32> to vector<8x1xf32>
    %130 = vector.broadcast %129 : vector<8x1xf32> to vector<8x8xf32>
    %131 = arith.subf %127, %130 : vector<8x8xf32>
    %132 = math.exp %131 : vector<8x8xf32>
    %cst_54 = arith.constant dense<0.000000e+00> : vector<8xf32>
    %133 = vector.multi_reduction <add>, %132, %cst_54 [1] : vector<8x8xf32> to vector<8xf32>
    %134 = vector.shape_cast %133 : vector<8xf32> to vector<8x1xf32>
    %135 = tpu.reciprocal %134 {approx = true} : vector<8x1xf32> -> vector<8x1xf32>
    %136 = vector.broadcast %135 : vector<8x1xf32> to vector<8x8xf32>
    %137 = arith.mulf %132, %136 : vector<8x8xf32>
    %138 = arith.truncf %137 : vector<8x8xf32> to vector<8x8xbf16>
    %cst_55 = arith.constant dense<0.000000e+00> : vector<8x64xf32>
    %139 = tpu.matmul %138, %124, %cst_55 {dimension_numbers = #tpu.dot_dimension_numbers<[1], [0], [0], [1], [0, 0, 1, 1], [], []>} : vector<8x8xbf16>, vector<8x64xbf16>, vector<8x64xf32> -> vector<8x64xf32>
    %140 = vector.extract_strided_slice %26 {offsets = [0, 384], sizes = [8, 64], strides = [1, 1]} : vector<8x512xbf16> to vector<8x64xbf16>
    %141 = vector.extract_strided_slice %27 {offsets = [0, 384], sizes = [8, 64], strides = [1, 1]} : vector<8x512xbf16> to vector<8x64xbf16>
    %142 = vector.extract_strided_slice %28 {offsets = [0, 384], sizes = [8, 64], strides = [1, 1]} : vector<8x512xbf16> to vector<8x64xbf16>
    "tpu.trace_start"() <{level = 10 : i32, message = "qd,kd->qk"}> : () -> ()
    %cst_56 = arith.constant dense<0.000000e+00> : vector<8x8xf32>
    %143 = tpu.matmul %140, %141, %cst_56 {dimension_numbers = #tpu.dot_dimension_numbers<[1], [1], [0], [0], [0, 0, 1, 0], [], []>} : vector<8x64xbf16>, vector<8x64xbf16>, vector<8x8xf32> -> vector<8x8xf32>
    %cst_57 = arith.constant -1.000000e+09 : f32
    "tpu.trace_stop"() : () -> ()
    %144 = vector.broadcast %cst_57 : f32 to vector<8x8xf32>
    %145 = arith.select %31, %144, %143 : vector<8x8xi1>, vector<8x8xf32>
    %cst_58 = arith.constant dense<0xFF800000> : vector<8xf32>
    %146 = vector.multi_reduction <maximumf>, %145, %cst_58 [1] : vector<8x8xf32> to vector<8xf32>
    %147 = vector.shape_cast %146 : vector<8xf32> to vector<8x1xf32>
    %148 = vector.broadcast %147 : vector<8x1xf32> to vector<8x8xf32>
    %149 = arith.subf %145, %148 : vector<8x8xf32>
    %150 = math.exp %149 : vector<8x8xf32>
    %cst_59 = arith.constant dense<0.000000e+00> : vector<8xf32>
    %151 = vector.multi_reduction <add>, %150, %cst_59 [1] : vector<8x8xf32> to vector<8xf32>
    %152 = vector.shape_cast %151 : vector<8xf32> to vector<8x1xf32>
    %153 = tpu.reciprocal %152 {approx = true} : vector<8x1xf32> -> vector<8x1xf32>
    %154 = vector.broadcast %153 : vector<8x1xf32> to vector<8x8xf32>
    %155 = arith.mulf %150, %154 : vector<8x8xf32>
    %156 = arith.truncf %155 : vector<8x8xf32> to vector<8x8xbf16>
    %cst_60 = arith.constant dense<0.000000e+00> : vector<8x64xf32>
    %157 = tpu.matmul %156, %142, %cst_60 {dimension_numbers = #tpu.dot_dimension_numbers<[1], [0], [0], [1], [0, 0, 1, 1], [], []>} : vector<8x8xbf16>, vector<8x64xbf16>, vector<8x64xf32> -> vector<8x64xf32>
    %158 = vector.extract_strided_slice %26 {offsets = [0, 448], sizes = [8, 64], strides = [1, 1]} : vector<8x512xbf16> to vector<8x64xbf16>
    %159 = vector.extract_strided_slice %27 {offsets = [0, 448], sizes = [8, 64], strides = [1, 1]} : vector<8x512xbf16> to vector<8x64xbf16>
    %160 = vector.extract_strided_slice %28 {offsets = [0, 448], sizes = [8, 64], strides = [1, 1]} : vector<8x512xbf16> to vector<8x64xbf16>
    "tpu.trace_start"() <{level = 10 : i32, message = "qd,kd->qk"}> : () -> ()
    %cst_61 = arith.constant dense<0.000000e+00> : vector<8x8xf32>
    %161 = tpu.matmul %158, %159, %cst_61 {dimension_numbers = #tpu.dot_dimension_numbers<[1], [1], [0], [0], [0, 0, 1, 0], [], []>} : vector<8x64xbf16>, vector<8x64xbf16>, vector<8x8xf32> -> vector<8x8xf32>
    %cst_62 = arith.constant -1.000000e+09 : f32
    "tpu.trace_stop"() : () -> ()
    %162 = vector.broadcast %cst_62 : f32 to vector<8x8xf32>
    %163 = arith.select %31, %162, %161 : vector<8x8xi1>, vector<8x8xf32>
    %cst_63 = arith.constant dense<0xFF800000> : vector<8xf32>
    %164 = vector.multi_reduction <maximumf>, %163, %cst_63 [1] : vector<8x8xf32> to vector<8xf32>
    %165 = vector.shape_cast %164 : vector<8xf32> to vector<8x1xf32>
    %166 = vector.broadcast %165 : vector<8x1xf32> to vector<8x8xf32>
    %167 = arith.subf %163, %166 : vector<8x8xf32>
    %168 = math.exp %167 : vector<8x8xf32>
    %cst_64 = arith.constant dense<0.000000e+00> : vector<8xf32>
    %169 = vector.multi_reduction <add>, %168, %cst_64 [1] : vector<8x8xf32> to vector<8xf32>
    %170 = vector.shape_cast %169 : vector<8xf32> to vector<8x1xf32>
    %171 = tpu.reciprocal %170 {approx = true} : vector<8x1xf32> -> vector<8x1xf32>
    %172 = vector.broadcast %171 : vector<8x1xf32> to vector<8x8xf32>
    %173 = arith.mulf %168, %172 : vector<8x8xf32>
    %174 = arith.truncf %173 : vector<8x8xf32> to vector<8x8xbf16>
    %cst_65 = arith.constant dense<0.000000e+00> : vector<8x64xf32>
    %175 = tpu.matmul %174, %160, %cst_65 {dimension_numbers = #tpu.dot_dimension_numbers<[1], [0], [0], [1], [0, 0, 1, 1], [], []>} : vector<8x8xbf16>, vector<8x64xbf16>, vector<8x64xf32> -> vector<8x64xf32>
    %176 = tpu.concatenate %49, %67, %85, %103, %121, %139, %157, %175 in 1 : vector<8x64xf32>, vector<8x64xf32>, vector<8x64xf32>, vector<8x64xf32>, vector<8x64xf32>, vector<8x64xf32>, vector<8x64xf32>, vector<8x64xf32> -> vector<8x512xf32>
    %177 = arith.truncf %176 : vector<8x512xf32> to vector<8x512xbf16>
    %c0_66 = arith.constant 0 : index
    %c0_67 = arith.constant 0 : index
    %178 = vector.load %arg10[%c0_66, %c0_67] : memref<512x512xbf16, #tpu.memory_space<vmem>>, vector<512x512xbf16>
    %cst_68 = arith.constant dense<0.000000e+00> : vector<8x512xf32>
    %179 = tpu.matmul %177, %178, %cst_68 {dimension_numbers = #tpu.dot_dimension_numbers<[1], [0], [0], [1], [0, 0, 1, 1], [], []>} : vector<8x512xbf16>, vector<512x512xbf16>, vector<8x512xf32> -> vector<8x512xf32>
    %c0_69 = arith.constant 0 : index
    %c0_70 = arith.constant 0 : index
    %180 = vector.load %arg11[%c0_69, %c0_70] : memref<1x512xf32, #tpu.memory_space<vmem>>, vector<1x512xf32>
    %181 = vector.broadcast %180 : vector<1x512xf32> to vector<8x512xf32>
    %182 = arith.addf %179, %181 : vector<8x512xf32>
    %c0_71 = arith.constant 0 : index
    %c0_72 = arith.constant 0 : index
    %c0_73 = arith.constant 0 : index
    %183 = vector.load %arg13[%c0_71, %c0_72, %c0_73] : memref<1x8x512xf32, #tpu.memory_space<vmem>>, vector<1x8x512xf32>
    %184 = vector.shape_cast %183 : vector<1x8x512xf32> to vector<8x512xf32>
    %185 = vector.shape_cast %182 : vector<8x512xf32> to vector<1x8x512xf32>
    tpu.vector_store %arg13[%c0_71, %c0_72, %c0_73], %185 {strides = array<i32>} : memref<1x8x512xf32, #tpu.memory_space<vmem>>, vector<1x8x512xf32>,
    return
  }
  func.func @transform_0(%arg0: i32) -> (i32, i32, i32) {
    %c0_i32 = arith.constant 0 : i32
    %c0_i32_0 = arith.constant 0 : i32
    %c0_i32_1 = arith.constant 0 : i32
    return %arg0, %c0_i32, %c0_i32_0 : i32, i32, i32
  }
  func.func @transform_1(%arg0: i32) -> (i32, i32, i32) {
    %c0_i32 = arith.constant 0 : i32
    %c0_i32_0 = arith.constant 0 : i32
    %c0_i32_1 = arith.constant 0 : i32
    return %arg0, %c0_i32, %c0_i32_0 : i32, i32, i32
  }
  func.func @transform_2(%arg0: i32) -> (i32, i32, i32) {
    %c0_i32 = arith.constant 0 : i32
    %c0_i32_0 = arith.constant 0 : i32
    %c0_i32_1 = arith.constant 0 : i32
    return %arg0, %c0_i32, %c0_i32_0 : i32, i32, i32
  }
  func.func @transform_3(%arg0: i32) -> (i32, i32) {
    %c0_i32 = arith.constant 0 : i32
    %c0_i32_0 = arith.constant 0 : i32
    %c0_i32_1 = arith.constant 0 : i32
    return %c0_i32, %c0_i32_0 : i32, i32
  }
  func.func @transform_4(%arg0: i32) -> (i32, i32) {
    %c0_i32 = arith.constant 0 : i32
    %c0_i32_0 = arith.constant 0 : i32
    %c0_i32_1 = arith.constant 0 : i32
    return %c0_i32, %c0_i32_0 : i32, i32
  }
  func.func @transform_5(%arg0: i32) -> (i32, i32) {
    %c0_i32 = arith.constant 0 : i32
    %c0_i32_0 = arith.constant 0 : i32
    %c0_i32_1 = arith.constant 0 : i32
    return %c0_i32, %c0_i32_0 : i32, i32
  }
  func.func @transform_6(%arg0: i32) -> (i32, i32) {
    %c0_i32 = arith.constant 0 : i32
    %c0_i32_0 = arith.constant 0 : i32
    %c0_i32_1 = arith.constant 0 : i32
    return %c0_i32, %c0_i32_0 : i32, i32
  }
  func.func @transform_7(%arg0: i32) -> (i32, i32) {
    %c0_i32 = arith.constant 0 : i32
    %c0_i32_0 = arith.constant 0 : i32
    %c0_i32_1 = arith.constant 0 : i32
    return %c0_i32, %c0_i32_0 : i32, i32
  }
  func.func @transform_8(%arg0: i32) -> (i32, i32) {
    %c0_i32 = arith.constant 0 : i32
    %c0_i32_0 = arith.constant 0 : i32
    %c0_i32_1 = arith.constant 0 : i32
    return %c0_i32, %c0_i32_0 : i32, i32
  }
  func.func @transform_9(%arg0: i32) -> (i32, i32) {
    %c0_i32 = arith.constant 0 : i32
    %c0_i32_0 = arith.constant 0 : i32
    %c0_i32_1 = arith.constant 0 : i32
    return %c0_i32, %c0_i32_0 : i32, i32
  }
  func.func @transform_10(%arg0: i32) -> (i32, i32) {
    %c0_i32 = arith.constant 0 : i32
    %c0_i32_0 = arith.constant 0 : i32
    %c0_i32_1 = arith.constant 0 : i32
    return %c0_i32, %c0_i32_0 : i32, i32
  }
  func.func @transform_11(%arg0: i32) -> (i32, i32) {
    %c0_i32 = arith.constant 0 : i32
    %c0_i32_0 = arith.constant 0 : i32
    %c0_i32_1 = arith.constant 0 : i32
    return %c0_i32, %c0_i32_0 : i32, i32
  }
  func.func @transform_12(%arg0: i32) -> (i32, i32, i32) {
    %c0_i32 = arith.constant 0 : i32
    %c0_i32_0 = arith.constant 0 : i32
    %c0_i32_1 = arith.constant 0 : i32
    return %arg0, %c0_i32, %c0_i32_0 : i32, i32, i32
  }
}

</mosaic_0001>

<bundles_post_ra>
// kernel: tpu_custom_call.1
= control target key start
LH: loop header
LB: loop body
LE: loop exit
PB: predicated region body
PF: predicated region fallthrough
CT: control target
= control target key end

     0   :  { %s8202_s0 = inlined_call_operand.hbm [shape: f32[2,8,512], index: 0, kind: input, shape index: {}]   ;;  %s8203_s1 = inlined_call_operand.hbm [shape: f32[2,8,512], index: 1, kind: input, shape index: {}]   ;;  %s8204_s2 = inlined_call_operand.hbm [shape: f32[2,8,512], index: 2, kind: input, shape index: {}]   ;;  %s8205_s3 = inlined_call_operand.hbm [shape: bf16[512,512], index: 3, kind: input, shape index: {}]   ;;  %s8206_s4 = inlined_call_operand.vmem [shape: f32[1,512], index: 4, kind: input, shape index: {}]   ;;  %s8207_s5 = inlined_call_operand.hbm [shape: bf16[512,512], index: 5, kind: input, shape index: {}]   ;;  %s8208_s6 = inlined_call_operand.vmem [shape: f32[1,512], index: 6, kind: input, shape index: {}]   ;;  %s8209_s7 = inlined_call_operand.hbm [shape: bf16[512,512], index: 7, kind: input, shape index: {}]   ;;  %s8210_s8 = inlined_call_operand.hbm [shape: f32[1,512], index: 8, kind: input, shape index: {}]   ;;  %s8211_s9 = inlined_call_operand.hbm [shape: bf16[512,512], index: 9, kind: input, shape index: {}]   ;;  %s8212_s10 = inlined_call_operand.hbm [shape: f32[1,512], index: 10, kind: input, shape index: {}]   ;;  %s8213_s11 = inlined_call_operand.vmem [shape: f32[8,8], index: 11, kind: input, shape index: {}]   ;;  %s8214_s12 = inlined_call_operand.hbm [shape: f32[2,8,512], index: 12, kind: output, shape index: {}]  }
   0x1   :  { %8234 = sst [smem:[#allocation30_spill]] %s8205_s3 }
   0x2   :  { %8235 = sst [smem:[#allocation31_spill]] %s8208_s6 }
   0x3   :  { %8236 = sst [smem:[#allocation32_spill]] %s8209_s7 }
   0x4   :  { %8237 = sst [smem:[#allocation33_spill]] %s8211_s9 }
   0x5   :  { %8238 = sst [smem:[#allocation34_spill]] %s8213_s11 }
   0x6   :  { %8239 = sst [smem:[#allocation35_spill]] %s8214_s12 }
   0x7   :  { %17 = vsyncpa [#allocation3], 0 }
   0x8   :  { %19 = vsyncpa [#allocation3 + $0x1], 0 }
   0x9   :  { %20 = vsyncpa [#allocation6], 0 }
   0xa   :  { %22 = vsyncpa [#allocation6 + $0x1], 0 }
   0xb   :  { %23 = vsyncpa [#allocation9], 0 }
   0xc   :  { %24 = vsyncpa [#allocation12], 0 }
   0xd   :  { %25 = vsyncpa [#allocation15], 0 }
   0xe   :  { %26 = vsyncpa [#allocation4], 0 }
   0xf   :  { %28 = vsyncpa [#allocation4 + $0x1], 0  ;;  %s7565_s21 = smov 0   ;;  %s7567_s22 = smov 0  }
  0x10   :  { %s7569_s23 = smov 0   ;;  %s7571_s24 = smov 0  }
  0x11 LB: > { %8240 = sst [smem:[#allocation24_spill]] %s7471_s21  ;;  %s7485_s25 = smov [#allocation8]   ;;  %s7483_s24 = sphi %s7571_s24, %s8280_s24   ;;  %s7479_s23 = sphi %s7569_s23, %s8284_s23   ;;  %s7475_s22 = sphi %s7567_s22, %s8283_s22   ;;  %s7471_s21 = sphi %s7565_s21, %s8282_s21  }
  0x12   : > { %8241 = sst [smem:[#allocation25_spill]] %s7483_s24  ;;  %s344_s26 = sshll.u32 %s7485_s25, 4  ;;  %s345_s26 = int_to_ptr.vmem [resolvable:$true] %s344_s26 }
  0x13   : > { %s7586_s27 = sadd.s32 4294967295, %s7483_s24   ;;  %p5538_p0 = scmp.ge.s32.totalorder %s7483_s24, 1 }
  0x14   : > { %p8225_p1 = scmp.eq.s32.totalorder %s7586_s27, 0  ;;  %p332_p2 = scmp.lt.s32.totalorder %s7483_s24, 3 }
  0x15   : > { %s7486_s29 = smov [#allocation11]   ;;  %s7487_s14 = smov [#allocation14]  }
  0x16   : > { %p7591_p3 = pnand %p5538_p0, %p332_p2  ;;  %s376_s30 = sshll.u32 %s7486_s29, 4  ;;  %s7604_s30 = int_to_ptr.vmem [resolvable:$true] %s376_s30 }
  0x17   : > { %s400_s15 = sshll.u32 %s7487_s14, 4  ;;  %s7174_s17 = scalar_lea.vmem %s345_s26, 16384  ;;  %s7606_s15 = int_to_ptr.vmem [resolvable:$true] %s400_s15 }
  0x18   : > { %s8242_s28 = scalar_select %p7591_p3, 1, 0 }
  0x19   : > { %p6263_p5 = pneg %p7591_p3  ;;  %p7175_p8 = scmp.ne.s32.totalorder %s345_s26, %s7174_s17 }
  0x1a   : > { %p7182_p11 = scmp.lt.s32.totalorder %s345_s26, %s345_s26  ;;  %p7183_p12 = scmp.lt.s32.totalorder %s7174_s17, %s7174_s17 }
  0x1b   : > { %p7600_p6 = pnand %p6263_p5, %p8225_p1 }
  0x1c   : > { %p7184_p13 = por %p7183_p12, %p7182_p11 }
  0x1d   : > { %s8243_s13 = scalar_select %p7600_p6, 1, 0 }
  0x1e   : > { %p7610_p7 = pneg %p7600_p6 }
  0x20   : > { %s8244_s16 = scalar_select %p7610_p7, 1, 0 }
  0x21   : > { %p7177_p9 = pnand %p7175_p8, %p7610_p7 }
  0x23   : > { %p7178_p10 = pneg %p7177_p9 }
  0x25   : > { %p7185_p0 = pnand %p7184_p13, %p7178_p10 }
  0x27   : > { %7188 = shalt.err (!%p7185_p0)
}
  0x28   : > { %s8216_s18 = smov 256   ;;  %s8217_s19 = smov 16  }
  0x29   : > { %s8245_s3 = sld [smem:[#allocation30_spill]]  ;;  %s7200_s29 = scalar_lea.vmem %s7604_s30, 16384 }
  0x2a   : > { %p7201_p2 = scmp.ne.s32.totalorder %s7604_s30, %s7200_s29  ;;  %p7208_p9 = scmp.lt.s32.totalorder %s7604_s30, %s7604_s30 }
  0x2b   : > { %p7209_p10 = scmp.lt.s32.totalorder %s7200_s29, %s7200_s29 }
  0x2c   : > { %p7203_p5 = pnand %p7201_p2, %p7610_p7 }
  0x2d   : > { %p7210_p11 = por %p7209_p10, %p7208_p9 }
  0x2e   : > { %p7204_p8 = pneg %p7203_p5 }
  0x2f   : > { %6266 = dma.hbm_to_vmem [thread:$0]  (!%p7600_p6), %s8245_s3, 16384, %s345_s26, [#allocation9], %s8216_s18, %s8216_s18, %s8217_s19  }
  0x30   : > { %p7211_p12 = pnand %p7210_p11, %p7204_p8 }
  0x32   : > { %7214 = shalt.err (!%p7211_p12)
}
  0x33   : > { %s8246_s7 = sld [smem:[#allocation32_spill]]  ;;  %s7226_s26 = scalar_lea.vmem %s7606_s15, 16384 }
  0x34   : > { %p7227_p13 = scmp.ne.s32.totalorder %s7606_s15, %s7226_s26  ;;  %p7234_p5 = scmp.lt.s32.totalorder %s7606_s15, %s7606_s15 }
  0x35   : > { %p7235_p8 = scmp.lt.s32.totalorder %s7226_s26, %s7226_s26 }
  0x36   : > { %p7229_p0 = pnand %p7227_p13, %p7610_p7 }
  0x37   : > { %p7236_p9 = por %p7235_p8, %p7234_p5 }
  0x38   : > { %p7230_p2 = pneg %p7229_p0 }
  0x39   : > { %6272 = dma.hbm_to_vmem [thread:$0]  (!%p7600_p6), %s8246_s7, 16384, %s7604_s30, [#allocation12], %s8216_s18, %s8216_s18, %s8217_s19  }
  0x3a   : > { %p7237_p10 = pnand %p7236_p9, %p7230_p2 }
  0x3c   : > { %7240 = shalt.err (!%p7237_p10)
}
  0x3d   : > { %s8247_s9 = sld [smem:[#allocation33_spill]]  ;;  %s5537_s30 = sadd.s32 4294967294, %s7483_s24  }
  0x3e   : > { %s7656_s29 = sadd.s32 1, %s7483_s24   ;;  %s41_s14 = sadd.s32 1, %s7479_s23 }
  0x3f   : > { %8248 = sst [smem:[#allocation26_spill]] %s7656_s29  ;;  %s38_s17 = ssub.s32 %s7483_s24, %s7656_s29 }
  0x40   : > { %p48_p11 = scmp.ne.s32.totalorder %s7479_s23, %s7475_s22  ;;  %p39_p12 = scmp.eq.s32.totalorder %s38_s17, 0 }
  0x41   : > { %p49_p13 = scmp.eq.s32.totalorder %s7483_s24, 0  ;;  %p54_p0 = scmp.ne.s32.totalorder %s7475_s22, %s7471_s21 }
  0x42   : > { %p319_p2 = scmp.eq.s32.totalorder %s7586_s27, 1  ;;  %p325_p10 = scmp.eq.s32.totalorder %s5537_s30, 1 }
  0x43   : > { %6278 = dma.hbm_to_vmem [thread:$0]  (!%p7600_p6), %s8247_s9, 16384, %s7606_s15, [#allocation15], %s8216_s18, %s8216_s18, %s8217_s19  }
  0x44   : > { %s7668_s26 = scalar_select %p39_p12, %s7479_s23, %s41_s14  }
  0x45   : > { %p50_p5 = por %p49_p13, %p48_p11  ;;  %p7672_p8 = por %p8225_p1, %p54_p0 }
  0x46   : > { %8249 = sst [smem:[#allocation27_spill]] %s7668_s26  ;;  %p7676_p9 = por %p319_p2, %p48_p11 }
  0x47   : > { %s8250_s15 = scalar_select %p7672_p8, 1, 0 }
  0x48   : > { %s8251_s20 = scalar_select %p7676_p9, 1, 0 }
  0x49   : > { %p6302_p4 = scmp.lt.s32.totalorder %s7483_s24, 2  ;;  %s8218_s25 = sand.u32 1, %s7479_s23  }
  0x4a   : > { %8252 = sst [smem:[#allocation28_spill]] %s8251_s20  ;;  %p7682_p3 = por %p325_p10, %p54_p0 }
  0x4b   : > { %s7688_s14 = sshll.u32 %s8218_s25, 5  ;;  %s7691_s18 = sshll.u32 %s7483_s24, 9 }
  0x4c   : > { %s8253_s17 = scalar_select %p7682_p3, 1, 0 }
  0x4d   : > { %p7693_p12 = pnand %p6302_p4, %p50_p5  ;;  %s447_s3 = sand.u32 1, %s7483_s24  }
  0x4e   : > { %8254 = sst [smem:[#allocation29_spill]] %s8253_s17  ;;  %s7702_s9 = scalar_lea.hbm %s8203_s1, %s7691_s18 }
  0x4f   : > { %s451_s25 = scalar_lea.vmem [#allocation5], %s7688_s14  ;;  %s7705_s29 = scalar_lea.sflag [#allocation6], %s447_s3 }
  0x50   : > { %s459_s26 = sshll.u32 %s451_s25, 4  ;;  %s7241_s17 = scalar_lea.hbm %s7702_s9, 512  ;;  %s460_s26 = int_to_ptr.vmem [resolvable:$true] %s459_s26 }
  0x51   : > { %p7242_p4 = scmp.ne.s32.totalorder %s7702_s9, %s7241_s17  ;;  %p7711_p11 = pneg %p7693_p12 }
  0x52   : > { %s7246_s24 = scalar_lea.hbm %s8203_s1, 1024  ;;  %p7247_p2 = scmp.lt.s32.totalorder %s7702_s9, %s8203_s1 }
  0x53   : > { %p7244_p13 = pnand %p7711_p11, %p7242_p4  ;;  %p7248_p5 = scmp.lt.s32.totalorder %s7246_s24, %s7241_s17 }
  0x55   : > { %p7245_p0 = pneg %p7244_p13  ;;  %p7249_p10 = por %p7248_p5, %p7247_p2 }
  0x57   : > { %p7250_p1 = pnand %p7249_p10, %p7245_p0 }
  0x59   : > { %7253 = shalt.err (!%p7250_p1)
}
  0x5a   : > { %s7254_s3 = scalar_lea.vmem %s460_s26, 512  ;;  %s7490_s20 = smov [#allocation5]  }
  0x5b   : > { %p7255_p3 = scmp.ne.s32.totalorder %s460_s26, %s7254_s3  ;;  %s7259_s11 = sshll.u32 %s7490_s20, 4  ;;  %s7260_s11 = int_to_ptr.vmem [resolvable:$false] %s7259_s11 }
  0x5c   : > { %s7261_s6 = scalar_lea.vmem %s7260_s11, 1024  ;;  %p7262_p4 = scmp.lt.s32.totalorder %s460_s26, %s7260_s11 }
  0x5d   : > { %p7257_p9 = pnand %p7255_p3, %p7711_p11  ;;  %p7263_p13 = scmp.lt.s32.totalorder %s7261_s6, %s7254_s3 }
  0x5f   : > { %p7258_p8 = pneg %p7257_p9  ;;  %p7264_p6 = por %p7263_p13, %p7262_p4 }
  0x61   : > { %p7265_p7 = pnand %p7264_p6, %p7258_p8 }
  0x63   : > { %7268 = shalt.err (!%p7265_p7)
}
  0x64   : > { %6288 = dma.hbm_to_vmem [thread:$0]  (!%p7693_p12), %s7702_s9, 512, %s460_s26, %s7705_s29  }
  0x65   : > { %s7491_s12 = smov [#allocation10]   ;;  %s7492_s17 = smov [#allocation13]  }
  0x66   : > { %s360_s24 = sshll.u32 %s7491_s12, 4  ;;  %s390_s7 = sshll.u32 %s7492_s17, 4  ;;  %s361_s24 = int_to_ptr.vmem [resolvable:$true] %s360_s24  ;;  %s391_s7 = int_to_ptr.vmem [resolvable:$true] %s390_s7 }
  0x67   : > { %s7280_s30 = scalar_lea.vmem %s361_s24, 16384  ;;  %p8257_p3 = scmp.ne.s32.totalorder %s8244_s16, 0 }
  0x68   : > { %p7281_p1 = scmp.ne.s32.totalorder %s361_s24, %s7280_s30  ;;  %p7288_p2 = scmp.lt.s32.totalorder %s361_s24, %s361_s24 }
  0x69   : > { %p7289_p5 = scmp.lt.s32.totalorder %s7280_s30, %s7280_s30 }
  0x6a   : > { %p7283_p9 = pnand %p7281_p1, %p8257_p3 }
  0x6b   : > { %p7290_p6 = por %p7289_p5, %p7288_p2 }
  0x6c   : > { %p7284_p0 = pneg %p7283_p9 }
  0x6e   : > { %p7291_p7 = pnand %p7290_p6, %p7284_p0 }
  0x70   : > { %7294 = shalt.err (!%p7291_p7)
}
  0x71   : > { %p8258_p8 = scmp.ne.s32.totalorder %s8243_s13, 0  ;;  %s8259_s6 = smov 16  }
  0x72   : > { %s8260_s11 = smov 256   ;;  %s7306_s20 = scalar_lea.vmem %s391_s7, 64 }
  0x73   : > { %6269 = dma.hbm_to_vmem [thread:$0]  (!%p8258_p8), %s8207_s5, 16384, %s361_s24, [#allocation9], %s8260_s11, %s8260_s11, %s8259_s6  }
  0x74   : > { %p7307_p10 = scmp.ne.s32.totalorder %s391_s7, %s7306_s20  ;;  %p7314_p1 = scmp.lt.s32.totalorder %s391_s7, %s391_s7 }
  0x75   : > { %p7315_p9 = scmp.lt.s32.totalorder %s7306_s20, %s7306_s20 }
  0x76   : > { %p7309_p4 = pnand %p7307_p10, %p8257_p3 }
  0x77   : > { %p7316_p0 = por %p7315_p9, %p7314_p1 }
  0x78   : > { %p7310_p13 = pneg %p7309_p4 }
  0x7a   : > { %p7317_p2 = pnand %p7316_p0, %p7310_p13 }
  0x7c   : > { %7320 = shalt.err (!%p7317_p2)
}
  0x7d   : > { %6275 = dma.hbm_to_vmem [thread:$0]  (!%p8258_p8), %s8210_s8, 64, %s391_s7, [#allocation12]  }
  0x7e   : > { %s7493_s12 = smov [#allocation16]  }
  0x7f   : > { %s414_s24 = sshll.u32 %s7493_s12, 4  ;;  %s415_s24 = int_to_ptr.vmem [resolvable:$true] %s414_s24 }
  0x80   : > { %s7332_s17 = scalar_lea.vmem %s415_s24, 64  ;;  %p7340_p10 = scmp.lt.s32.totalorder %s415_s24, %s415_s24 }
  0x81   : > { %p7333_p5 = scmp.ne.s32.totalorder %s415_s24, %s7332_s17  ;;  %p7341_p4 = scmp.lt.s32.totalorder %s7332_s17, %s7332_s17 }
  0x83   : > { %p7335_p6 = pnand %p7333_p5, %p8257_p3  ;;  %p7342_p1 = por %p7341_p4, %p7340_p10 }
  0x85   : > { %p7336_p7 = pneg %p7335_p6 }
  0x87   : > { %p7343_p13 = pnand %p7342_p1, %p7336_p7 }
  0x89   : > { %7346 = shalt.err (!%p7343_p13)
}
  0x8a   : > { %6281 = dma.hbm_to_vmem [thread:$0]  (!%p8258_p8), %s8212_s10, 64, %s415_s24, [#allocation15]  }
  0x8b   : > { %s7758_s16 = scalar_lea.hbm %s8202_s0, %s7691_s18  ;;  %s432_s9 = scalar_lea.vmem [#allocation2], %s7688_s14 }
  0x8c   : > { %s440_s26 = sshll.u32 %s432_s9, 4  ;;  %s8261_s13 = sand.u32 1, %s7479_s23   ;;  %s441_s26 = int_to_ptr.vmem [resolvable:$true] %s440_s26 }
  0x8d   : > { %s429_s20 = scalar_lea.sflag [#allocation3], %s8261_s13  ;;  %s7347_s25 = scalar_lea.hbm %s7758_s16, 512 }
  0x8e   : > { %p7348_p3 = scmp.ne.s32.totalorder %s7758_s16, %s7347_s25  ;;  %s7352_s24 = scalar_lea.hbm %s8202_s0, 1024 }
  0x8f   : > { %p7353_p8 = scmp.lt.s32.totalorder %s7758_s16, %s8202_s0  ;;  %p7354_p2 = scmp.lt.s32.totalorder %s7352_s24, %s7347_s25 }
  0x90   : > { %p7350_p9 = pnand %p7348_p3, %p7711_p11 }
  0x91   : > { %p7355_p5 = por %p7354_p2, %p7353_p8 }
  0x92   : > { %p7351_p0 = pneg %p7350_p9 }
  0x94   : > { %p7356_p6 = pnand %p7355_p5, %p7351_p0 }
  0x96   : > { %7359 = shalt.err (!%p7356_p6)
}
  0x97   : > { %s7360_s6 = scalar_lea.vmem %s441_s26, 512  ;;  %s7494_s7 = smov [#allocation2]  }
  0x98   : > { %p7361_p7 = scmp.ne.s32.totalorder %s441_s26, %s7360_s6  ;;  %s7365_s11 = sshll.u32 %s7494_s7, 4  ;;  %s7366_s11 = int_to_ptr.vmem [resolvable:$false] %s7365_s11 }
  0x99   : > { %s7367_s9 = scalar_lea.vmem %s7366_s11, 1024  ;;  %p7368_p1 = scmp.lt.s32.totalorder %s441_s26, %s7366_s11 }
  0x9a   : > { %p7363_p10 = pnand %p7361_p7, %p7711_p11  ;;  %p7369_p13 = scmp.lt.s32.totalorder %s7367_s9, %s7360_s6 }
  0x9c   : > { %p7364_p4 = pneg %p7363_p10  ;;  %p7370_p3 = por %p7369_p13, %p7368_p1 }
  0x9e   : > { %p7371_p9 = pnand %p7370_p3, %p7364_p4 }
  0xa0   : > { %7374 = shalt.err (!%p7371_p9)
}
  0xa1   : > { %6285 = dma.hbm_to_vmem [thread:$0]  (!%p7693_p12), %s7758_s16, 512, %s441_s26, %s429_s20  }
  0xa2   : > { %s476_s3 = scalar_lea.hbm %s8204_s2, %s7691_s18  ;;  %s470_s12 = scalar_lea.vmem [#allocation7], %s7688_s14 }
  0xa3   : > { %s478_s24 = sshll.u32 %s470_s12, 4  ;;  %s7375_s17 = scalar_lea.hbm %s476_s3, 512  ;;  %s479_s24 = int_to_ptr.vmem [resolvable:$true] %s478_s24 }
  0xa4   : > { %p7376_p0 = scmp.ne.s32.totalorder %s476_s3, %s7375_s17  ;;  %s7380_s7 = scalar_lea.hbm %s8204_s2, 1024 }
  0xa5   : > { %p7381_p5 = scmp.lt.s32.totalorder %s476_s3, %s8204_s2  ;;  %p7382_p6 = scmp.lt.s32.totalorder %s7380_s7, %s7375_s17 }
  0xa6   : > { %p7378_p8 = pnand %p7376_p0, %p7711_p11 }
  0xa7   : > { %p7383_p7 = por %p7382_p6, %p7381_p5 }
  0xa8   : > { %p7379_p2 = pneg %p7378_p8 }
  0xaa   : > { %p7384_p10 = pnand %p7383_p7, %p7379_p2 }
  0xac   : > { %7387 = shalt.err (!%p7384_p10)
}
  0xad   : > { %s7388_s18 = scalar_lea.vmem %s479_s24, 512  ;;  %s7495_s14 = smov [#allocation7]  }
  0xae   : > { %p7389_p4 = scmp.ne.s32.totalorder %s479_s24, %s7388_s18  ;;  %s7393_s16 = sshll.u32 %s7495_s14, 4  ;;  %s7394_s16 = int_to_ptr.vmem [resolvable:$false] %s7393_s16 }
  0xaf   : > { %s7395_s26 = scalar_lea.vmem %s7394_s16, 1024  ;;  %p7396_p3 = scmp.lt.s32.totalorder %s479_s24, %s7394_s16 }
  0xb0   : > { %p7391_p1 = pnand %p7389_p4, %p7711_p11  ;;  %p7397_p9 = scmp.lt.s32.totalorder %s7395_s26, %s7388_s18 }
  0xb2   : > { %p7392_p13 = pneg %p7391_p1  ;;  %p7398_p0 = por %p7397_p9, %p7396_p3 }
  0xb4   : > { %p7399_p8 = pnand %p7398_p0, %p7392_p13 }
  0xb6   : > { %7402 = shalt.err (!%p7399_p8)
}
  0xb7   : > { %6291 = dma.hbm_to_vmem [thread:$0]  (!%p7693_p12), %s476_s3, 512, %s479_s24, %s7705_s29  }
  0xb8   : > { %p8262_p2 = scmp.ne.s32.totalorder %s8242_s28, 0 }
  0xb9   : > { %s7800_s21 = sand.u32 (!%p8262_p2), 1, %s7475_s22   ;;  %p8263_p11 = scmp.ne.s32.totalorder (!%p8262_p2), %s8250_s15, 0 }
  0xba   : > { %487 = sbr.rel (%p8262_p2) target bundleno = 1904 (0x770), region = 68  ;;  %s7803_s20 = sshll.u32 (!%p8262_p2), %s7800_s21, 5 }
  0xbb   : > { %s490_s13 = scalar_lea.sflag (!%p8262_p2), [#allocation3], %s7800_s21  ;;  %s7807_s25 = scalar_lea.vmem (!%p8262_p2), [#allocation2], %s7803_s20 }
  0xbf   : > { %7446 = dma.done.wait (%p8263_p11), %s490_s13, 512  }
  0xc0   : > { %7448 = vsyncadd (%p8263_p11), %s490_s13, 4294966784  ;;  %s498_s28 = sand.u32 1, %s7586_s27   ;;  %s7815_s29 = scalar_lea.vmem [#allocation5], %s7803_s20 }
  0xc1   : > { %s499_s19 = scalar_lea.sflag [#allocation6], %s498_s28 }
  0xc2   : > { %7450 = dma.done.wait (%p8263_p11), %s499_s19, 1024  }
  0xc3   : > { %7452 = vsyncadd (%p8263_p11), %s499_s19, 4294966272  ;;  %s7822_s3 = scalar_lea.vmem [#allocation7], %s7803_s20  ;;  %p8264_p12 = scmp.eq.s32.totalorder %s7586_s27, 0 }
  0xc5   : > { %7454 = dma.done.wait (%p8264_p12), [#allocation9], 32768   ;;  %p8265_p5 = pmov %p8264_p12 }
  0xc7   : > { %7456 = vsyncadd (%p8265_p5), [#allocation9], 4294934528  ;;  %p8266_p6 = pmov %p8265_p5 }
  0xc8   : > { %p8267_p7 = pmov %p8265_p5 }
  0xc9   : > { %7458 = dma.done.wait (%p8266_p6), [#allocation12], 16448  }
  0xca   : > { %7460 = vsyncadd (%p8267_p7), [#allocation12], 4294950848  ;;  %p8268_p10 = pmov %p8265_p5 }
  0xcb   : > { %p8269_p4 = pmov %p8265_p5 }
  0xcc   : > { %7462 = dma.done.wait (%p8268_p10), [#allocation15], 16448  }
  0xcd   : > { %7464 = vsyncadd (%p8269_p4), [#allocation15], 4294950848  ;;  %v6363_v0 = vld [vmem:[#allocation8 + $0xe4] ss:$16 sps:$4 sm:$0xff]   ;;  %v6367_v2 = vld [vmem:[#allocation8 + $0xe0] ss:$16 sps:$4 sm:$0xff]  }
  0xce   : > { %v6365_v1 = vld [vmem:[#allocation8 + $0x2e4] ss:$16 sps:$4 sm:$0xff]   ;;  %1401 = vmatprep.subr.bf16.mxu0 %v6363_v0  ;;  %v6368_v3 = vld [vmem:[#allocation8 + $0x2e0] ss:$16 sps:$4 sm:$0xff]   ;;  %v588_v46 = vld [vmem:[%s7807_s25 + $0x8] sm:$0xff]  ;;  %s8270_s30 = sld [smem:[#allocation31_spill]] }
  0xcf   : > { %1442 = vmatprep.subr.bf16.mxu1 %v6365_v1  ;;  %v6369_v4 = vld [vmem:[#allocation8 + $0xc4] ss:$16 sps:$4 sm:$0xff]   ;;  %1402 = vmatpush1.bf16.msra.mxu0 %v6367_v2  ;;  %v6373_v6 = vld [vmem:[#allocation8 + $0xc0] ss:$16 sps:$4 sm:$0xff]   ;;  %v7837_v49 = vpack.c.bf16 %v588_v46, %v588_v46  ;;  %v590_v50 = vld [vmem:[%s7807_s25 + $0x18] sm:$0xff]  ;;  %vm7497_vm0 = vmmov 0  }
  0xd0   : > { %1443 = vmatpush1.bf16.msra.mxu1 %v6368_v3  ;;  %v6371_v5 = vld [vmem:[#allocation8 + $0x2c4] ss:$16 sps:$4 sm:$0xff]   ;;  %1403 = vmatprep.subr.bf16.mxu0 %v6369_v4  ;;  %v6374_v7 = vld [vmem:[#allocation8 + $0x2c0] ss:$16 sps:$4 sm:$0xff]   ;;  %v594_v52 = vpack.c.bf16 %v590_v50, %v590_v50  ;;  %v6513_v46 = vld [vmem:[#allocation8 + $0x1c8] ss:$16 sps:$4 sm:$0xff]  }
  0xd1   : > { %1444 = vmatprep.subr.bf16.mxu1 %v6371_v5  ;;  %v6375_v8 = vld [vmem:[#allocation8 + $0xa4] ss:$16 sps:$4 sm:$0xff]   ;;  %v6379_v10 = vld [vmem:[#allocation8 + $0xa0] ss:$16 sps:$4 sm:$0xff]   ;;  %1433 = vmatprep.mubr.bf16.mxu0 %v7837_v49  ;;  %v6519_v50 = vld [vmem:[#allocation8 + $0x1a8] ss:$16 sps:$4 sm:$0xff]  }
  0xd2   : > { %v6377_v9 = vld [vmem:[#allocation8 + $0x2a4] ss:$16 sps:$4 sm:$0xff]   ;;  %v6380_v11 = vld [vmem:[#allocation8 + $0x2a0] ss:$16 sps:$4 sm:$0xff]   ;;  %1474 = vmatprep.mubr.bf16.mxu1 %v594_v52  ;;  %vm3491_vm1 = vcmask 523264   ;;  %s7498_s6 = smov 64  }
  0xd3   : > { %1404 = vmatpush1.bf16.msra.mxu0 %v6373_v6  ;;  %v6381_v12 = vld [vmem:[#allocation8 + $0x84] ss:$16 sps:$4 sm:$0xff]   ;;  %v6385_v14 = vld [vmem:[#allocation8 + $0x80] ss:$16 sps:$4 sm:$0xff]   ;;  %v6461_v6 = vld [vmem:[#allocation8 + $0xec] ss:$16 sps:$4 sm:$0xff]  }
  0xd4   : > { %1445 = vmatpush1.bf16.msra.mxu1 %v6374_v7  ;;  %1405 = vmatprep.subr.bf16.mxu0 %v6375_v8  ;;  %v6383_v13 = vld [vmem:[#allocation8 + $0x284] ss:$16 sps:$4 sm:$0xff]   ;;  %v6386_v15 = vld [vmem:[#allocation8 + $0x280] ss:$16 sps:$4 sm:$0xff]   ;;  %v6464_v7 = vld [vmem:[#allocation8 + $0x2ec] ss:$16 sps:$4 sm:$0xff]  }
  0xd5   : > { %1446 = vmatprep.subr.bf16.mxu1 %v6377_v9  ;;  %v6387_v16 = vld [vmem:[#allocation8 + $0x64] ss:$16 sps:$4 sm:$0xff]   ;;  %v6391_v18 = vld [vmem:[#allocation8 + $0x60] ss:$16 sps:$4 sm:$0xff]   ;;  %vm3555_vm2 = vcmask 1043456   ;;  %s8271_s9 = sld [smem:[#allocation34_spill]] }
  0xd6   : > { %v6389_v17 = vld [vmem:[#allocation8 + $0x264] ss:$16 sps:$4 sm:$0xff]   ;;  %v6392_v19 = vld [vmem:[#allocation8 + $0x260] ss:$16 sps:$4 sm:$0xff]   ;;  %vm3539_vm4 = vcmask 64512   ;;  %s585_s18 = scalar_lea.vmem [#allocation17], %s7803_s20 }
  0xd7   : > { %1406 = vmatpush1.bf16.msra.mxu0 %v6379_v10  ;;  %v6393_v20 = vld [vmem:[#allocation8 + $0x44] ss:$16 sps:$4 sm:$0xff]   ;;  %v6397_v22 = vld [vmem:[#allocation8 + $0x40] ss:$16 sps:$4 sm:$0xff]   ;;  %v6459_v10 = vld [vmem:[#allocation8 + $0xe8] ss:$16 sps:$4 sm:$0xff]  }
  0xd8   : > { %1447 = vmatpush1.bf16.msra.mxu1 %v6380_v11  ;;  %1407 = vmatprep.subr.bf16.mxu0 %v6381_v12  ;;  %v6395_v21 = vld [vmem:[#allocation8 + $0x244] ss:$16 sps:$4 sm:$0xff]   ;;  %v6398_v23 = vld [vmem:[#allocation8 + $0x240] ss:$16 sps:$4 sm:$0xff]   ;;  %v6462_v11 = vld [vmem:[#allocation8 + $0x2e8] ss:$16 sps:$4 sm:$0xff]  }
  0xd9   : > { %1448 = vmatprep.subr.bf16.mxu1 %v6383_v13  ;;  %v6399_v24 = vld [vmem:[#allocation8 + $0x24] ss:$16 sps:$4 sm:$0xff]   ;;  %v6403_v26 = vld [vmem:[#allocation8 + $0x20] ss:$16 sps:$4 sm:$0xff]   ;;  %v6467_v12 = vld [vmem:[#allocation8 + $0xcc] ss:$16 sps:$4 sm:$0xff]  }
  0xda   : > { %v6401_v25 = vld [vmem:[#allocation8 + $0x224] ss:$16 sps:$4 sm:$0xff]   ;;  %v6404_v27 = vld [vmem:[#allocation8 + $0x220] ss:$16 sps:$4 sm:$0xff]   ;;  %v6470_v13 = vld [vmem:[#allocation8 + $0x2cc] ss:$16 sps:$4 sm:$0xff]  }
  0xdb   : > { %1408 = vmatpush1.bf16.msra.mxu0 %v6385_v14  ;;  %v6405_v28 = vld [vmem:[#allocation8 + $0x4] ss:$16 sps:$4 sm:$0xff]   ;;  %v6409_v30 = vld [vmem:[#allocation8] ss:$16 sps:$4 sm:$0xff]   ;;  %v6465_v14 = vld [vmem:[#allocation8 + $0xc8] ss:$16 sps:$4 sm:$0xff]  }
  0xdc   : > { %1449 = vmatpush1.bf16.msra.mxu1 %v6386_v15  ;;  %1409 = vmatprep.subr.bf16.mxu0 %v6387_v16  ;;  %v6407_v29 = vld [vmem:[#allocation8 + $0x204] ss:$16 sps:$4 sm:$0xff]   ;;  %v6410_v31 = vld [vmem:[#allocation8 + $0x200] ss:$16 sps:$4 sm:$0xff]   ;;  %v6468_v15 = vld [vmem:[#allocation8 + $0x2c8] ss:$16 sps:$4 sm:$0xff]  }
  0xdd   : > { %1450 = vmatprep.subr.bf16.mxu1 %v6389_v17  ;;  %v6411_v32 = vld [vmem:[#allocation8 + $0x1e4] ss:$16 sps:$4 sm:$0xff]   ;;  %v6415_v34 = vld [vmem:[#allocation8 + $0x1e0] ss:$16 sps:$4 sm:$0xff]   ;;  %v6473_v16 = vld [vmem:[#allocation8 + $0xac] ss:$16 sps:$4 sm:$0xff]  }
  0xde   : > { %v6413_v33 = vld [vmem:[#allocation8 + $0x3e4] ss:$16 sps:$4 sm:$0xff]   ;;  %v6416_v35 = vld [vmem:[#allocation8 + $0x3e0] ss:$16 sps:$4 sm:$0xff]   ;;  %v6476_v17 = vld [vmem:[#allocation8 + $0x2ac] ss:$16 sps:$4 sm:$0xff]  }
  0xdf   : > { %1410 = vmatpush1.bf16.msra.mxu0 %v6391_v18  ;;  %v6417_v36 = vld [vmem:[#allocation8 + $0x1c4] ss:$16 sps:$4 sm:$0xff]   ;;  %v6421_v38 = vld [vmem:[#allocation8 + $0x1c0] ss:$16 sps:$4 sm:$0xff]   ;;  %v6471_v18 = vld [vmem:[#allocation8 + $0xa8] ss:$16 sps:$4 sm:$0xff]  }
  0xe0   : > { %1451 = vmatpush1.bf16.msra.mxu1 %v6392_v19  ;;  %1411 = vmatprep.subr.bf16.mxu0 %v6393_v20  ;;  %v6419_v37 = vld [vmem:[#allocation8 + $0x3c4] ss:$16 sps:$4 sm:$0xff]   ;;  %v6422_v39 = vld [vmem:[#allocation8 + $0x3c0] ss:$16 sps:$4 sm:$0xff]   ;;  %v6474_v19 = vld [vmem:[#allocation8 + $0x2a8] ss:$16 sps:$4 sm:$0xff]  }
  0xe1   : > { %1452 = vmatprep.subr.bf16.mxu1 %v6395_v21  ;;  %v6423_v40 = vld [vmem:[#allocation8 + $0x1a4] ss:$16 sps:$4 sm:$0xff]   ;;  %v6427_v42 = vld [vmem:[#allocation8 + $0x1a0] ss:$16 sps:$4 sm:$0xff]   ;;  %v6479_v20 = vld [vmem:[#allocation8 + $0x8c] ss:$16 sps:$4 sm:$0xff]  }
  0xe2   : > { %v6425_v41 = vld [vmem:[#allocation8 + $0x3a4] ss:$16 sps:$4 sm:$0xff]   ;;  %v6428_v43 = vld [vmem:[#allocation8 + $0x3a0] ss:$16 sps:$4 sm:$0xff]   ;;  %v6482_v21 = vld [vmem:[#allocation8 + $0x28c] ss:$16 sps:$4 sm:$0xff]  }
  0xe3   : > { %1412 = vmatpush1.bf16.msra.mxu0 %v6397_v22  ;;  %v6429_v44 = vld [vmem:[#allocation8 + $0x184] ss:$16 sps:$4 sm:$0xff]   ;;  %v6433_v47 = vld [vmem:[#allocation8 + $0x180] ss:$16 sps:$4 sm:$0xff]   ;;  %v6477_v22 = vld [vmem:[#allocation8 + $0x88] ss:$16 sps:$4 sm:$0xff]  }
  0xe4   : > { %1453 = vmatpush1.bf16.msra.mxu1 %v6398_v23  ;;  %1413 = vmatprep.subr.bf16.mxu0 %v6399_v24  ;;  %v6431_v45 = vld [vmem:[#allocation8 + $0x384] ss:$16 sps:$4 sm:$0xff]   ;;  %v6434_v48 = vld [vmem:[#allocation8 + $0x380] ss:$16 sps:$4 sm:$0xff]   ;;  %v6480_v23 = vld [vmem:[#allocation8 + $0x288] ss:$16 sps:$4 sm:$0xff]  }
  0xe5   : > { %1454 = vmatprep.subr.bf16.mxu1 %v6401_v25  ;;  %v6435_v51 = vld [vmem:[#allocation8 + $0x164] ss:$16 sps:$4 sm:$0xff]   ;;  %v6439_v54 = vld [vmem:[#allocation8 + $0x160] ss:$16 sps:$4 sm:$0xff]   ;;  %v6485_v24 = vld [vmem:[#allocation8 + $0x6c] ss:$16 sps:$4 sm:$0xff]  }
  0xe6   : > { %v6437_v53 = vld [vmem:[#allocation8 + $0x364] ss:$16 sps:$4 sm:$0xff]   ;;  %v6440_v55 = vld [vmem:[#allocation8 + $0x360] ss:$16 sps:$4 sm:$0xff]   ;;  %v6488_v25 = vld [vmem:[#allocation8 + $0x26c] ss:$16 sps:$4 sm:$0xff]  }
  0xe7   : > { %1414 = vmatpush1.bf16.msra.mxu0 %v6403_v26  ;;  %v6441_v56 = vld [vmem:[#allocation8 + $0x144] ss:$16 sps:$4 sm:$0xff]   ;;  %v6445_v58 = vld [vmem:[#allocation8 + $0x140] ss:$16 sps:$4 sm:$0xff]   ;;  %v6483_v26 = vld [vmem:[#allocation8 + $0x68] ss:$16 sps:$4 sm:$0xff]  }
  0xe8   : > { %1455 = vmatpush1.bf16.msra.mxu1 %v6404_v27  ;;  %1415 = vmatprep.subr.bf16.mxu0 %v6405_v28  ;;  %v6443_v57 = vld [vmem:[#allocation8 + $0x344] ss:$16 sps:$4 sm:$0xff]   ;;  %v6446_v59 = vld [vmem:[#allocation8 + $0x340] ss:$16 sps:$4 sm:$0xff]   ;;  %v6486_v27 = vld [vmem:[#allocation8 + $0x268] ss:$16 sps:$4 sm:$0xff]  }
  0xe9   : > { %1456 = vmatprep.subr.bf16.mxu1 %v6407_v29  ;;  %v6447_v60 = vld [vmem:[#allocation8 + $0x124] ss:$16 sps:$4 sm:$0xff]   ;;  %v6451_v62 = vld [vmem:[#allocation8 + $0x120] ss:$16 sps:$4 sm:$0xff]   ;;  %v6491_v28 = vld [vmem:[#allocation8 + $0x4c] ss:$16 sps:$4 sm:$0xff]  }
  0xea   : > { %v6449_v61 = vld [vmem:[#allocation8 + $0x324] ss:$16 sps:$4 sm:$0xff]   ;;  %v6452_v63 = vld [vmem:[#allocation8 + $0x320] ss:$16 sps:$4 sm:$0xff]   ;;  %v6494_v29 = vld [vmem:[#allocation8 + $0x24c] ss:$16 sps:$4 sm:$0xff]  }
  0xeb   : > { %1416 = vmatpush1.bf16.msra.mxu0 %v6409_v30  ;;  %v6453_v0 = vld [vmem:[#allocation8 + $0x104] ss:$16 sps:$4 sm:$0xff]   ;;  %v6457_v2 = vld [vmem:[#allocation8 + $0x100] ss:$16 sps:$4 sm:$0xff]   ;;  %v6489_v30 = vld [vmem:[#allocation8 + $0x48] ss:$16 sps:$4 sm:$0xff]  }
  0xec   : > { %1457 = vmatpush1.bf16.msra.mxu1 %v6410_v31  ;;  %1417 = vmatprep.subr.bf16.mxu0 %v6411_v32  ;;  %v6455_v1 = vld [vmem:[#allocation8 + $0x304] ss:$16 sps:$4 sm:$0xff]   ;;  %v6458_v3 = vld [vmem:[#allocation8 + $0x300] ss:$16 sps:$4 sm:$0xff]   ;;  %v6492_v31 = vld [vmem:[#allocation8 + $0x248] ss:$16 sps:$4 sm:$0xff]  }
  0xed   : > { %1458 = vmatprep.subr.bf16.mxu1 %v6413_v33  ;;  %v587_v4 = vld [vmem:[%s7807_s25] sm:$0xff]  ;;  %v589_v5 = vld [vmem:[%s7807_s25 + $0x10] sm:$0xff]  ;;  %v6497_v32 = vld [vmem:[#allocation8 + $0x2c] ss:$16 sps:$4 sm:$0xff]   ;;  %s8272_s14 = sld [smem:[#allocation28_spill]]  ;;  %s6102_s16 = sshll.u32 %s7586_s27, 9 }
  0xee   : > { %v7843_v8 = vpack.c.bf16 %v587_v4, %v587_v4  ;;  %v7845_v9 = vpack.c.bf16 %v589_v5, %v589_v5  ;;  %v6500_v33 = vld [vmem:[#allocation8 + $0x22c] ss:$16 sps:$4 sm:$0xff]   ;;  %s5367_s26 = sshll.u32 %s585_s18, 4  ;;  %s8273_s25 = sld [smem:[#allocation35_spill]]  ;;  %s8161_s26 = int_to_ptr.vmem [resolvable:$true] %s5367_s26 }
  0xef   : > { %1418 = vmatpush2.bf16.msra.mxu0 %v6415_v34  ;;  %v6495_v34 = vld [vmem:[#allocation8 + $0x28] ss:$16 sps:$4 sm:$0xff]   ;;  %v6551_v4 = vld [vmem:[#allocation8 + $0x10c] ss:$16 sps:$4 sm:$0xff]   ;;  %s5353_s27 = scalar_lea.sflag [#allocation4], %s7800_s21  ;;  %s7403_s19 = scalar_lea.vmem %s8161_s26, 512 }
  0xf0   : > { %1459 = vmatpush2.bf16.msra.mxu1 %v6416_v35  ;;  %1419 = vmatprep.subr.bf16.mxu0 %v6417_v36  ;;  %v6498_v35 = vld [vmem:[#allocation8 + $0x228] ss:$16 sps:$4 sm:$0xff]   ;;  %v6503_v36 = vld [vmem:[#allocation8 + $0xc] ss:$16 sps:$4 sm:$0xff]   ;;  %p7404_p1 = scmp.ne.s32.totalorder %s8161_s26, %s7403_s19 }
  0xf1   : > { %1460 = vmatprep.subr.bf16.mxu1 %v6419_v37  ;;  %v6506_v37 = vld [vmem:[#allocation8 + $0x20c] ss:$16 sps:$4 sm:$0xff]  }
  0xf2   : > { %v6554_v5 = vld [vmem:[#allocation8 + $0x30c] ss:$16 sps:$4 sm:$0xff]  }
  0xf3   : > { %1420 = vmatpush2.bf16.msra.mxu0 %v6421_v38  ;;  %v6501_v38 = vld [vmem:[#allocation8 + $0x8] ss:$16 sps:$4 sm:$0xff]   ;;  %p8274_p13 = scmp.ne.s32.totalorder %s8272_s14, 0 }
  0xf4   : > { %1461 = vmatpush2.bf16.msra.mxu1 %v6422_v39  ;;  %1421 = vmatprep.subr.bf16.mxu0 %v6423_v40  ;;  %v6504_v39 = vld [vmem:[#allocation8 + $0x208] ss:$16 sps:$4 sm:$0xff]   ;;  %v6509_v40 = vld [vmem:[#allocation8 + $0x1ec] ss:$16 sps:$4 sm:$0xff]   ;;  %s8159_s28 = scalar_lea.hbm %s8273_s25, %s6102_s16 }
  0xf5   : > { %1462 = vmatprep.subr.bf16.mxu1 %v6425_v41  ;;  %v6512_v41 = vld [vmem:[#allocation8 + $0x3ec] ss:$16 sps:$4 sm:$0xff]   ;;  %p7405_p3 = pnand %p7404_p1, %p8274_p13 }
  0xf7   : > { %1422 = vmatpush2.bf16.msra.mxu0 %v6427_v42  ;;  %v6507_v42 = vld [vmem:[#allocation8 + $0x1e8] ss:$16 sps:$4 sm:$0xff]   ;;  %p7406_p9 = pneg %p7405_p3 }
  0xf8   : > { %1463 = vmatpush2.bf16.msra.mxu1 %v6428_v43  ;;  %1423 = vmatprep.subr.bf16.mxu0 %v6429_v44  ;;  %v6510_v43 = vld [vmem:[#allocation8 + $0x3e8] ss:$16 sps:$4 sm:$0xff]   ;;  %v6515_v44 = vld [vmem:[#allocation8 + $0x1cc] ss:$16 sps:$4 sm:$0xff]  }
  0xf9   : > { %1464 = vmatprep.subr.bf16.mxu1 %v6431_v45  ;;  %v6518_v45 = vld [vmem:[#allocation8 + $0x3cc] ss:$16 sps:$4 sm:$0xff]  }
  0xfb   : > { %1424 = vmatpush2.bf16.msra.mxu0 %v6433_v47  ;;  %v6516_v47 = vld [vmem:[#allocation8 + $0x3c8] ss:$16 sps:$4 sm:$0xff]  }
  0xfc   : > { %1465 = vmatpush2.bf16.msra.mxu1 %v6434_v48  ;;  %1425 = vmatprep.subr.bf16.mxu0 %v6435_v51  ;;  %v6521_v48 = vld [vmem:[#allocation8 + $0x1ac] ss:$16 sps:$4 sm:$0xff]   ;;  %v6522_v51 = vld [vmem:[#allocation8 + $0x3a8] ss:$16 sps:$4 sm:$0xff]  }
  0xfd   : > { %1466 = vmatprep.subr.bf16.mxu1 %v6437_v53  ;;  %v6530_v53 = vld [vmem:[#allocation8 + $0x38c] ss:$16 sps:$4 sm:$0xff]  }
  0xff   : > { %1426 = vmatpush2.bf16.msra.mxu0 %v6439_v54  ;;  %v6525_v54 = vld [vmem:[#allocation8 + $0x188] ss:$16 sps:$4 sm:$0xff]  }
 0x100   : > { %1467 = vmatpush2.bf16.msra.mxu1 %v6440_v55  ;;  %1427 = vmatprep.subr.bf16.mxu0 %v6441_v56  ;;  %v6528_v55 = vld [vmem:[#allocation8 + $0x388] ss:$16 sps:$4 sm:$0xff]   ;;  %v6533_v56 = vld [vmem:[#allocation8 + $0x16c] ss:$16 sps:$4 sm:$0xff]  }
 0x101   : > { %1468 = vmatprep.subr.bf16.mxu1 %v6443_v57  ;;  %v6536_v57 = vld [vmem:[#allocation8 + $0x36c] ss:$16 sps:$4 sm:$0xff]  }
 0x103   : > { %1428 = vmatpush2.bf16.msra.mxu0 %v6445_v58  ;;  %v6531_v58 = vld [vmem:[#allocation8 + $0x168] ss:$16 sps:$4 sm:$0xff]  }
 0x104   : > { %1469 = vmatpush2.bf16.msra.mxu1 %v6446_v59  ;;  %1429 = vmatprep.subr.bf16.mxu0 %v6447_v60  ;;  %v6534_v59 = vld [vmem:[#allocation8 + $0x368] ss:$16 sps:$4 sm:$0xff]   ;;  %v6539_v60 = vld [vmem:[#allocation8 + $0x14c] ss:$16 sps:$4 sm:$0xff]  }
 0x105   : > { %1470 = vmatprep.subr.bf16.mxu1 %v6449_v61  ;;  %v6542_v61 = vld [vmem:[#allocation8 + $0x34c] ss:$16 sps:$4 sm:$0xff]  }
 0x107   : > { %1430 = vmatpush2.bf16.msra.mxu0 %v6451_v62  ;;  %v6537_v62 = vld [vmem:[#allocation8 + $0x148] ss:$16 sps:$4 sm:$0xff]  }
 0x108   : > { %1471 = vmatpush2.bf16.msra.mxu1 %v6452_v63  ;;  %1431 = vmatprep.subr.bf16.mxu0 %v6453_v0  ;;  %v6540_v63 = vld [vmem:[#allocation8 + $0x348] ss:$16 sps:$4 sm:$0xff]   ;;  %v6545_v0 = vld [vmem:[#allocation8 + $0x12c] ss:$16 sps:$4 sm:$0xff]  }
 0x109   : > { %1472 = vmatprep.subr.bf16.mxu1 %v6455_v1  ;;  %v6548_v1 = vld [vmem:[#allocation8 + $0x32c] ss:$16 sps:$4 sm:$0xff]  }
 0x10b   : > { %1432 = vmatpush2.bf16.msra.mxu0 %v6457_v2  ;;  %v6543_v2 = vld [vmem:[#allocation8 + $0x128] ss:$16 sps:$4 sm:$0xff]  }
 0x10c   : > { %1473 = vmatpush2.bf16.msra.mxu1 %v6458_v3  ;;  %1483 = vmatprep.subr.bf16.mxu0 %v6461_v6  ;;  %v6546_v3 = vld [vmem:[#allocation8 + $0x328] ss:$16 sps:$4 sm:$0xff]  }
 0x10d   : > { %1524 = vmatprep.subr.bf16.mxu1 %v6464_v7  ;;  %v6549_v6 = vld [vmem:[#allocation8 + $0x108] ss:$16 sps:$4 sm:$0xff]  }
 0x10e   : > { %1434 = vmatmul.mubr.bf16.vlgmr.msra.gmra.mxu0 %v7843_v8  ;;  %v6552_v7 = vld [vmem:[#allocation8 + $0x308] ss:$16 sps:$4 sm:$0xff]  }
 0x10f   : > { %1475 = vmatmul.mubr.bf16.vlgmr.msra.gmra.mxu1 %v7845_v9  ;;  %1484 = vmatpush1.bf16.msra.mxu0 %v6459_v10  ;;  %v6557_v10 = vld [vmem:[#allocation10 + $0xe4] ss:$16 sps:$4 sm:$0xff]  }
 0x110   : > { %1525 = vmatpush1.bf16.msra.mxu1 %v6462_v11  ;;  %1485 = vmatprep.subr.bf16.mxu0 %v6467_v12  ;;  %v6560_v11 = vld [vmem:[#allocation10 + $0x2e4] ss:$16 sps:$4 sm:$0xff]   ;;  %v6555_v12 = vld [vmem:[#allocation10 + $0xe0] ss:$16 sps:$4 sm:$0xff]  }
 0x111   : > { %1526 = vmatprep.subr.bf16.mxu1 %v6470_v13  ;;  %1515 = vmatprep.mubr.bf16.mxu0 %v7837_v49  ;;  %v6524_v49 = vld [vmem:[#allocation8 + $0x3ac] ss:$16 sps:$4 sm:$0xff]   ;;  %v6558_v13 = vld [vmem:[#allocation10 + $0x2e0] ss:$16 sps:$4 sm:$0xff]  }
 0x112   : > { %1556 = vmatprep.mubr.bf16.mxu1 %v594_v52  ;;  %v6527_v52 = vld [vmem:[#allocation8 + $0x18c] ss:$16 sps:$4 sm:$0xff]  }
 0x113   : > { %1486 = vmatpush1.bf16.msra.mxu0 %v6465_v14  ;;  %v6563_v14 = vld [vmem:[#allocation10 + $0xc4] ss:$16 sps:$4 sm:$0xff]  }
 0x114   : > { %1527 = vmatpush1.bf16.msra.mxu1 %v6468_v15  ;;  %1487 = vmatprep.subr.bf16.mxu0 %v6473_v16  ;;  %v6566_v15 = vld [vmem:[#allocation10 + $0x2c4] ss:$16 sps:$4 sm:$0xff]   ;;  %v596_v16 = vld [vmem:[%s7815_s29 + $0x8] sm:$0xff] }
 0x115   : > { %1528 = vmatprep.subr.bf16.mxu1 %v6476_v17  ;;  %v598_v17 = vld [vmem:[%s7815_s29 + $0x18] sm:$0xff] }
 0x117   : > { %1488 = vmatpush1.bf16.msra.mxu0 %v6471_v18  ;;  %v7852_v18 = vpack.c.bf16 %v596_v16, %v596_v16  ;;  %v6653_v16 = vld [vmem:[#allocation10 + $0xec] ss:$16 sps:$4 sm:$0xff]  }
 0x118   : > { %1529 = vmatpush1.bf16.msra.mxu1 %v6474_v19  ;;  %1489 = vmatprep.subr.bf16.mxu0 %v6479_v20  ;;  %v7854_v19 = vpack.c.bf16 %v598_v17, %v598_v17  ;;  %v6561_v20 = vld [vmem:[#allocation10 + $0xc0] ss:$16 sps:$4 sm:$0xff]   ;;  %v6656_v17 = vld [vmem:[#allocation10 + $0x2ec] ss:$16 sps:$4 sm:$0xff]  }
 0x119   : > { %1530 = vmatprep.subr.bf16.mxu1 %v6482_v21  ;;  %v6564_v21 = vld [vmem:[#allocation10 + $0x2c0] ss:$16 sps:$4 sm:$0xff]  }
 0x11b   : > { %1490 = vmatpush1.bf16.msra.mxu0 %v6477_v22  ;;  %v6569_v22 = vld [vmem:[#allocation10 + $0xa4] ss:$16 sps:$4 sm:$0xff]  }
 0x11c   : > { %1531 = vmatpush1.bf16.msra.mxu1 %v6480_v23  ;;  %1491 = vmatprep.subr.bf16.mxu0 %v6485_v24  ;;  %v6572_v23 = vld [vmem:[#allocation10 + $0x2a4] ss:$16 sps:$4 sm:$0xff]   ;;  %v6567_v24 = vld [vmem:[#allocation10 + $0xa0] ss:$16 sps:$4 sm:$0xff]  }
 0x11d   : > { %1532 = vmatprep.subr.bf16.mxu1 %v6488_v25  ;;  %v6570_v25 = vld [vmem:[#allocation10 + $0x2a0] ss:$16 sps:$4 sm:$0xff]  }
 0x11f   : > { %1492 = vmatpush1.bf16.msra.mxu0 %v6483_v26  ;;  %v6575_v26 = vld [vmem:[#allocation10 + $0x84] ss:$16 sps:$4 sm:$0xff]  }
 0x120   : > { %1533 = vmatpush1.bf16.msra.mxu1 %v6486_v27  ;;  %1493 = vmatprep.subr.bf16.mxu0 %v6491_v28  ;;  %v6576_v27 = vld [vmem:[#allocation10 + $0x280] ss:$16 sps:$4 sm:$0xff]   ;;  %v6581_v28 = vld [vmem:[#allocation10 + $0x64] ss:$16 sps:$4 sm:$0xff]  }
 0x121   : > { %1534 = vmatprep.subr.bf16.mxu1 %v6494_v29  ;;  %v6584_v29 = vld [vmem:[#allocation10 + $0x264] ss:$16 sps:$4 sm:$0xff]  }
 0x123   : > { %1494 = vmatpush1.bf16.msra.mxu0 %v6489_v30  ;;  %v6579_v30 = vld [vmem:[#allocation10 + $0x60] ss:$16 sps:$4 sm:$0xff]  }
 0x124   : > { %1535 = vmatpush1.bf16.msra.mxu1 %v6492_v31  ;;  %1495 = vmatprep.subr.bf16.mxu0 %v6497_v32  ;;  %v6582_v31 = vld [vmem:[#allocation10 + $0x260] ss:$16 sps:$4 sm:$0xff]   ;;  %v6587_v32 = vld [vmem:[#allocation10 + $0x44] ss:$16 sps:$4 sm:$0xff]  }
 0x125   : > { %1536 = vmatprep.subr.bf16.mxu1 %v6500_v33  ;;  %v6590_v33 = vld [vmem:[#allocation10 + $0x244] ss:$16 sps:$4 sm:$0xff]  }
 0x127   : > { %1496 = vmatpush1.bf16.msra.mxu0 %v6495_v34  ;;  %v6585_v34 = vld [vmem:[#allocation10 + $0x40] ss:$16 sps:$4 sm:$0xff]  }
 0x128   : > { %1537 = vmatpush1.bf16.msra.mxu1 %v6498_v35  ;;  %1497 = vmatprep.subr.bf16.mxu0 %v6503_v36  ;;  %v6588_v35 = vld [vmem:[#allocation10 + $0x240] ss:$16 sps:$4 sm:$0xff]   ;;  %v6593_v36 = vld [vmem:[#allocation10 + $0x24] ss:$16 sps:$4 sm:$0xff]  }
 0x129   : > { %1538 = vmatprep.subr.bf16.mxu1 %v6506_v37  ;;  %v6596_v37 = vld [vmem:[#allocation10 + $0x224] ss:$16 sps:$4 sm:$0xff]  }
 0x12b   : > { %1498 = vmatpush1.bf16.msra.mxu0 %v6501_v38  ;;  %v6591_v38 = vld [vmem:[#allocation10 + $0x20] ss:$16 sps:$4 sm:$0xff]  }
 0x12c   : > { %1539 = vmatpush1.bf16.msra.mxu1 %v6504_v39  ;;  %1499 = vmatprep.subr.bf16.mxu0 %v6509_v40  ;;  %v6594_v39 = vld [vmem:[#allocation10 + $0x220] ss:$16 sps:$4 sm:$0xff]   ;;  %v6599_v40 = vld [vmem:[#allocation10 + $0x4] ss:$16 sps:$4 sm:$0xff]  }
 0x12d   : > { %1540 = vmatprep.subr.bf16.mxu1 %v6512_v41  ;;  %v6602_v41 = vld [vmem:[#allocation10 + $0x204] ss:$16 sps:$4 sm:$0xff]  }
 0x12f   : > { %1500 = vmatpush2.bf16.msra.mxu0 %v6507_v42  ;;  %v6597_v42 = vld [vmem:[#allocation10] ss:$16 sps:$4 sm:$0xff]  }
 0x130   : > { %1541 = vmatpush2.bf16.msra.mxu1 %v6510_v43  ;;  %1501 = vmatprep.subr.bf16.mxu0 %v6515_v44  ;;  %v6600_v43 = vld [vmem:[#allocation10 + $0x200] ss:$16 sps:$4 sm:$0xff]   ;;  %v6605_v44 = vld [vmem:[#allocation10 + $0x1e4] ss:$16 sps:$4 sm:$0xff]  }
 0x131   : > { %1542 = vmatprep.subr.bf16.mxu1 %v6518_v45  ;;  %v6608_v45 = vld [vmem:[#allocation10 + $0x3e4] ss:$16 sps:$4 sm:$0xff]  }
 0x133   : > { %1502 = vmatpush2.bf16.msra.mxu0 %v6513_v46  ;;  %v6603_v46 = vld [vmem:[#allocation10 + $0x1e0] ss:$16 sps:$4 sm:$0xff]  }
 0x134   : > { %1543 = vmatpush2.bf16.msra.mxu1 %v6516_v47  ;;  %1503 = vmatprep.subr.bf16.mxu0 %v6521_v48  ;;  %v6606_v47 = vld [vmem:[#allocation10 + $0x3e0] ss:$16 sps:$4 sm:$0xff]   ;;  %v6611_v48 = vld [vmem:[#allocation10 + $0x1c4] ss:$16 sps:$4 sm:$0xff]  }
 0x135   : > { %1544 = vmatprep.subr.bf16.mxu1 %v6524_v49  ;;  %v6614_v49 = vld [vmem:[#allocation10 + $0x3c4] ss:$16 sps:$4 sm:$0xff]  }
 0x137   : > { %1504 = vmatpush2.bf16.msra.mxu0 %v6519_v50  ;;  %v6609_v50 = vld [vmem:[#allocation10 + $0x1c0] ss:$16 sps:$4 sm:$0xff]  }
 0x138   : > { %1545 = vmatpush2.bf16.msra.mxu1 %v6522_v51  ;;  %1505 = vmatprep.subr.bf16.mxu0 %v6527_v52  ;;  %v6612_v51 = vld [vmem:[#allocation10 + $0x3c0] ss:$16 sps:$4 sm:$0xff]   ;;  %v6617_v52 = vld [vmem:[#allocation10 + $0x1a4] ss:$16 sps:$4 sm:$0xff]  }
 0x139   : > { %1546 = vmatprep.subr.bf16.mxu1 %v6530_v53  ;;  %v6620_v53 = vld [vmem:[#allocation10 + $0x3a4] ss:$16 sps:$4 sm:$0xff]  }
 0x13b   : > { %1506 = vmatpush2.bf16.msra.mxu0 %v6525_v54  ;;  %v6615_v54 = vld [vmem:[#allocation10 + $0x1a0] ss:$16 sps:$4 sm:$0xff]  }
 0x13c   : > { %1547 = vmatpush2.bf16.msra.mxu1 %v6528_v55  ;;  %1507 = vmatprep.subr.bf16.mxu0 %v6533_v56  ;;  %v6618_v55 = vld [vmem:[#allocation10 + $0x3a0] ss:$16 sps:$4 sm:$0xff]   ;;  %v6623_v56 = vld [vmem:[#allocation10 + $0x184] ss:$16 sps:$4 sm:$0xff]  }
 0x13d   : > { %1548 = vmatprep.subr.bf16.mxu1 %v6536_v57  ;;  %v6626_v57 = vld [vmem:[#allocation10 + $0x384] ss:$16 sps:$4 sm:$0xff]  }
 0x13f   : > { %1508 = vmatpush2.bf16.msra.mxu0 %v6531_v58  ;;  %v6621_v58 = vld [vmem:[#allocation10 + $0x180] ss:$16 sps:$4 sm:$0xff]  }
 0x140   : > { %1549 = vmatpush2.bf16.msra.mxu1 %v6534_v59  ;;  %1509 = vmatprep.subr.bf16.mxu0 %v6539_v60  ;;  %v6624_v59 = vld [vmem:[#allocation10 + $0x380] ss:$16 sps:$4 sm:$0xff]   ;;  %v6629_v60 = vld [vmem:[#allocation10 + $0x164] ss:$16 sps:$4 sm:$0xff]  }
 0x141   : > { %1550 = vmatprep.subr.bf16.mxu1 %v6542_v61  ;;  %v6632_v61 = vld [vmem:[#allocation10 + $0x364] ss:$16 sps:$4 sm:$0xff]  }
 0x143   : > { %1510 = vmatpush2.bf16.msra.mxu0 %v6537_v62  ;;  %v6627_v62 = vld [vmem:[#allocation10 + $0x160] ss:$16 sps:$4 sm:$0xff]  }
 0x144   : > { %1551 = vmatpush2.bf16.msra.mxu1 %v6540_v63  ;;  %1511 = vmatprep.subr.bf16.mxu0 %v6545_v0  ;;  %v6630_v63 = vld [vmem:[#allocation10 + $0x360] ss:$16 sps:$4 sm:$0xff]   ;;  %v6635_v0 = vld [vmem:[#allocation10 + $0x144] ss:$16 sps:$4 sm:$0xff]  }
 0x145   : > { %1552 = vmatprep.subr.bf16.mxu1 %v6548_v1  ;;  %v6638_v1 = vld [vmem:[#allocation10 + $0x344] ss:$16 sps:$4 sm:$0xff]  }
 0x147   : > { %1512 = vmatpush2.bf16.msra.mxu0 %v6543_v2  ;;  %v6633_v2 = vld [vmem:[#allocation10 + $0x140] ss:$16 sps:$4 sm:$0xff]  }
 0x148   : > { %1553 = vmatpush2.bf16.msra.mxu1 %v6546_v3  ;;  %1513 = vmatprep.subr.bf16.mxu0 %v6551_v4  ;;  %v6636_v3 = vld [vmem:[#allocation10 + $0x340] ss:$16 sps:$4 sm:$0xff]   ;;  %v6641_v4 = vld [vmem:[#allocation10 + $0x124] ss:$16 sps:$4 sm:$0xff]  }
 0x149   : > { %1554 = vmatprep.subr.bf16.mxu1 %v6554_v5  ;;  %v6644_v5 = vld [vmem:[#allocation10 + $0x324] ss:$16 sps:$4 sm:$0xff]  }
 0x14b   : > { %1514 = vmatpush2.bf16.msra.mxu0 %v6549_v6  ;;  %v6639_v6 = vld [vmem:[#allocation10 + $0x120] ss:$16 sps:$4 sm:$0xff]  }
 0x14c   : > { %1555 = vmatpush2.bf16.msra.mxu1 %v6552_v7  ;;  %2355 = vmatprep.subr.bf16.mxu0 %v6557_v10  ;;  %v6642_v7 = vld [vmem:[#allocation10 + $0x320] ss:$16 sps:$4 sm:$0xff]   ;;  %v6647_v10 = vld [vmem:[#allocation10 + $0x104] ss:$16 sps:$4 sm:$0xff]  }
 0x14d   : > { %2396 = vmatprep.subr.bf16.mxu1 %v6560_v11  ;;  %v6650_v11 = vld [vmem:[#allocation10 + $0x304] ss:$16 sps:$4 sm:$0xff]  }
 0x14e   : > { %1516 = vmatmul.mubr.bf16.vlgmr.msra.gmra.mxu0 %v7843_v8  ;;  %v6578_v8 = vld [vmem:[#allocation10 + $0x284] ss:$16 sps:$4 sm:$0xff]  }
 0x14f   : > { %1557 = vmatmul.mubr.bf16.vlgmr.msra.gmra.mxu1 %v7845_v9  ;;  %2356 = vmatpush1.bf16.msra.mxu0 %v6555_v12  ;;  %v6573_v9 = vld [vmem:[#allocation10 + $0x80] ss:$16 sps:$4 sm:$0xff]  }
 0x150   : > { %2397 = vmatpush1.bf16.msra.mxu1 %v6558_v13  ;;  %2357 = vmatprep.subr.bf16.mxu0 %v6563_v14  ;;  %v6645_v12 = vld [vmem:[#allocation10 + $0x100] ss:$16 sps:$4 sm:$0xff]  }
 0x151   : > { %2398 = vmatprep.subr.bf16.mxu1 %v6566_v15  ;;  %2387 = vmatprep.mubr.bf16.mxu0 %v7852_v18  ;;  %v6648_v13 = vld [vmem:[#allocation10 + $0x300] ss:$16 sps:$4 sm:$0xff]  }
 0x152   : > { %2428 = vmatprep.mubr.bf16.mxu1 %v7854_v19  ;;  %v595_v14 = vld [vmem:[%s7815_s29] sm:$0xff]  ;;  %v597_v15 = vld [vmem:[%s7815_s29 + $0x10] sm:$0xff]  ;;  %s7499_s29 = smov [#allocation17]  }
 0x153   : > { %2358 = vmatpush1.bf16.msra.mxu0 %v6561_v20  ;;  %v7862_v20 = vpack.c.bf16 %v595_v14, %v595_v14  ;;  %v6738_v14 = vld [vmem:[#allocation10 + $0x328] ss:$16 sps:$4 sm:$0xff]  }
 0x154   : > { %2399 = vmatpush1.bf16.msra.mxu1 %v6564_v21  ;;  %2359 = vmatprep.subr.bf16.mxu0 %v6569_v22  ;;  %v7864_v21 = vpack.c.bf16 %v597_v15, %v597_v15  ;;  %v6651_v22 = vld [vmem:[#allocation10 + $0xe8] ss:$16 sps:$4 sm:$0xff]  }
 0x155   : > { %2400 = vmatprep.subr.bf16.mxu1 %v6572_v23  ;;  %v6654_v23 = vld [vmem:[#allocation10 + $0x2e8] ss:$16 sps:$4 sm:$0xff]  }
 0x157   : > { %2360 = vmatpush1.bf16.msra.mxu0 %v6567_v24  ;;  %v6659_v24 = vld [vmem:[#allocation10 + $0xcc] ss:$16 sps:$4 sm:$0xff]  }
 0x158   : > { %2401 = vmatpush1.bf16.msra.mxu1 %v6570_v25  ;;  %2361 = vmatprep.subr.bf16.mxu0 %v6575_v26  ;;  %v6662_v25 = vld [vmem:[#allocation10 + $0x2cc] ss:$16 sps:$4 sm:$0xff]   ;;  %v6657_v26 = vld [vmem:[#allocation10 + $0xc8] ss:$16 sps:$4 sm:$0xff]  }
 0x159   : > { %2402 = vmatprep.subr.bf16.mxu1 %v6578_v8  ;;  %v6660_v8 = vld [vmem:[#allocation10 + $0x2c8] ss:$16 sps:$4 sm:$0xff]  }
 0x15b   : > { %2362 = vmatpush1.bf16.msra.mxu0 %v6573_v9  ;;  %v6665_v9 = vld [vmem:[#allocation10 + $0xac] ss:$16 sps:$4 sm:$0xff]  }
 0x15c   : > { %2403 = vmatpush1.bf16.msra.mxu1 %v6576_v27  ;;  %2363 = vmatprep.subr.bf16.mxu0 %v6581_v28  ;;  %v6668_v27 = vld [vmem:[#allocation10 + $0x2ac] ss:$16 sps:$4 sm:$0xff]   ;;  %v6663_v28 = vld [vmem:[#allocation10 + $0xa8] ss:$16 sps:$4 sm:$0xff]  }
 0x15d   : > { %2404 = vmatprep.subr.bf16.mxu1 %v6584_v29  ;;  %v6666_v29 = vld [vmem:[#allocation10 + $0x2a8] ss:$16 sps:$4 sm:$0xff]  }
 0x15f   : > { %2364 = vmatpush1.bf16.msra.mxu0 %v6579_v30  ;;  %v6671_v30 = vld [vmem:[#allocation10 + $0x8c] ss:$16 sps:$4 sm:$0xff]  }
 0x160   : > { %2405 = vmatpush1.bf16.msra.mxu1 %v6582_v31  ;;  %2365 = vmatprep.subr.bf16.mxu0 %v6587_v32  ;;  %v6674_v31 = vld [vmem:[#allocation10 + $0x28c] ss:$16 sps:$4 sm:$0xff]   ;;  %v6669_v32 = vld [vmem:[#allocation10 + $0x88] ss:$16 sps:$4 sm:$0xff]  }
 0x161   : > { %2406 = vmatprep.subr.bf16.mxu1 %v6590_v33  ;;  %v6672_v33 = vld [vmem:[#allocation10 + $0x288] ss:$16 sps:$4 sm:$0xff]  }
 0x163   : > { %2366 = vmatpush1.bf16.msra.mxu0 %v6585_v34  ;;  %v6677_v34 = vld [vmem:[#allocation10 + $0x6c] ss:$16 sps:$4 sm:$0xff]  }
 0x164   : > { %2407 = vmatpush1.bf16.msra.mxu1 %v6588_v35  ;;  %2367 = vmatprep.subr.bf16.mxu0 %v6593_v36  ;;  %v6680_v35 = vld [vmem:[#allocation10 + $0x26c] ss:$16 sps:$4 sm:$0xff]   ;;  %v6675_v36 = vld [vmem:[#allocation10 + $0x68] ss:$16 sps:$4 sm:$0xff]  }
 0x165   : > { %2408 = vmatprep.subr.bf16.mxu1 %v6596_v37  ;;  %v6686_v37 = vld [vmem:[#allocation10 + $0x24c] ss:$16 sps:$4 sm:$0xff]  }
 0x167   : > { %2368 = vmatpush1.bf16.msra.mxu0 %v6591_v38  ;;  %v6681_v38 = vld [vmem:[#allocation10 + $0x48] ss:$16 sps:$4 sm:$0xff]  }
 0x168   : > { %2409 = vmatpush1.bf16.msra.mxu1 %v6594_v39  ;;  %2369 = vmatprep.subr.bf16.mxu0 %v6599_v40  ;;  %v6684_v39 = vld [vmem:[#allocation10 + $0x248] ss:$16 sps:$4 sm:$0xff]   ;;  %v6689_v40 = vld [vmem:[#allocation10 + $0x2c] ss:$16 sps:$4 sm:$0xff]  }
 0x169   : > { %2410 = vmatprep.subr.bf16.mxu1 %v6602_v41  ;;  %v6692_v41 = vld [vmem:[#allocation10 + $0x22c] ss:$16 sps:$4 sm:$0xff]  }
 0x16b   : > { %2370 = vmatpush1.bf16.msra.mxu0 %v6597_v42  ;;  %v6687_v42 = vld [vmem:[#allocation10 + $0x28] ss:$16 sps:$4 sm:$0xff]  }
 0x16c   : > { %2411 = vmatpush1.bf16.msra.mxu1 %v6600_v43  ;;  %2371 = vmatprep.subr.bf16.mxu0 %v6605_v44  ;;  %v6690_v43 = vld [vmem:[#allocation10 + $0x228] ss:$16 sps:$4 sm:$0xff]   ;;  %v6695_v44 = vld [vmem:[#allocation10 + $0xc] ss:$16 sps:$4 sm:$0xff]  }
 0x16d   : > { %2412 = vmatprep.subr.bf16.mxu1 %v6608_v45  ;;  %v6698_v45 = vld [vmem:[#allocation10 + $0x20c] ss:$16 sps:$4 sm:$0xff]  }
 0x16f   : > { %2372 = vmatpush2.bf16.msra.mxu0 %v6603_v46  ;;  %v6693_v46 = vld [vmem:[#allocation10 + $0x8] ss:$16 sps:$4 sm:$0xff]  }
 0x170   : > { %2413 = vmatpush2.bf16.msra.mxu1 %v6606_v47  ;;  %2373 = vmatprep.subr.bf16.mxu0 %v6611_v48  ;;  %v6696_v47 = vld [vmem:[#allocation10 + $0x208] ss:$16 sps:$4 sm:$0xff]   ;;  %v6701_v48 = vld [vmem:[#allocation10 + $0x1ec] ss:$16 sps:$4 sm:$0xff]  }
 0x171   : > { %2414 = vmatprep.subr.bf16.mxu1 %v6614_v49  ;;  %v6704_v49 = vld [vmem:[#allocation10 + $0x3ec] ss:$16 sps:$4 sm:$0xff]  }
 0x173   : > { %2374 = vmatpush2.bf16.msra.mxu0 %v6609_v50  ;;  %v6699_v50 = vld [vmem:[#allocation10 + $0x1e8] ss:$16 sps:$4 sm:$0xff]  }
 0x174   : > { %2415 = vmatpush2.bf16.msra.mxu1 %v6612_v51  ;;  %2375 = vmatprep.subr.bf16.mxu0 %v6617_v52  ;;  %v6702_v51 = vld [vmem:[#allocation10 + $0x3e8] ss:$16 sps:$4 sm:$0xff]   ;;  %v6707_v52 = vld [vmem:[#allocation10 + $0x1cc] ss:$16 sps:$4 sm:$0xff]  }
 0x175   : > { %2416 = vmatprep.subr.bf16.mxu1 %v6620_v53  ;;  %v6710_v53 = vld [vmem:[#allocation10 + $0x3cc] ss:$16 sps:$4 sm:$0xff]  }
 0x177   : > { %2376 = vmatpush2.bf16.msra.mxu0 %v6615_v54  ;;  %v6705_v54 = vld [vmem:[#allocation10 + $0x1c8] ss:$16 sps:$4 sm:$0xff]  }
 0x178   : > { %2417 = vmatpush2.bf16.msra.mxu1 %v6618_v55  ;;  %2377 = vmatprep.subr.bf16.mxu0 %v6623_v56  ;;  %v6708_v55 = vld [vmem:[#allocation10 + $0x3c8] ss:$16 sps:$4 sm:$0xff]   ;;  %v6713_v56 = vld [vmem:[#allocation10 + $0x1ac] ss:$16 sps:$4 sm:$0xff]  }
 0x179   : > { %2418 = vmatprep.subr.bf16.mxu1 %v6626_v57  ;;  %v6716_v57 = vld [vmem:[#allocation10 + $0x3ac] ss:$16 sps:$4 sm:$0xff]  }
 0x17b   : > { %2378 = vmatpush2.bf16.msra.mxu0 %v6621_v58  ;;  %v6711_v58 = vld [vmem:[#allocation10 + $0x1a8] ss:$16 sps:$4 sm:$0xff]  }
 0x17c   : > { %2419 = vmatpush2.bf16.msra.mxu1 %v6624_v59  ;;  %2379 = vmatprep.subr.bf16.mxu0 %v6629_v60  ;;  %v6714_v59 = vld [vmem:[#allocation10 + $0x3a8] ss:$16 sps:$4 sm:$0xff]   ;;  %v6719_v60 = vld [vmem:[#allocation10 + $0x18c] ss:$16 sps:$4 sm:$0xff]  }
 0x17d   : > { %2420 = vmatprep.subr.bf16.mxu1 %v6632_v61  ;;  %v6722_v61 = vld [vmem:[#allocation10 + $0x38c] ss:$16 sps:$4 sm:$0xff]  }
 0x17f   : > { %2380 = vmatpush2.bf16.msra.mxu0 %v6627_v62  ;;  %v6717_v62 = vld [vmem:[#allocation10 + $0x188] ss:$16 sps:$4 sm:$0xff]  }
 0x180   : > { %2421 = vmatpush2.bf16.msra.mxu1 %v6630_v63  ;;  %2381 = vmatprep.subr.bf16.mxu0 %v6635_v0  ;;  %v6720_v63 = vld [vmem:[#allocation10 + $0x388] ss:$16 sps:$4 sm:$0xff]   ;;  %v6725_v0 = vld [vmem:[#allocation10 + $0x16c] ss:$16 sps:$4 sm:$0xff]  }
 0x181   : > { %2422 = vmatprep.subr.bf16.mxu1 %v6638_v1  ;;  %v6728_v1 = vld [vmem:[#allocation10 + $0x36c] ss:$16 sps:$4 sm:$0xff]  }
 0x183   : > { %2382 = vmatpush2.bf16.msra.mxu0 %v6633_v2  ;;  %v6723_v2 = vld [vmem:[#allocation10 + $0x168] ss:$16 sps:$4 sm:$0xff]  }
 0x184   : > { %2423 = vmatpush2.bf16.msra.mxu1 %v6636_v3  ;;  %2383 = vmatprep.subr.bf16.mxu0 %v6641_v4  ;;  %v6726_v3 = vld [vmem:[#allocation10 + $0x368] ss:$16 sps:$4 sm:$0xff]   ;;  %v6731_v4 = vld [vmem:[#allocation10 + $0x14c] ss:$16 sps:$4 sm:$0xff]  }
 0x185   : > { %2424 = vmatprep.subr.bf16.mxu1 %v6644_v5  ;;  %v6734_v5 = vld [vmem:[#allocation10 + $0x34c] ss:$16 sps:$4 sm:$0xff]  }
 0x187   : > { %2384 = vmatpush2.bf16.msra.mxu0 %v6639_v6  ;;  %v6729_v6 = vld [vmem:[#allocation10 + $0x148] ss:$16 sps:$4 sm:$0xff]  }
 0x188   : > { %2425 = vmatpush2.bf16.msra.mxu1 %v6642_v7  ;;  %2385 = vmatprep.subr.bf16.mxu0 %v6647_v10  ;;  %v6732_v7 = vld [vmem:[#allocation10 + $0x348] ss:$16 sps:$4 sm:$0xff]   ;;  %v6737_v10 = vld [vmem:[#allocation10 + $0x12c] ss:$16 sps:$4 sm:$0xff]  }
 0x189   : > { %2426 = vmatprep.subr.bf16.mxu1 %v6650_v11  ;;  %v741_v11 = vlaneseq }
 0x18b   : > { %2386 = vmatpush2.bf16.msra.mxu0 %v6645_v12  ;;  %v6740_v12 = vld [vmem:[#allocation10 + $0x32c] ss:$16 sps:$4 sm:$0xff]   ;;  %v7870_v15 = vshrl.u32 %v741_v11, 7  ;;  %v6869_v11 = vld [vmem:[#allocation11 + $0x3e4] ss:$16 sps:$4 sm:$0xff]  }
 0x18c   : > { %2427 = vmatpush2.bf16.msra.mxu1 %v6648_v13  ;;  %2437 = vmatprep.subr.bf16.mxu0 %v6653_v16  ;;  %v6735_v13 = vld [vmem:[#allocation10 + $0x128] ss:$16 sps:$4 sm:$0xff]   ;;  %v6743_v16 = vld [vmem:[#allocation10 + $0x10c] ss:$16 sps:$4 sm:$0xff]  }
 0x18d   : > { %2478 = vmatprep.subr.bf16.mxu1 %v6656_v17  ;;  %v6746_v17 = vld [vmem:[#allocation10 + $0x30c] ss:$16 sps:$4 sm:$0xff]  }
 0x18e   : > { %2388 = vmatmul.mubr.bf16.vlgmr.msra.gmra.mxu0 %v7862_v20 }
 0x18f   : > { %2429 = vmatmul.mubr.bf16.vlgmr.msra.gmra.mxu1 %v7864_v21  ;;  %2438 = vmatpush1.bf16.msra.mxu0 %v6651_v22  ;;  %v6741_v22 = vld [vmem:[#allocation10 + $0x108] ss:$16 sps:$4 sm:$0xff]  }
 0x190   : > { %2479 = vmatpush1.bf16.msra.mxu1 %v6654_v23  ;;  %2439 = vmatprep.subr.bf16.mxu0 %v6659_v24  ;;  %v6744_v23 = vld [vmem:[#allocation10 + $0x308] ss:$16 sps:$4 sm:$0xff]   ;;  %v7875_v24 = vld [vmem:[%s8206_s4] sm:$0xf] }
 0x191   : > { %2480 = vmatprep.subr.bf16.mxu1 %v6662_v25  ;;  %2469 = vmatprep.mubr.bf16.mxu0 %v7852_v18  ;;  %v6678_v18 = vld [vmem:[#allocation10 + $0x268] ss:$16 sps:$4 sm:$0xff]   ;;  %v6749_v25 = vld [vmem:[#allocation11 + $0xe4] ss:$16 sps:$4 sm:$0xff]  }
 0x192   : > { %2510 = vmatprep.mubr.bf16.mxu1 %v7854_v19  ;;  %v6683_v19 = vld [vmem:[#allocation10 + $0x4c] ss:$16 sps:$4 sm:$0xff]  }
 0x193   : > { %2440 = vmatpush1.bf16.msra.mxu0 %v6657_v26  ;;  %v604_v26 = vld [vmem:[%s7822_s3 + $0x8] sm:$0xff] }
 0x194   : > { %2481 = vmatpush1.bf16.msra.mxu1 %v6660_v8  ;;  %2441 = vmatprep.subr.bf16.mxu0 %v6665_v9  ;;  %v6830_v8 = vld [vmem:[#allocation11 + $0x2e4] ss:$16 sps:$4 sm:$0xff]   ;;  %v7879_v9 = vsub.s32 0, %v7870_v15 }
 0x195   : > { %2482 = vmatprep.subr.bf16.mxu1 %v6668_v27  ;;  %v7882_v27 = vsub.s32 1, %v7870_v15 }
 0x197   : > { %2442 = vmatpush1.bf16.msra.mxu0 %v6663_v28  ;;  %v6747_v28 = vld [vmem:[#allocation11 + $0xe0] ss:$16 sps:$4 sm:$0xff]  }
 0x198   : > { %2483 = vmatpush1.bf16.msra.mxu1 %v6666_v29  ;;  %2443 = vmatprep.subr.bf16.mxu0 %v6671_v30  ;;  %v6752_v29 = vld [vmem:[#allocation11 + $0xc4] ss:$16 sps:$4 sm:$0xff]   ;;  %v6828_v30 = vld [vmem:[#allocation11 + $0x2e0] ss:$16 sps:$4 sm:$0xff]  }
 0x199   : > { %2484 = vmatprep.subr.bf16.mxu1 %v6674_v31  ;;  %v744_v31 = vrot.slane %v7875_v24, %v7879_v9 }
 0x19b   : > { %2444 = vmatpush1.bf16.msra.mxu0 %v6669_v32  ;;  %v7886_v32 = vpack.c.bf16 %v604_v26, %v604_v26  ;;  %v6782_v26 = vld [vmem:[#allocation11 + $0x184] ss:$16 sps:$4 sm:$0xff]  }
 0x19c   : > { %2485 = vmatpush1.bf16.msra.mxu1 %v6672_v33  ;;  %2445 = vmatprep.subr.bf16.mxu0 %v6677_v34  ;;  %v6836_v33 = vld [vmem:[#allocation11 + $0x2c4] ss:$16 sps:$4 sm:$0xff]   ;;  %v748_v34 = vrot.slane %v7875_v24, %v7882_v27 }
 0x19d   : > { %2486 = vmatprep.subr.bf16.mxu1 %v6680_v35 }
 0x19f   : > { %2446 = vmatpush1.bf16.msra.mxu0 %v6675_v36 }
 0x1a0   : > { %2487 = vmatpush1.bf16.msra.mxu1 %v6678_v18  ;;  %2447 = vmatprep.subr.bf16.mxu0 %v6683_v19  ;;  %v6750_v18 = vld [vmem:[#allocation11 + $0xc0] ss:$16 sps:$4 sm:$0xff]  }
 0x1a1   : > { %2488 = vmatprep.subr.bf16.mxu1 %v6686_v37  ;;  %v6755_v37 = vld [vmem:[#allocation11 + $0xa4] ss:$16 sps:$4 sm:$0xff]  }
 0x1a3   : > { %2448 = vmatpush1.bf16.msra.mxu0 %v6681_v38  ;;  %v6834_v38 = vld [vmem:[#allocation11 + $0x2c0] ss:$16 sps:$4 sm:$0xff]  }
 0x1a4   : > { %2489 = vmatpush1.bf16.msra.mxu1 %v6684_v39  ;;  %2449 = vmatprep.subr.bf16.mxu0 %v6689_v40 }
 0x1a5   : > { %2490 = vmatprep.subr.bf16.mxu1 %v6692_v41  ;;  %v6842_v41 = vld [vmem:[#allocation11 + $0x2a4] ss:$16 sps:$4 sm:$0xff]  }
 0x1a7   : > { %2450 = vmatpush1.bf16.msra.mxu0 %v6687_v42 }
 0x1a8   : > { %2491 = vmatpush1.bf16.msra.mxu1 %v6690_v43  ;;  %2451 = vmatprep.subr.bf16.mxu0 %v6695_v44  ;;  %v6753_v44 = vld [vmem:[#allocation11 + $0xa0] ss:$16 sps:$4 sm:$0xff]  }
 0x1a9   : > { %2492 = vmatprep.subr.bf16.mxu1 %v6698_v45 }
 0x1ab   : > { %2452 = vmatpush1.bf16.msra.mxu0 %v6693_v46  ;;  %v6840_v46 = vld [vmem:[#allocation11 + $0x2a0] ss:$16 sps:$4 sm:$0xff]  }
 0x1ac   : > { %2493 = vmatpush1.bf16.msra.mxu1 %v6696_v47  ;;  %2453 = vmatprep.subr.bf16.mxu0 %v6701_v48  ;;  %v6848_v48 = vld [vmem:[#allocation11 + $0x284] ss:$16 sps:$4 sm:$0xff]  }
 0x1ad   : > { %2494 = vmatprep.subr.bf16.mxu1 %v6704_v49 }
 0x1af   : > { %2454 = vmatpush2.bf16.msra.mxu0 %v6699_v50 }
 0x1b0   : > { %2495 = vmatpush2.bf16.msra.mxu1 %v6702_v51  ;;  %2455 = vmatprep.subr.bf16.mxu0 %v6707_v52  ;;  %v6756_v51 = vld [vmem:[#allocation11 + $0x80] ss:$16 sps:$4 sm:$0xff]   ;;  %v6761_v52 = vld [vmem:[#allocation11 + $0x64] ss:$16 sps:$4 sm:$0xff]  }
 0x1b1   : > { %2496 = vmatprep.subr.bf16.mxu1 %v6710_v53  ;;  %v6846_v53 = vld [vmem:[#allocation11 + $0x280] ss:$16 sps:$4 sm:$0xff]  }
 0x1b3   : > { %2456 = vmatpush2.bf16.msra.mxu0 %v6705_v54  ;;  %v6854_v54 = vld [vmem:[#allocation11 + $0x264] ss:$16 sps:$4 sm:$0xff]  }
 0x1b4   : > { %2497 = vmatpush2.bf16.msra.mxu1 %v6708_v55  ;;  %2457 = vmatprep.subr.bf16.mxu0 %v6713_v56  ;;  %v6759_v55 = vld [vmem:[#allocation11 + $0x60] ss:$16 sps:$4 sm:$0xff]   ;;  %v6764_v56 = vld [vmem:[#allocation11 + $0x44] ss:$16 sps:$4 sm:$0xff]  }
 0x1b5   : > { %2498 = vmatprep.subr.bf16.mxu1 %v6716_v57  ;;  %v6852_v57 = vld [vmem:[#allocation11 + $0x260] ss:$16 sps:$4 sm:$0xff]  }
 0x1b7   : > { %2458 = vmatpush2.bf16.msra.mxu0 %v6711_v58  ;;  %v6860_v58 = vld [vmem:[#allocation11 + $0x244] ss:$16 sps:$4 sm:$0xff]  }
 0x1b8   : > { %2499 = vmatpush2.bf16.msra.mxu1 %v6714_v59  ;;  %2459 = vmatprep.subr.bf16.mxu0 %v6719_v60  ;;  %v6762_v59 = vld [vmem:[#allocation11 + $0x40] ss:$16 sps:$4 sm:$0xff]   ;;  %v6767_v60 = vld [vmem:[#allocation11 + $0x24] ss:$16 sps:$4 sm:$0xff]  }
 0x1b9   : > { %2500 = vmatprep.subr.bf16.mxu1 %v6722_v61  ;;  %v6858_v61 = vld [vmem:[#allocation11 + $0x240] ss:$16 sps:$4 sm:$0xff]  }
 0x1bb   : > { %2460 = vmatpush2.bf16.msra.mxu0 %v6717_v62  ;;  %v6863_v62 = vld [vmem:[#allocation11 + $0x224] ss:$16 sps:$4 sm:$0xff]  }
 0x1bc   : > { %2501 = vmatpush2.bf16.msra.mxu1 %v6720_v63  ;;  %2461 = vmatprep.subr.bf16.mxu0 %v6725_v0  ;;  %v6765_v63 = vld [vmem:[#allocation11 + $0x20] ss:$16 sps:$4 sm:$0xff]   ;;  %v6770_v0 = vld [vmem:[#allocation11 + $0x4] ss:$16 sps:$4 sm:$0xff]  }
 0x1bd   : > { %2502 = vmatprep.subr.bf16.mxu1 %v6728_v1  ;;  %v6861_v1 = vld [vmem:[#allocation11 + $0x220] ss:$16 sps:$4 sm:$0xff]  }
 0x1bf   : > { %2462 = vmatpush2.bf16.msra.mxu0 %v6723_v2  ;;  %v6866_v2 = vld [vmem:[#allocation11 + $0x204] ss:$16 sps:$4 sm:$0xff]  }
 0x1c0   : > { %2503 = vmatpush2.bf16.msra.mxu1 %v6726_v3  ;;  %2463 = vmatprep.subr.bf16.mxu0 %v6731_v4  ;;  %v6768_v3 = vld [vmem:[#allocation11] ss:$16 sps:$4 sm:$0xff]   ;;  %v606_v4 = vld [vmem:[%s7822_s3 + $0x18] sm:$0xff] }
 0x1c1   : > { %2504 = vmatprep.subr.bf16.mxu1 %v6734_v5  ;;  %v6773_v5 = vld [vmem:[#allocation11 + $0x1e4] ss:$16 sps:$4 sm:$0xff]  }
 0x1c3   : > { %2464 = vmatpush2.bf16.msra.mxu0 %v6729_v6  ;;  %v6864_v6 = vld [vmem:[#allocation11 + $0x200] ss:$16 sps:$4 sm:$0xff]  }
 0x1c4   : > { %2505 = vmatpush2.bf16.msra.mxu1 %v6732_v7  ;;  %2465 = vmatprep.subr.bf16.mxu0 %v6737_v10  ;;  %v7898_v7 = vpack.c.bf16 %v606_v4, %v606_v4  ;;  %v6771_v10 = vld [vmem:[#allocation11 + $0x1e0] ss:$16 sps:$4 sm:$0xff]  }
 0x1c5   : > { %2506 = vmatprep.subr.bf16.mxu1 %v6740_v12  ;;  %v6776_v12 = vld [vmem:[#allocation11 + $0x1c4] ss:$16 sps:$4 sm:$0xff]  }
 0x1c7   : > { %2466 = vmatpush2.bf16.msra.mxu0 %v6735_v13  ;;  %v6867_v13 = vld [vmem:[#allocation11 + $0x3e0] ss:$16 sps:$4 sm:$0xff]  }
 0x1c8   : > { %2507 = vmatpush2.bf16.msra.mxu1 %v6738_v14  ;;  %2467 = vmatprep.subr.bf16.mxu0 %v6743_v16  ;;  %v6872_v14 = vld [vmem:[#allocation11 + $0x3c4] ss:$16 sps:$4 sm:$0xff]   ;;  %v6774_v16 = vld [vmem:[#allocation11 + $0x1c0] ss:$16 sps:$4 sm:$0xff]  }
 0x1c9   : > { %2508 = vmatprep.subr.bf16.mxu1 %v6746_v17  ;;  %v6779_v17 = vld [vmem:[#allocation11 + $0x1a4] ss:$16 sps:$4 sm:$0xff]  }
 0x1cb   : > { %2468 = vmatpush2.bf16.msra.mxu0 %v6741_v22  ;;  %v6870_v22 = vld [vmem:[#allocation11 + $0x3c0] ss:$16 sps:$4 sm:$0xff]  }
 0x1cc   : > { %2509 = vmatpush2.bf16.msra.mxu1 %v6744_v23  ;;  %3309 = vmatprep.subr.bf16.mxu0 %v6749_v25  ;;  %v6875_v23 = vld [vmem:[#allocation11 + $0x3a4] ss:$16 sps:$4 sm:$0xff]   ;;  %v6777_v25 = vld [vmem:[#allocation11 + $0x1a0] ss:$16 sps:$4 sm:$0xff]  }
 0x1cd   : > { %3350 = vmatprep.subr.bf16.mxu1 %v6830_v8  ;;  %v6873_v8 = vld [vmem:[#allocation11 + $0x3a0] ss:$16 sps:$4 sm:$0xff]  }
 0x1ce   : > { %v1435_v35 = vpop.f32.mrf.mxu0  ;;  %2470 = vmatmul.mubr.bf16.vlgmr.msra.gmra.mxu0 %v7862_v20 }
 0x1cf   : > { %v1476_v36 = vpop.f32.mrf.mxu1  ;;  %2511 = vmatmul.mubr.bf16.vlgmr.msra.gmra.mxu1 %v7864_v21  ;;  %v1436_v19 = vadd.f32 %v1435_v35, %v744_v31  ;;  %3310 = vmatpush1.bf16.msra.mxu0 %v6747_v28  ;;  %v6758_v21 = vld [vmem:[#allocation11 + $0x84] ss:$16 sps:$4 sm:$0xff]   ;;  %v6876_v31 = vld [vmem:[#allocation11 + $0x380] ss:$16 sps:$4 sm:$0xff]  }
 0x1d0   : > { %3341 = vmatprep.mubr.bf16.mxu0 %v7886_v32  ;;  %v1437_v39 = vpop.f32.mrf.mxu0  ;;  %3311 = vmatprep.subr.bf16.mxu0 %v6752_v29  ;;  %v6878_v28 = vld [vmem:[#allocation11 + $0x384] ss:$16 sps:$4 sm:$0xff]   ;;  %v6780_v29 = vld [vmem:[#allocation11 + $0x180] ss:$16 sps:$4 sm:$0xff]  }
 0x1d1   : > { %v1478_v40 = vpop.f32.mrf.mxu1  ;;  %3351 = vmatpush1.bf16.msra.mxu1 %v6828_v30  ;;  %v7893_v42 = vadd.f32 %v1476_v36, %v1436_v19  ;;  %v1438_v43 = vadd.f32 %v1437_v39, %v748_v34  ;;  %3382 = vmatprep.mubr.bf16.mxu1 %v7898_v7  ;;  %v6785_v30 = vld [vmem:[#allocation11 + $0x164] ss:$16 sps:$4 sm:$0xff]   ;;  %v6783_v34 = vld [vmem:[#allocation11 + $0x160] ss:$16 sps:$4 sm:$0xff]  }
 0x1d2   : > { %3352 = vmatprep.subr.bf16.mxu1 %v6836_v33  ;;  %v1439_v20 = vpop.f32.mrf.mxu0  ;;  %v6881_v33 = vld [vmem:[#allocation11 + $0x364] ss:$16 sps:$4 sm:$0xff]   ;;  %v6879_v36 = vld [vmem:[#allocation11 + $0x360] ss:$16 sps:$4 sm:$0xff]  }
 0x1d3   : > { %v1480_v45 = vpop.f32.mrf.mxu1  ;;  %v7895_v47 = vadd.f32 %v1478_v40, %v1438_v43  ;;  %3312 = vmatpush1.bf16.msra.mxu0 %v6750_v18  ;;  %v6788_v35 = vld [vmem:[#allocation11 + $0x144] ss:$16 sps:$4 sm:$0xff]   ;;  %v6786_v19 = vld [vmem:[#allocation11 + $0x140] ss:$16 sps:$4 sm:$0xff]   ;;  %v7902_v20 = vsub.s32 2, %v7870_v15 }
 0x1d4   : > { %v1440_v49 = vpop.f32.mrf.mxu0  ;;  %3313 = vmatprep.subr.bf16.mxu0 %v6755_v37  ;;  %v6884_v18 = vld [vmem:[#allocation11 + $0x344] ss:$16 sps:$4 sm:$0xff]   ;;  %v6789_v40 = vld [vmem:[#allocation11 + $0x120] ss:$16 sps:$4 sm:$0xff]  }
 0x1d5   : > { %v1481_v50 = vpop.f32.mrf.mxu1  ;;  %3353 = vmatpush1.bf16.msra.mxu1 %v6834_v38  ;;  %v6791_v37 = vld [vmem:[#allocation11 + $0x124] ss:$16 sps:$4 sm:$0xff]   ;;  %v6882_v38 = vld [vmem:[#allocation11 + $0x340] ss:$16 sps:$4 sm:$0xff]   ;;  %v7906_v49 = vsub.s32 3, %v7870_v15 }
 0x1d6   : > { %3354 = vmatprep.subr.bf16.mxu1 %v6842_v41  ;;  %v6887_v39 = vld [vmem:[#allocation11 + $0x324] ss:$16 sps:$4 sm:$0xff]   ;;  %v6885_v43 = vld [vmem:[#allocation11 + $0x320] ss:$16 sps:$4 sm:$0xff]   ;;  %v6891_v15 = vld [vmem:[#allocation11 + $0x2e8] ss:$16 sps:$4 sm:$0xff]  }
 0x1d7   : > { %3314 = vmatpush1.bf16.msra.mxu0 %v6753_v44  ;;  %v6794_v41 = vld [vmem:[#allocation11 + $0x104] ss:$16 sps:$4 sm:$0xff]   ;;  %v6792_v45 = vld [vmem:[#allocation11 + $0x100] ss:$16 sps:$4 sm:$0xff]  }
 0x1d8   : > { %3315 = vmatprep.subr.bf16.mxu0 %v6758_v21  ;;  %v6890_v44 = vld [vmem:[#allocation11 + $0x304] ss:$16 sps:$4 sm:$0xff]  }
 0x1d9   : > { %3355 = vmatpush1.bf16.msra.mxu1 %v6840_v46  ;;  %v603_v21 = vld [vmem:[%s7822_s3] sm:$0xff]  ;;  %v6797_v46 = vld [vmem:[#allocation11 + $0xec] ss:$16 sps:$4 sm:$0xff]   ;;  %v605_v50 = vld [vmem:[%s7822_s3 + $0x10] sm:$0xff]  ;;  %s7407_s3 = sshll.u32 %s7499_s29, 4  ;;  %s7408_s3 = int_to_ptr.vmem [resolvable:$false] %s7407_s3 }
 0x1da   : > { %3356 = vmatprep.subr.bf16.mxu1 %v6848_v48  ;;  %v6888_v48 = vld [vmem:[#allocation11 + $0x300] ss:$16 sps:$4 sm:$0xff]   ;;  %s7409_s15 = scalar_lea.vmem %s7408_s3, 1024  ;;  %p7410_p0 = scmp.lt.s32.totalorder %s8161_s26, %s7408_s3 }
 0x1db   : > { %3316 = vmatpush1.bf16.msra.mxu0 %v6756_v51  ;;  %v6893_v51 = vld [vmem:[#allocation11 + $0x2ec] ss:$16 sps:$4 sm:$0xff]   ;;  %p7411_p8 = scmp.lt.s32.totalorder %s7409_s15, %s7403_s19 }
 0x1dc   : > { %3317 = vmatprep.subr.bf16.mxu0 %v6761_v52  ;;  %v7909_v52 = vpack.c.bf16 %v603_v21, %v603_v21  ;;  %v6827_v21 = vld [vmem:[#allocation11 + $0x1ac] ss:$16 sps:$4 sm:$0xff]  }
 0x1dd   : > { %3357 = vmatpush1.bf16.msra.mxu1 %v6846_v53  ;;  %v752_v53 = vrot.slane %v7875_v24, %v7902_v20  ;;  %p7412_p2 = por %p7411_p8, %p7410_p0 }
 0x1de   : > { %3358 = vmatprep.subr.bf16.mxu1 %v6854_v54  ;;  %v6795_v54 = vld [vmem:[#allocation11 + $0xe8] ss:$16 sps:$4 sm:$0xff]  }
 0x1df   : > { %3318 = vmatpush1.bf16.msra.mxu0 %v6759_v55  ;;  %v6800_v55 = vld [vmem:[#allocation11 + $0xcc] ss:$16 sps:$4 sm:$0xff]   ;;  %p7413_p11 = pnand %p7412_p2, %p7406_p9 }
 0x1e0   : > { %3319 = vmatprep.subr.bf16.mxu0 %v6764_v56  ;;  %v7913_v56 = vpack.c.bf16 %v605_v50, %v605_v50  ;;  %v6825_v50 = vld [vmem:[#allocation11 + $0x1a8] ss:$16 sps:$4 sm:$0xff]  }
 0x1e1   : > { %3359 = vmatpush1.bf16.msra.mxu1 %v6852_v57  ;;  %v756_v57 = vrot.slane %v7875_v24, %v7906_v49 }
 0x1e2   : > { %3360 = vmatprep.subr.bf16.mxu1 %v6860_v58 }
 0x1e3   : > { %3320 = vmatpush1.bf16.msra.mxu0 %v6762_v59 }
 0x1e4   : > { %3321 = vmatprep.subr.bf16.mxu0 %v6767_v60  ;;  %v6896_v60 = vld [vmem:[#allocation11 + $0x2cc] ss:$16 sps:$4 sm:$0xff]  }
 0x1e5   : > { %3361 = vmatpush1.bf16.msra.mxu1 %v6858_v61 }
 0x1e6   : > { %3362 = vmatprep.subr.bf16.mxu1 %v6863_v62  ;;  %v6798_v62 = vld [vmem:[#allocation11 + $0xc8] ss:$16 sps:$4 sm:$0xff]  }
 0x1e7   : > { %3322 = vmatpush1.bf16.msra.mxu0 %v6765_v63 }
 0x1e8   : > { %3323 = vmatprep.subr.bf16.mxu0 %v6770_v0 }
 0x1e9   : > { %3363 = vmatpush1.bf16.msra.mxu1 %v6861_v1  ;;  %v6803_v1 = vld [vmem:[#allocation11 + $0xac] ss:$16 sps:$4 sm:$0xff]  }
 0x1ea   : > { %3364 = vmatprep.subr.bf16.mxu1 %v6866_v2 }
 0x1eb   : > { %3324 = vmatpush1.bf16.msra.mxu0 %v6768_v3  ;;  %v6894_v3 = vld [vmem:[#allocation11 + $0x2c8] ss:$16 sps:$4 sm:$0xff]  }
 0x1ec   : > { %3325 = vmatprep.subr.bf16.mxu0 %v6773_v5 }
 0x1ed   : > { %3365 = vmatpush1.bf16.msra.mxu1 %v6864_v6  ;;  %v6899_v6 = vld [vmem:[#allocation11 + $0x2ac] ss:$16 sps:$4 sm:$0xff]  }
 0x1ee   : > { %3366 = vmatprep.subr.bf16.mxu1 %v6869_v11 }
 0x1ef   : > { %3326 = vmatpush2.bf16.msra.mxu0 %v6771_v10 }
 0x1f0   : > { %3327 = vmatprep.subr.bf16.mxu0 %v6776_v12 }
 0x1f1   : > { %3367 = vmatpush2.bf16.msra.mxu1 %v6867_v13  ;;  %v6806_v13 = vld [vmem:[#allocation11 + $0x8c] ss:$16 sps:$4 sm:$0xff]  }
 0x1f2   : > { %3368 = vmatprep.subr.bf16.mxu1 %v6872_v14  ;;  %v6897_v14 = vld [vmem:[#allocation11 + $0x2a8] ss:$16 sps:$4 sm:$0xff]  }
 0x1f3   : > { %3328 = vmatpush2.bf16.msra.mxu0 %v6774_v16  ;;  %v6902_v16 = vld [vmem:[#allocation11 + $0x28c] ss:$16 sps:$4 sm:$0xff]  }
 0x1f4   : > { %3329 = vmatprep.subr.bf16.mxu0 %v6779_v17  ;;  %v6804_v17 = vld [vmem:[#allocation11 + $0x88] ss:$16 sps:$4 sm:$0xff]  }
 0x1f5   : > { %3369 = vmatpush2.bf16.msra.mxu1 %v6870_v22  ;;  %v6900_v22 = vld [vmem:[#allocation11 + $0x288] ss:$16 sps:$4 sm:$0xff]  }
 0x1f6   : > { %3370 = vmatprep.subr.bf16.mxu1 %v6875_v23  ;;  %v6905_v23 = vld [vmem:[#allocation11 + $0x26c] ss:$16 sps:$4 sm:$0xff]  }
 0x1f7   : > { %3330 = vmatpush2.bf16.msra.mxu0 %v6777_v25  ;;  %v6807_v25 = vld [vmem:[#allocation11 + $0x68] ss:$16 sps:$4 sm:$0xff]  }
 0x1f8   : > { %3331 = vmatprep.subr.bf16.mxu0 %v6782_v26  ;;  %v6812_v26 = vld [vmem:[#allocation11 + $0x4c] ss:$16 sps:$4 sm:$0xff]  }
 0x1f9   : > { %3371 = vmatpush2.bf16.msra.mxu1 %v6873_v8  ;;  %v6903_v8 = vld [vmem:[#allocation11 + $0x268] ss:$16 sps:$4 sm:$0xff]  }
 0x1fa   : > { %3372 = vmatprep.subr.bf16.mxu1 %v6878_v28  ;;  %v6908_v28 = vld [vmem:[#allocation11 + $0x24c] ss:$16 sps:$4 sm:$0xff]  }
 0x1fb   : > { %3332 = vmatpush2.bf16.msra.mxu0 %v6780_v29  ;;  %v6810_v29 = vld [vmem:[#allocation11 + $0x48] ss:$16 sps:$4 sm:$0xff]  }
 0x1fc   : > { %3333 = vmatprep.subr.bf16.mxu0 %v6785_v30  ;;  %v6815_v30 = vld [vmem:[#allocation11 + $0x2c] ss:$16 sps:$4 sm:$0xff]  }
 0x1fd   : > { %3373 = vmatpush2.bf16.msra.mxu1 %v6876_v31  ;;  %v6906_v31 = vld [vmem:[#allocation11 + $0x248] ss:$16 sps:$4 sm:$0xff]  }
 0x1fe   : > { %3374 = vmatprep.subr.bf16.mxu1 %v6881_v33  ;;  %v6911_v33 = vld [vmem:[#allocation11 + $0x22c] ss:$16 sps:$4 sm:$0xff]  }
 0x1ff   : > { %3334 = vmatpush2.bf16.msra.mxu0 %v6783_v34  ;;  %v6813_v34 = vld [vmem:[#allocation11 + $0x28] ss:$16 sps:$4 sm:$0xff]  }
 0x200   : > { %3335 = vmatprep.subr.bf16.mxu0 %v6788_v35  ;;  %v6818_v35 = vld [vmem:[#allocation11 + $0xc] ss:$16 sps:$4 sm:$0xff]  }
 0x201   : > { %3375 = vmatpush2.bf16.msra.mxu1 %v6879_v36  ;;  %v6909_v36 = vld [vmem:[#allocation11 + $0x228] ss:$16 sps:$4 sm:$0xff]  }
 0x202   : > { %3376 = vmatprep.subr.bf16.mxu1 %v6884_v18  ;;  %v6914_v18 = vld [vmem:[#allocation11 + $0x20c] ss:$16 sps:$4 sm:$0xff]  }
 0x203   : > { %3336 = vmatpush2.bf16.msra.mxu0 %v6786_v19  ;;  %v6816_v19 = vld [vmem:[#allocation11 + $0x8] ss:$16 sps:$4 sm:$0xff]  }
 0x204   : > { %3337 = vmatprep.subr.bf16.mxu0 %v6791_v37  ;;  %v6821_v37 = vld [vmem:[#allocation11 + $0x1ec] ss:$16 sps:$4 sm:$0xff]  }
 0x205   : > { %3377 = vmatpush2.bf16.msra.mxu1 %v6882_v38  ;;  %v6912_v38 = vld [vmem:[#allocation11 + $0x208] ss:$16 sps:$4 sm:$0xff]  }
 0x206   : > { %3378 = vmatprep.subr.bf16.mxu1 %v6887_v39  ;;  %v6917_v39 = vld [vmem:[#allocation11 + $0x3ec] ss:$16 sps:$4 sm:$0xff]  }
 0x207   : > { %3338 = vmatpush2.bf16.msra.mxu0 %v6789_v40  ;;  %v6819_v40 = vld [vmem:[#allocation11 + $0x1e8] ss:$16 sps:$4 sm:$0xff]  }
 0x208   : > { %3339 = vmatprep.subr.bf16.mxu0 %v6794_v41  ;;  %v6824_v41 = vld [vmem:[#allocation11 + $0x1cc] ss:$16 sps:$4 sm:$0xff]  }
 0x209   : > { %3379 = vmatpush2.bf16.msra.mxu1 %v6885_v43  ;;  %v6915_v43 = vld [vmem:[#allocation11 + $0x3e8] ss:$16 sps:$4 sm:$0xff]  }
 0x20a   : > { %3380 = vmatprep.subr.bf16.mxu1 %v6890_v44  ;;  %v6920_v44 = vld [vmem:[#allocation11 + $0x3cc] ss:$16 sps:$4 sm:$0xff]  }
 0x20b   : > { %3340 = vmatpush2.bf16.msra.mxu0 %v6792_v45  ;;  %v6822_v45 = vld [vmem:[#allocation11 + $0x1c8] ss:$16 sps:$4 sm:$0xff]  }
 0x20c   : > { %3391 = vmatprep.subr.bf16.mxu0 %v6797_v46  ;;  %v6918_v46 = vld [vmem:[#allocation11 + $0x3c8] ss:$16 sps:$4 sm:$0xff]  }
 0x20d   : > { %3381 = vmatpush2.bf16.msra.mxu1 %v6888_v48  ;;  %v6923_v48 = vld [vmem:[#allocation11 + $0x3ac] ss:$16 sps:$4 sm:$0xff]  }
 0x20e   : > { %3432 = vmatprep.subr.bf16.mxu1 %v6893_v51  ;;  %v1517_v58 = vpop.f32.mrf.mxu0  ;;  %3342 = vmatmul.mubr.bf16.vlgmr.msra.gmra.mxu0 %v7909_v52  ;;  %v6833_v51 = vld [vmem:[#allocation11 + $0x18c] ss:$16 sps:$4 sm:$0xff]  }
 0x20f   : > { %v1558_v59 = vpop.f32.mrf.mxu1  ;;  %v1518_v61 = vadd.f32 %v1517_v58, %v752_v53  ;;  %3392 = vmatpush1.bf16.msra.mxu0 %v6795_v54  ;;  %3423 = vmatprep.mubr.bf16.mxu0 %v7886_v32  ;;  %v6801_v32 = vld [vmem:[#allocation11 + $0xa8] ss:$16 sps:$4 sm:$0xff]   ;;  %v6926_v54 = vld [vmem:[#allocation11 + $0x38c] ss:$16 sps:$4 sm:$0xff]  }
 0x210   : > { %v1519_v63 = vpop.f32.mrf.mxu0  ;;  %3393 = vmatprep.subr.bf16.mxu0 %v6800_v55  ;;  %3383 = vmatmul.mubr.bf16.vlgmr.msra.gmra.mxu1 %v7913_v56  ;;  %v6921_v53 = vld [vmem:[#allocation11 + $0x3a8] ss:$16 sps:$4 sm:$0xff]   ;;  %v6929_v58 = vld [vmem:[#allocation11 + $0x36c] ss:$16 sps:$4 sm:$0xff]  }
 0x211   : > { %v1560_v0 = vpop.f32.mrf.mxu1  ;;  %v7920_v2 = vadd.f32 %v1558_v59, %v1518_v61  ;;  %v1520_v24 = vadd.f32 %v1519_v63, %v756_v57  ;;  %3433 = vmatpush1.bf16.msra.mxu1 %v6891_v15  ;;  %3464 = vmatprep.mubr.bf16.mxu1 %v7898_v7  ;;  %v6809_v7 = vld [vmem:[#allocation11 + $0x6c] ss:$16 sps:$4 sm:$0xff]   ;;  %v6831_v55 = vld [vmem:[#allocation11 + $0x188] ss:$16 sps:$4 sm:$0xff]  }
 0x212   : > { %v1521_v4 = vpop.f32.mrf.mxu0  ;;  %3434 = vmatprep.subr.bf16.mxu1 %v6896_v60  ;;  %v6839_v57 = vld [vmem:[#allocation11 + $0x16c] ss:$16 sps:$4 sm:$0xff]   ;;  %v6924_v15 = vld [vmem:[#allocation11 + $0x388] ss:$16 sps:$4 sm:$0xff]  }
 0x213   : > { %v1562_v5 = vpop.f32.mrf.mxu1  ;;  %v7923_v10 = vadd.f32 %v1560_v0, %v1520_v24  ;;  %3394 = vmatpush1.bf16.msra.mxu0 %v6798_v62  ;;  %v6837_v59 = vld [vmem:[#allocation11 + $0x168] ss:$16 sps:$4 sm:$0xff]   ;;  %v6845_v60 = vld [vmem:[#allocation11 + $0x14c] ss:$16 sps:$4 sm:$0xff]  }
 0x214   : > { %v1522_v11 = vpop.f32.mrf.mxu0  ;;  %3395 = vmatprep.subr.bf16.mxu0 %v6803_v1  ;;  %v6927_v61 = vld [vmem:[#allocation11 + $0x368] ss:$16 sps:$4 sm:$0xff]   ;;  %v6932_v62 = vld [vmem:[#allocation11 + $0x34c] ss:$16 sps:$4 sm:$0xff]  }
 0x215   : > { %v1563_v12 = vpop.f32.mrf.mxu1  ;;  %3435 = vmatpush1.bf16.msra.mxu1 %v6894_v3  ;;  %v6843_v63 = vld [vmem:[#allocation11 + $0x148] ss:$16 sps:$4 sm:$0xff]   ;;  %v6851_v0 = vld [vmem:[#allocation11 + $0x12c] ss:$16 sps:$4 sm:$0xff]   ;;  %v1693_v11 = vld [vmem:[%s8270_s30] sm:$0xf] }
 0x216   : > { %3436 = vmatprep.subr.bf16.mxu1 %v6899_v6  ;;  %v6930_v1 = vld [vmem:[#allocation11 + $0x348] ss:$16 sps:$4 sm:$0xff]   ;;  %v6935_v24 = vld [vmem:[#allocation11 + $0x32c] ss:$16 sps:$4 sm:$0xff]  }
 0x217   : > { %3396 = vmatpush1.bf16.msra.mxu0 %v6801_v32  ;;  %v6849_v3 = vld [vmem:[#allocation11 + $0x128] ss:$16 sps:$4 sm:$0xff]   ;;  %v6857_v4 = vld [vmem:[#allocation11 + $0x10c] ss:$16 sps:$4 sm:$0xff]  }
 0x218   : > { %3397 = vmatprep.subr.bf16.mxu0 %v6806_v13  ;;  %v6933_v5 = vld [vmem:[#allocation11 + $0x328] ss:$16 sps:$4 sm:$0xff]   ;;  %v6938_v6 = vld [vmem:[#allocation11 + $0x30c] ss:$16 sps:$4 sm:$0xff]   ;;  %v1698_v13 = vrot.slane %v1693_v11, %v7879_v9 }
 0x219   : > { %3437 = vmatpush1.bf16.msra.mxu1 %v6897_v14  ;;  %v6855_v32 = vld [vmem:[#allocation11 + $0x108] ss:$16 sps:$4 sm:$0xff]   ;;  %v7496_v14 = vmov 0.0  }
 0x21a   : > { %3438 = vmatprep.subr.bf16.mxu1 %v6902_v16  ;;  %v6936_v12 = vld [vmem:[#allocation11 + $0x308] ss:$16 sps:$4 sm:$0xff]   ;;  %v1702_v16 = vrot.slane %v1693_v11, %v7882_v27 }
 0x21b   : > { %3398 = vmatpush1.bf16.msra.mxu0 %v6804_v17 }
 0x21c   : > { %3399 = vmatprep.subr.bf16.mxu0 %v6809_v7 }
 0x21d   : > { %3439 = vmatpush1.bf16.msra.mxu1 %v6900_v22 }
 0x21e   : > { %3440 = vmatprep.subr.bf16.mxu1 %v6905_v23 }
 0x21f   : > { %3400 = vmatpush1.bf16.msra.mxu0 %v6807_v25 }
 0x220   : > { %3401 = vmatprep.subr.bf16.mxu0 %v6812_v26 }
 0x221   : > { %3441 = vmatpush1.bf16.msra.mxu1 %v6903_v8 }
 0x222   : > { %3442 = vmatprep.subr.bf16.mxu1 %v6908_v28 }
 0x223   : > { %3402 = vmatpush1.bf16.msra.mxu0 %v6810_v29 }
 0x224   : > { %3403 = vmatprep.subr.bf16.mxu0 %v6815_v30 }
 0x225   : > { %3443 = vmatpush1.bf16.msra.mxu1 %v6906_v31 }
 0x226   : > { %3444 = vmatprep.subr.bf16.mxu1 %v6911_v33 }
 0x227   : > { %3404 = vmatpush1.bf16.msra.mxu0 %v6813_v34 }
 0x228   : > { %3405 = vmatprep.subr.bf16.mxu0 %v6818_v35  ;;  %v3474_v35 = vmul.f32 0.125, %v7895_v47 }
 0x229   : > { %3445 = vmatpush1.bf16.msra.mxu1 %v6909_v36 }
 0x22a   : > { %3446 = vmatprep.subr.bf16.mxu1 %v6914_v18 }
 0x22b   : > { %3406 = vmatpush1.bf16.msra.mxu0 %v6816_v19  ;;  %v3478_v19 = vpack.c.bf16 %v3474_v35, %v3474_v35 }
 0x22c   : > { %3407 = vmatprep.subr.bf16.mxu0 %v6821_v37  ;;  %v3476_v37 = vmul.f32 0.125, %v7923_v10 }
 0x22d   : > { %3447 = vmatpush1.bf16.msra.mxu1 %v6912_v38 }
 0x22e   : > { %3448 = vmatprep.subr.bf16.mxu1 %v6917_v39  ;;  %v7955_v38 = vpack.c.bf16 %v3476_v37, %v3476_v37  ;;  %v1710_v39 = vrot.slane %v1693_v11, %v7906_v49 }
 0x22f   : > { %3408 = vmatpush2.bf16.msra.mxu0 %v6819_v40 }
 0x230   : > { %3409 = vmatprep.subr.bf16.mxu0 %v6824_v41 }
 0x231   : > { %3449 = vmatpush2.bf16.msra.mxu1 %v6915_v43 }
 0x232   : > { %3450 = vmatprep.subr.bf16.mxu1 %v6920_v44 }
 0x233   : > { %3410 = vmatpush2.bf16.msra.mxu0 %v6822_v45 }
 0x234   : > { %3411 = vmatprep.subr.bf16.mxu0 %v6827_v21 }
 0x235   : > { %3451 = vmatpush2.bf16.msra.mxu1 %v6918_v46 }
 0x236   : > { %3452 = vmatprep.subr.bf16.mxu1 %v6923_v48 }
 0x237   : > { %3412 = vmatpush2.bf16.msra.mxu0 %v6825_v50 }
 0x238   : > { %3413 = vmatprep.subr.bf16.mxu0 %v6833_v51 }
 0x239   : > { %3453 = vmatpush2.bf16.msra.mxu1 %v6921_v53 }
 0x23a   : > { %3454 = vmatprep.subr.bf16.mxu1 %v6926_v54 }
 0x23b   : > { %3414 = vmatpush2.bf16.msra.mxu0 %v6831_v55 }
 0x23c   : > { %3415 = vmatprep.subr.bf16.mxu0 %v6839_v57 }
 0x23d   : > { %3455 = vmatpush2.bf16.msra.mxu1 %v6924_v15 }
 0x23e   : > { %3456 = vmatprep.subr.bf16.mxu1 %v6929_v58  ;;  %v2647_v58 = vld [vmem:[#allocation13] sm:$0xf] }
 0x23f   : > { %3416 = vmatpush2.bf16.msra.mxu0 %v6837_v59  ;;  %v2652_v59 = vrot.slane %v2647_v58, %v7879_v9 }
 0x240   : > { %3417 = vmatprep.subr.bf16.mxu0 %v6845_v60  ;;  %v2656_v60 = vrot.slane %v2647_v58, %v7882_v27 }
 0x241   : > { %3457 = vmatpush2.bf16.msra.mxu1 %v6927_v61 }
 0x242   : > { %3458 = vmatprep.subr.bf16.mxu1 %v6932_v62 }
 0x243   : > { %3418 = vmatpush2.bf16.msra.mxu0 %v6843_v63 }
 0x244   : > { %3419 = vmatprep.subr.bf16.mxu0 %v6851_v0 }
 0x245   : > { %3459 = vmatpush2.bf16.msra.mxu1 %v6930_v1 }
 0x246   : > { %3460 = vmatprep.subr.bf16.mxu1 %v6935_v24 }
 0x247   : > { %3420 = vmatpush2.bf16.msra.mxu0 %v6849_v3 }
 0x248   : > { %3421 = vmatprep.subr.bf16.mxu0 %v6857_v4 }
 0x249   : > { %3461 = vmatpush2.bf16.msra.mxu1 %v6933_v5 }
 0x24a   : > { %3462 = vmatprep.subr.bf16.mxu1 %v6938_v6 }
 0x24b   : > { %3422 = vmatpush2.bf16.msra.mxu0 %v6855_v32 }
 0x24c   : > { %6135 = vmatprep.subr.bf16.mxu0 %v7496_v14 }
 0x24d   : > { %3463 = vmatpush2.bf16.msra.mxu1 %v6936_v12 }
 0x24e   : > { %v2389_v17 = vpop.f32.mrf.mxu0  ;;  %3424 = vmatmul.mubr.bf16.vlgmr.msra.gmra.mxu0 %v7909_v52  ;;  %6141 = vmatprep.subr.bf16.mxu1 %v7496_v14  ;;  %v3473_v52 = vmul.f32 0.125, %v7893_v42  ;;  %v3475_v42 = vmul.f32 0.125, %v7920_v2  ;;  %v1706_v2 = vrot.slane %v1693_v11, %v7902_v20 }
 0x24f   : > { %v2430_v7 = vpop.f32.mrf.mxu1  ;;  %v2390_v22 = vadd.f32 %v2389_v17, %v1698_v13  ;;  %6137 = vmatprep.mubr.msk.bf16.mxu0 %vm7497_vm0, %v7496_v14 }
 0x250   : > { %v2391_v23 = vpop.f32.mrf.mxu0  ;;  %3465 = vmatmul.mubr.bf16.vlgmr.msra.gmra.mxu1 %v7913_v56  ;;  %v3477_v56 = vpack.c.bf16 %v3473_v52, %v3473_v52  ;;  %v7947_v47 = vpack.c.bf16 %v3475_v42, %v3475_v42 }
 0x251   : > { %v2432_v25 = vpop.f32.mrf.mxu1  ;;  %v2431_v26 = vadd.f32 %v2430_v7, %v2390_v22  ;;  %v2392_v8 = vadd.f32 %v2391_v23, %v1702_v16  ;;  %6143 = vmatprep.mubr.msk.bf16.mxu1 %vm7497_vm0, %v7496_v14 }
 0x252   : > { %v2393_v28 = vpop.f32.mrf.mxu0 }
 0x253   : > { %v2434_v29 = vpop.f32.mrf.mxu1  ;;  %v3481_v30 = vpack.c.bf16 %v2431_v26, %v2431_v26  ;;  %v2433_v31 = vadd.f32 %v2432_v25, %v2392_v8  ;;  %v2660_v28 = vrot.slane %v2647_v58, %v7902_v20 }
 0x254   : > { %v2394_v33 = vpop.f32.mrf.mxu0  ;;  %v2664_v29 = vrot.slane %v2647_v58, %v7906_v49 }
 0x255   : > { %v2435_v34 = vpop.f32.mrf.mxu1  ;;  %v3496_v36 = vsel %vm3491_vm1, %v3481_v30, 0  ;;  %v3482_v18 = vpack.c.bf16 %v2433_v31, %v2433_v31  ;;  %3603 = vrot.lane.b32.xlu0 %v3481_v30, %s7498_s6 }
 0x256   : > { %6136 = vmatpush3.bf16.xpose.msra.mxu0 %v3496_v36 }
 0x257   : > { %3822 = vrot.lane.b32.xlu1 %v3482_v18, %s7498_s6  ;;  %6147 = vmatprep.subr.bf16.mxu0 %v7496_v14  ;;  %v3717_v0 = vsel %vm3491_vm1, %v3482_v18, 0 }
 0x259   : > { %3600 = vrot.lane.b32.xlu0 %v3477_v56, %s7498_s6 }
 0x25b   : > { %3819 = vrot.lane.b32.xlu1 %v3478_v19, %s7498_s6 }
 0x25d   : > { %6138 = vmatmul.mubr.msk.bf16.vlgmr.msra.gmra.mxu0 %vm3491_vm1, %v3477_v56 }
 0x25e   : > { %6149 = vmatprep.mubr.msk.bf16.mxu0 %vm7497_vm0, %v7496_v14 }
 0x25f   : > { %4038 = vrot.lane.b32.xlu1 %v7947_v47, %s7498_s6 }
 0x263   : > { %4257 = vrot.lane.b32.xlu1 %v7955_v38, %s7498_s6 }
 0x28e   : > { %v2471_v40 = vpop.f32.mrf.mxu0 }
 0x28f   : > { %v2512_v41 = vpop.f32.mrf.mxu1  ;;  %v2472_v10 = vadd.f32 %v2471_v40, %v1706_v2 }
 0x290   : > { %v2473_v43 = vpop.f32.mrf.mxu0 }
 0x291   : > { %v2514_v44 = vpop.f32.mrf.mxu1  ;;  %v2513_v45 = vadd.f32 %v2512_v41, %v2472_v10  ;;  %v2474_v21 = vadd.f32 %v2473_v43, %v1710_v39  ;;  %v8012_v41 = vld [vmem:[%s8271_s9] sm:$0xff] }
 0x292   : > { %v2475_v46 = vpop.f32.mrf.mxu0  ;;  %vm3490_vm3 = vcmp.eq.f32.partialorder %v8012_v41, 0.0 }
 0x293   : > { %v2516_v48 = vpop.f32.mrf.mxu1  ;;  %v3483_v50 = vpack.c.bf16 %v2513_v45, %v2513_v45  ;;  %v2515_v51 = vadd.f32 %v2514_v44, %v2474_v21 }
 0x294   : > { %v2476_v53 = vpop.f32.mrf.mxu0 }
 0x295   : > { %v2517_v54 = vpop.f32.mrf.mxu1  ;;  %v3484_v55 = vpack.c.bf16 %v2515_v51, %v2515_v51  ;;  %4041 = vrot.lane.b32.xlu0 %v3483_v50, %s7498_s6  ;;  %v3936_v25 = vsel %vm3491_vm1, %v3483_v50, 0 }
 0x297   : > { %v4155_v33 = vsel %vm3491_vm1, %v3484_v55, 0 }
 0x299   : > { %4260 = vrot.lane.b32.xlu0 %v3484_v55, %s7498_s6 }
 0x2c7   : > { %v3604_v57 = vpop.permute.xlu0 %3603 }
 0x2c8   : > { %v3609_v15 = vsel %vm3491_vm1, %v3604_v57, 0 }
 0x2c9   : > { %6148 = vmatpush3.bf16.xpose.msra.mxu0 %v3609_v15  ;;  %v3823_v16 = vpop.permute.xlu1 %3822 }
 0x2ca   : > { %6159 = vmatprep.subr.bf16.mxu0 %v7496_v14  ;;  %v3828_v22 = vsel %vm3491_vm1, %v3823_v16, 0 }
 0x2cb   : > { %v3601_v62 = vpop.permute.xlu0 %3600 }
 0x2cd   : > { %v3820_v23 = vpop.permute.xlu1 %3819 }
 0x2ce   : > { %v3343_v61 = vpop.f32.mrf.mxu0 }
 0x2cf   : > { %v3344_v63 = vadd.f32 %v3343_v61, %v2652_v59 }
 0x2d0   : > { %6150 = vmatmul.mubr.msk.bf16.vlgmr.msra.gmra.mxu0 %vm3491_vm1, %v3601_v62  ;;  %v3345_v1 = vpop.f32.mrf.mxu0  ;;  %v3384_v24 = vpop.f32.mrf.mxu1 }
 0x2d1   : > { %6160 = vmatpush3.bf16.xpose.msra.mxu0 %v3717_v0  ;;  %6161 = vmatprep.mubr.msk.bf16.mxu0 %vm7497_vm0, %v7496_v14  ;;  %v3346_v3 = vadd.f32 %v3345_v1, %v2656_v60  ;;  %v3385_v4 = vadd.f32 %v3384_v24, %v3344_v63  ;;  %v4039_v30 = vpop.permute.xlu1 %4038 }
 0x2d2   : > { %6171 = vmatprep.subr.bf16.mxu0 %v7496_v14  ;;  %v3347_v5 = vpop.f32.mrf.mxu0  ;;  %v3386_v6 = vpop.f32.mrf.mxu1 }
 0x2d3   : > { %v7972_v32 = vpack.c.bf16 %v3385_v4, %v3385_v4  ;;  %v7974_v11 = vadd.f32 %v3386_v6, %v3346_v3 }
 0x2d4   : > { %v3348_v12 = vpop.f32.mrf.mxu0  ;;  %v3388_v13 = vpop.f32.mrf.mxu1 }
 0x2d5   : > { %v3557_v17 = vsel %vm3555_vm2, %v7972_v32, 0  ;;  %v4258_v44 = vpop.permute.xlu1 %4257 }
 0x2d6   : > { %6142 = vmatpush3.bf16.msra.mxu1 %v3557_v17  ;;  %v3389_v7 = vpop.f32.mrf.mxu1 }
 0x2d7   : > { %6153 = vmatprep.subr.bf16.mxu1 %v7496_v14 }
 0x2d8   : > { %6162 = vmatmul.mubr.msk.bf16.vlgmr.msra.gmra.mxu0 %vm3491_vm1, %v3478_v19 }
 0x2d9   : > { %6172 = vmatpush3.bf16.xpose.msra.mxu0 %v3828_v22  ;;  %6173 = vmatprep.mubr.msk.bf16.mxu0 %vm7497_vm0, %v7496_v14 }
 0x2da   : > { %6183 = vmatprep.subr.bf16.mxu0 %v7496_v14 }
 0x2e0   : > { %6174 = vmatmul.mubr.msk.bf16.vlgmr.msra.gmra.mxu0 %vm3491_vm1, %v3820_v23 }
 0x2e1   : > { %6184 = vmatpush3.bf16.xpose.msra.mxu0 %v3936_v25  ;;  %6185 = vmatprep.mubr.msk.bf16.mxu0 %vm7497_vm0, %v7496_v14 }
 0x2e2   : > { %6195 = vmatprep.subr.bf16.mxu0 %v7496_v14 }
 0x2e8   : > { %6186 = vmatmul.mubr.msk.bf16.vlgmr.msra.gmra.mxu0 %vm3491_vm1, %v7947_v47 }
 0x2e9   : > { %6197 = vmatprep.mubr.msk.bf16.mxu0 %vm7497_vm0, %v7496_v14 }
 0x307   : > { %v4042_v26 = vpop.permute.xlu0 %4041 }
 0x308   : > { %v4047_v8 = vsel %vm3491_vm1, %v4042_v26, 0 }
 0x309   : > { %6196 = vmatpush3.bf16.xpose.msra.mxu0 %v4047_v8 }
 0x30a   : > { %6207 = vmatprep.subr.bf16.mxu0 %v7496_v14 }
 0x30b   : > { %v4261_v2 = vpop.permute.xlu0 %4260 }
 0x30c   : > { %v4266_v40 = vsel %vm3491_vm1, %v4261_v2, 0 }
 0x30e   : > { %v3425_v52 = vpop.f32.mrf.mxu0 }
 0x30f   : > { %v3426_v31 = vadd.f32 %v3425_v52, %v2660_v28 }
 0x310   : > { %6198 = vmatmul.mubr.msk.bf16.vlgmr.msra.gmra.mxu0 %vm3491_vm1, %v4039_v30  ;;  %v3427_v34 = vpop.f32.mrf.mxu0  ;;  %v3466_v35 = vpop.f32.mrf.mxu1 }
 0x311   : > { %6208 = vmatpush3.bf16.xpose.msra.mxu0 %v4155_v33  ;;  %v3428_v36 = vadd.f32 %v3427_v34, %v2664_v29  ;;  %6209 = vmatprep.mubr.msk.bf16.mxu0 %vm7497_vm0, %v7496_v14  ;;  %v8001_v18 = vadd.f32 %v3466_v35, %v3426_v31 }
 0x312   : > { %6219 = vmatprep.subr.bf16.mxu0 %v7496_v14  ;;  %v3429_v56 = vpop.f32.mrf.mxu0  ;;  %v3468_v19 = vpop.f32.mrf.mxu1 }
 0x313   : > { %v8004_v42 = vadd.f32 %v3468_v19, %v3428_v36 }
 0x314   : > { %v3430_v47 = vpop.f32.mrf.mxu0  ;;  %v3470_v37 = vpop.f32.mrf.mxu1 }
 0x316   : > { %v3471_v39 = vpop.f32.mrf.mxu1 }
 0x318   : > { %6210 = vmatmul.mubr.msk.bf16.vlgmr.msra.gmra.mxu0 %vm3491_vm1, %v7955_v38 }
 0x319   : > { %6220 = vmatpush3.bf16.xpose.msra.mxu0 %v4266_v40  ;;  %6221 = vmatprep.mubr.msk.bf16.mxu0 %vm7497_vm0, %v7496_v14 }
 0x31d   : > { %v3532_v10 = vpop.f32.mrf.mxu0 }
 0x31e   : > { %v3538_v43 = vsel %vm3490_vm3, -1e+09, %v3532_v10 }
 0x31f   : > { %v6139_v45 = vpop.f32.mrf.mxu0  ;;  %v3540_v38 = vsel %vm3539_vm4, %v3538_v43, -inf }
 0x320   : > { %6222 = vmatmul.mubr.msk.bf16.vlgmr.msra.gmra.mxu0 %vm3491_vm1, %v4258_v44  ;;  %3541 = vmax.xlane.f32.xlu0 %v3540_v38 }
 0x321   : > { %v3535_v21 = vpop.f32.mrf.mxu0 }
 0x323   : > { %v6140_v46 = vpop.f32.mrf.mxu0 }
 0x390   : > { %v3645_v48 = vpop.f32.mrf.mxu0 }
 0x391   : > { %v3651_v50 = vsel %vm3490_vm3, -1e+09, %v3645_v48 }
 0x392   : > { %v6151_v51 = vpop.f32.mrf.mxu0  ;;  %v3652_v53 = vsel %vm3539_vm4, %v3651_v50, -inf }
 0x393   : > { %3653 = vmax.xlane.f32.xlu1 %v3652_v53 }
 0x394   : > { %v3648_v54 = vpop.f32.mrf.mxu0 }
 0x396   : > { %v6152_v55 = vpop.f32.mrf.mxu0 }
 0x398   : > { %v3753_v57 = vpop.f32.mrf.mxu0 }
 0x399   : > { %v3759_v15 = vsel %vm3490_vm3, -1e+09, %v3753_v57 }
 0x39a   : > { %v6163_v58 = vpop.f32.mrf.mxu0  ;;  %v3760_v59 = vsel %vm3539_vm4, %v3759_v15, -inf }
 0x39b   : > { %3761 = vmax.xlane.f32.xlu0 %v3760_v59 }
 0x39c   : > { %v3756_v60 = vpop.f32.mrf.mxu0 }
 0x39e   : > { %v6164_v61 = vpop.f32.mrf.mxu0 }
 0x3a0   : > { %v3864_v62 = vpop.f32.mrf.mxu0 }
 0x3a1   : > { %v3870_v63 = vsel %vm3490_vm3, -1e+09, %v3864_v62 }
 0x3a2   : > { %v6175_v0 = vpop.f32.mrf.mxu0  ;;  %v3871_v1 = vsel %vm3539_vm4, %v3870_v63, -inf }
 0x3a3   : > { %3872 = vmax.xlane.f32.xlu0 %v3871_v1 }
 0x3a4   : > { %v3867_v24 = vpop.f32.mrf.mxu0 }
 0x3a6   : > { %v6176_v3 = vpop.f32.mrf.mxu0 }
 0x3a8   : > { %v3972_v4 = vpop.f32.mrf.mxu0 }
 0x3a9   : > { %v3978_v5 = vsel %vm3490_vm3, -1e+09, %v3972_v4  ;;  %v3542_v17 = vpop.xlane.xlu0 %3541 }
 0x3aa   : > { %v6187_v6 = vpop.f32.mrf.mxu0  ;;  %v3979_v12 = vsel %vm3539_vm4, %v3978_v5, -inf  ;;  %v3543_v7 = vsub.f32 %v3538_v43, %v3542_v17 }
 0x3ab   : > { %3980 = vmax.xlane.f32.xlu1 %v3979_v12 }
 0x3ac   : > { %v3975_v13 = vpop.f32.mrf.mxu0  ;;  %v3544_v22 = vmul.f32 1.442695, %v3543_v7 }
 0x3ae   : > { %v6188_v16 = vpop.f32.mrf.mxu0  ;;  %7131 = vpow2.f32 %v3544_v22 }
 0x3bb   : > { %v8039_v34 = vpop.eup %7131 }
 0x3bc   : > { %v3546_v56 = vsel %vm3539_vm4, %v8039_v34, 0.0 }
 0x3d0   : > { %v4083_v23 = vpop.f32.mrf.mxu0 }
 0x3d1   : > { %v4089_v25 = vsel %vm3490_vm3, -1e+09, %v4083_v23 }
 0x3d2   : > { %v6199_v26 = vpop.f32.mrf.mxu0  ;;  %v4090_v8 = vsel %vm3539_vm4, %v4089_v25, -inf }
 0x3d3   : > { %4091 = vmax.xlane.f32.xlu0 %v4090_v8  ;;  %v3487_v8 = vpack.c.bf16 %v8001_v18, %v8001_v18 }
 0x3d4   : > { %v4086_v28 = vpop.f32.mrf.mxu0 }
 0x3d5   : > { %v3488_v28 = vpack.c.bf16 %v8004_v42, %v8004_v42 }
 0x3d6   : > { %v6200_v29 = vpop.f32.mrf.mxu0 }
 0x3d8   : > { %v4191_v52 = vpop.f32.mrf.mxu0 }
 0x3d9   : > { %v4197_v30 = vsel %vm3490_vm3, -1e+09, %v4191_v52 }
 0x3da   : > { %v6211_v31 = vpop.f32.mrf.mxu0  ;;  %v4198_v33 = vsel %vm3539_vm4, %v4197_v30, -inf }
 0x3db   : > { %4199 = vmax.xlane.f32.xlu1 %v4198_v33 }
 0x3dc   : > { %v4194_v35 = vpop.f32.mrf.mxu0 }
 0x3de   : > { %v6212_v36 = vpop.f32.mrf.mxu0 }
 0x3df   : > { %3547 = vadd.xlane.f32.xlu1 %v3546_v56 }
 0x3e0   : > { %v4302_v19 = vpop.f32.mrf.mxu0 }
 0x3e1   : > { %v4308_v47 = vsel %vm3490_vm3, -1e+09, %v4302_v19 }
 0x3e2   : > { %v6223_v37 = vpop.f32.mrf.mxu0  ;;  %v4309_v2 = vsel %vm3539_vm4, %v4308_v47, -inf }
 0x3e3   : > { %4310 = vmax.xlane.f32.xlu0 %v4309_v2 }
 0x3e4   : > { %v4305_v39 = vpop.f32.mrf.mxu0 }
 0x3e6   : > { %v6224_v40 = vpop.f32.mrf.mxu0 }
 0x41c   : > { %v3654_v10 = vpop.xlane.xlu1 %3653 }
 0x41d   : > { %v3655_v43 = vsub.f32 %v3651_v50, %v3654_v10  ;;  %v3995_v10 = vsel %vm3555_vm2, %v3487_v8, 0 }
 0x41f   : > { %v3656_v44 = vmul.f32 1.442695, %v3655_v43 }
 0x421   : > { %7133 = vpow2.f32 %v3656_v44 }
 0x424   : > { %v3762_v45 = vpop.xlane.xlu0 %3761 }
 0x425   : > { %v3763_v38 = vsub.f32 %v3759_v15, %v3762_v45  ;;  %v3486_v15 = vpack.c.bf16 %v7974_v11, %v7974_v11 }
 0x427   : > { %v3764_v21 = vmul.f32 1.442695, %v3763_v38  ;;  %v3776_v42 = vsel %vm3555_vm2, %v3486_v15, 0 }
 0x429   : > { %7135 = vpow2.f32 %v3764_v21 }
 0x42c   : > { %v3873_v46 = vpop.xlane.xlu0 %3872 }
 0x42d   : > { %v3874_v48 = vsub.f32 %v3870_v63, %v3873_v46 }
 0x42e   : > { %v7134_v51 = vpop.eup %7133 }
 0x42f   : > { %v3875_v53 = vmul.f32 1.442695, %v3874_v48  ;;  %v3658_v41 = vsel %vm3539_vm4, %v7134_v51, 0.0 }
 0x430   : > { %3659 = vadd.xlane.f32.xlu0 %v3658_v41 }
 0x431   : > { %7137 = vpow2.f32 %v3875_v53 }
 0x434   : > { %v3981_v58 = vpop.xlane.xlu1 %3980 }
 0x435   : > { %v3982_v59 = vsub.f32 %v3978_v5, %v3981_v58 }
 0x436   : > { %v8047_v54 = vpop.eup %7135 }
 0x437   : > { %v3766_v55 = vsel %vm3539_vm4, %v8047_v54, 0.0  ;;  %v3983_v60 = vmul.f32 1.442695, %v3982_v59 }
 0x438   : > { %3767 = vadd.xlane.f32.xlu1 %v3766_v55 }
 0x439   : > { %7139 = vpow2.f32 %v3983_v60 }
 0x43e   : > { %v8051_v50 = vpop.eup %7137 }
 0x43f   : > { %v3877_v57 = vsel %vm3539_vm4, %v8051_v50, 0.0 }
 0x440   : > { %3878 = vadd.xlane.f32.xlu0 %v3877_v57  ;;  %v4214_v57 = vsel %vm3555_vm2, %v3488_v28, 0 }
 0x446   : > { %v8060_v4 = vpop.eup %7139 }
 0x447   : > { %v3985_v5 = vsel %vm3539_vm4, %v8060_v4, 0.0 }
 0x449   : > { %3884 = vrot.lane.b32.xlu1 %v3486_v15, %s7498_s6 }
 0x456   : > { %3665 = vrot.lane.b32.xlu0 %v7972_v32, %s7498_s6 }
 0x45c   : > { %v4092_v61 = vpop.xlane.xlu0 %4091 }
 0x45d   : > { %v4093_v62 = vsub.f32 %v4089_v25, %v4092_v61 }
 0x45f   : > { %v4094_v63 = vmul.f32 1.442695, %v4093_v62 }
 0x461   : > { %7141 = vpow2.f32 %v4094_v63 }
 0x464   : > { %v4200_v0 = vpop.xlane.xlu1 %4199 }
 0x465   : > { %v4201_v1 = vsub.f32 %v4197_v30, %v4200_v0 }
 0x467   : > { %v4202_v24 = vmul.f32 1.442695, %v4201_v1 }
 0x468   : > { %v3548_v3 = vpop.xlane.xlu1 %3547 }
 0x469   : > { %7143 = vpow2.f32 %v4202_v24 }
 0x46a   : > { %7145 = vrcp.f32 %v3548_v3 }
 0x46c   : > { %v4311_v11 = vpop.xlane.xlu0 %4310 }
 0x46d   : > { %v4312_v6 = vsub.f32 %v4308_v47, %v4311_v11  ;;  %3986 = vadd.xlane.f32.xlu1 %v3985_v5  ;;  %v6939_v11 = vld [vmem:[#allocation14 + $0xe0] ss:$16 sps:$4 sm:$0xff]   ;;  %v6944_v5 = vld [vmem:[#allocation14 + $0xc4] ss:$16 sps:$4 sm:$0xff]  }
 0x46e   : > { %v8064_v32 = vpop.eup %7141 }
 0x46f   : > { %v4313_v12 = vmul.f32 1.442695, %v4312_v6  ;;  %v4096_v13 = vsel %vm3539_vm4, %v8064_v32, 0.0  ;;  %v6942_v6 = vld [vmem:[#allocation14 + $0xc0] ss:$16 sps:$4 sm:$0xff]  }
 0x471   : > { %7147 = vpow2.f32 %v4313_v12  ;;  %4097 = vadd.xlane.f32.xlu1 %v4096_v13  ;;  %v6948_v12 = vld [vmem:[#allocation14 + $0x80] ss:$16 sps:$4 sm:$0xff]   ;;  %v6950_v13 = vld [vmem:[#allocation14 + $0x84] ss:$16 sps:$4 sm:$0xff]  }
 0x476   : > { %v8068_v16 = vpop.eup %7143 }
 0x477   : > { %v7146_v17 = vpop.eup %7145  ;;  %v4204_v7 = vsel %vm3539_vm4, %v8068_v16, 0.0 }
 0x478   : > { %4205 = vadd.xlane.f32.xlu1 %v4204_v7  ;;  %v3550_v22 = vmul.f32 %v7146_v17, %v8039_v34  ;;  %v6951_v17 = vld [vmem:[#allocation14 + $0x60] ss:$16 sps:$4 sm:$0xff]   ;;  %v6956_v7 = vld [vmem:[#allocation14 + $0x44] ss:$16 sps:$4 sm:$0xff]  }
 0x47a   : > { %v3551_v23 = vpack.c.bf16 %v3550_v22, %v3550_v22  ;;  %v6954_v22 = vld [vmem:[#allocation14 + $0x40] ss:$16 sps:$4 sm:$0xff]  }
 0x47c   : > { %6144 = vmatmul.mubr.msk.bf16.vlgmr.msra.gmra.mxu1 %vm3539_vm4, %v3551_v23  ;;  %v6959_v23 = vld [vmem:[#allocation14 + $0x24] ss:$16 sps:$4 sm:$0xff]  }
 0x47d   : > { %6155 = vmatprep.mubr.msk.bf16.mxu1 %vm7497_vm0, %v7496_v14 }
 0x47e   : > { %v8076_v25 = vpop.eup %7147 }
 0x47f   : > { %v4315_v26 = vsel %vm3539_vm4, %v8076_v25, 0.0 }
 0x480   : > { %4316 = vadd.xlane.f32.xlu0 %v4315_v26  ;;  %v6962_v26 = vld [vmem:[#allocation14 + $0x4] ss:$16 sps:$4 sm:$0xff]  }
 0x489   : > { %4103 = vrot.lane.b32.xlu1 %v3487_v8, %s7498_s6  ;;  %v6960_v8 = vld [vmem:[#allocation14] ss:$16 sps:$4 sm:$0xff]  }
 0x48d   : > { %4322 = vrot.lane.b32.xlu1 %v3488_v28, %s7498_s6  ;;  %v6965_v28 = vld [vmem:[#allocation14 + $0x1e4] ss:$16 sps:$4 sm:$0xff]  }
 0x4b9   : > { %v3660_v29 = vpop.xlane.xlu0 %3659 }
 0x4ba   : > { %7149 = vrcp.f32 %v3660_v29  ;;  %v6963_v29 = vld [vmem:[#allocation14 + $0x1e0] ss:$16 sps:$4 sm:$0xff]  }
 0x4c1   : > { %v3768_v52 = vpop.xlane.xlu1 %3767 }
 0x4c2   : > { %7151 = vrcp.f32 %v3768_v52  ;;  %v6968_v52 = vld [vmem:[#allocation14 + $0x1c4] ss:$16 sps:$4 sm:$0xff]  }
 0x4c5   : > { %v3885_v19 = vpop.permute.xlu1 %3884 }
 0x4c6   : > { %v3890_v2 = vsel %vm3555_vm2, %v3885_v19, 0  ;;  %v6983_v19 = vld [vmem:[#allocation14 + $0x124] ss:$16 sps:$4 sm:$0xff]  }
 0x4c7   : > { %v7150_v30 = vpop.eup %7149 }
 0x4c8   : > { %v3662_v33 = vmul.f32 %v7150_v30, %v7134_v51  ;;  %v6966_v30 = vld [vmem:[#allocation14 + $0x1c0] ss:$16 sps:$4 sm:$0xff]  }
 0x4c9   : > { %v3879_v31 = vpop.xlane.xlu0 %3878 }
 0x4ca   : > { %7153 = vrcp.f32 %v3879_v31  ;;  %v3663_v18 = vpack.c.bf16 %v3662_v33, %v3662_v33  ;;  %v6971_v31 = vld [vmem:[#allocation14 + $0x1a4] ss:$16 sps:$4 sm:$0xff]   ;;  %v6969_v33 = vld [vmem:[#allocation14 + $0x1a0] ss:$16 sps:$4 sm:$0xff]  }
 0x4cd   : > { %v3666_v34 = vpop.permute.xlu0 %3665 }
 0x4ce   : > { %v3671_v35 = vsel %vm3555_vm2, %v3666_v34, 0  ;;  %v6974_v34 = vld [vmem:[#allocation14 + $0x184] ss:$16 sps:$4 sm:$0xff]  }
 0x4cf   : > { %6154 = vmatpush3.bf16.msra.mxu1 %v3671_v35  ;;  %v7152_v36 = vpop.eup %7151  ;;  %v6972_v35 = vld [vmem:[#allocation14 + $0x180] ss:$16 sps:$4 sm:$0xff]  }
 0x4d0   : > { %6165 = vmatprep.subr.bf16.mxu1 %v7496_v14  ;;  %v3770_v56 = vmul.f32 %v7152_v36, %v8047_v54  ;;  %v6975_v36 = vld [vmem:[#allocation14 + $0x160] ss:$16 sps:$4 sm:$0xff]  }
 0x4d2   : > { %6156 = vmatmul.mubr.msk.bf16.vlgmr.msra.gmra.mxu1 %vm3539_vm4, %v3663_v18  ;;  %v3771_v47 = vpack.c.bf16 %v3770_v56, %v3770_v56  ;;  %v6977_v18 = vld [vmem:[#allocation14 + $0x164] ss:$16 sps:$4 sm:$0xff]   ;;  %v6978_v56 = vld [vmem:[#allocation14 + $0x140] ss:$16 sps:$4 sm:$0xff]  }
 0x4d3   : > { %6166 = vmatpush3.bf16.msra.mxu1 %v3776_v42  ;;  %6167 = vmatprep.mubr.msk.bf16.mxu1 %vm7497_vm0, %v7496_v14  ;;  %v6980_v42 = vld [vmem:[#allocation14 + $0x144] ss:$16 sps:$4 sm:$0xff]  }
 0x4d4   : > { %6177 = vmatprep.subr.bf16.mxu1 %v7496_v14 }
 0x4d7   : > { %v7154_v37 = vpop.eup %7153 }
 0x4d8   : > { %v3881_v39 = vmul.f32 %v7154_v37, %v8051_v50  ;;  %v6981_v37 = vld [vmem:[#allocation14 + $0x120] ss:$16 sps:$4 sm:$0xff]  }
 0x4da   : > { %6168 = vmatmul.mubr.msk.bf16.vlgmr.msra.gmra.mxu1 %vm3539_vm4, %v3771_v47  ;;  %v3882_v40 = vpack.c.bf16 %v3881_v39, %v3881_v39 }
 0x4db   : > { %6178 = vmatpush3.bf16.msra.mxu1 %v3890_v2  ;;  %6179 = vmatprep.mubr.msk.bf16.mxu1 %vm7497_vm0, %v7496_v14 }
 0x4dc   : > { %6189 = vmatprep.subr.bf16.mxu1 %v7496_v14 }
 0x4e2   : > { %6180 = vmatmul.mubr.msk.bf16.vlgmr.msra.gmra.mxu1 %vm3539_vm4, %v3882_v40 }
 0x4e3   : > { %6190 = vmatpush3.bf16.msra.mxu1 %v3995_v10  ;;  %6191 = vmatprep.mubr.msk.bf16.mxu1 %vm7497_vm0, %v7496_v14  ;;  %v6986_v10 = vld [vmem:[#allocation14 + $0x104] ss:$16 sps:$4 sm:$0xff]  }
 0x4e4   : > { %6201 = vmatprep.subr.bf16.mxu1 %v7496_v14 }
 0x4f6   : > { %v3987_v43 = vpop.xlane.xlu1 %3986 }
 0x4f7   : > { %7155 = vrcp.f32 %v3987_v43  ;;  %v6984_v43 = vld [vmem:[#allocation14 + $0x100] ss:$16 sps:$4 sm:$0xff]  }
 0x4fa   : > { %v4098_v44 = vpop.xlane.xlu1 %4097 }
 0x4fb   : > { %7157 = vrcp.f32 %v4098_v44 }
 0x501   : > { %v4206_v45 = vpop.xlane.xlu1 %4205 }
 0x502   : > { %7159 = vrcp.f32 %v4206_v45  ;;  %v6987_v45 = vld [vmem:[#allocation14 + $0x2e0] ss:$16 sps:$4 sm:$0xff]  }
 0x504   : > { %v7156_v38 = vpop.eup %7155 }
 0x505   : > { %v3989_v21 = vmul.f32 %v7156_v38, %v8060_v4  ;;  %v4104_v46 = vpop.permute.xlu1 %4103  ;;  %v6941_v4 = vld [vmem:[#allocation14 + $0xe4] ss:$16 sps:$4 sm:$0xff]  }
 0x506   : > { %v4109_v53 = vsel %vm3555_vm2, %v4104_v46, 0  ;;  %5184 = vmatprep.subr.bf16.mxu0 %v6941_v4  ;;  %v6989_v38 = vld [vmem:[#allocation14 + $0x2e4] ss:$16 sps:$4 sm:$0xff]   ;;  %v6992_v46 = vld [vmem:[#allocation14 + $0xec] ss:$16 sps:$4 sm:$0xff]  }
 0x507   : > { %v3990_v48 = vpack.c.bf16 %v3989_v21, %v3989_v21  ;;  %5185 = vmatpush1.bf16.msra.mxu0 %v6939_v11  ;;  %v7025_v4 = vld [vmem:[#allocation14 + $0x224] ss:$16 sps:$4 sm:$0xff]   ;;  %v7029_v11 = vld [vmem:[#allocation14 + $0x200] ss:$16 sps:$4 sm:$0xff]  }
 0x508   : > { %v7158_v51 = vpop.eup %7157  ;;  %5186 = vmatprep.subr.bf16.mxu0 %v6944_v5  ;;  %v7031_v5 = vld [vmem:[#allocation14 + $0x204] ss:$16 sps:$4 sm:$0xff]  }
 0x509   : > { %6192 = vmatmul.mubr.msk.bf16.vlgmr.msra.gmra.mxu1 %vm3539_vm4, %v3990_v48  ;;  %v4317_v41 = vpop.xlane.xlu0 %4316  ;;  %v4100_v54 = vmul.f32 %v7158_v51, %v8064_v32  ;;  %v4323_v58 = vpop.permute.xlu1 %4322  ;;  %v6947_v32 = vld [vmem:[#allocation14 + $0xa4] ss:$16 sps:$4 sm:$0xff]   ;;  %v6993_v51 = vld [vmem:[#allocation14 + $0x2c0] ss:$16 sps:$4 sm:$0xff]  }
 0x50a   : > { %6202 = vmatpush3.bf16.msra.mxu1 %v4109_v53  ;;  %6203 = vmatprep.mubr.msk.bf16.mxu1 %vm7497_vm0, %v7496_v14  ;;  %7161 = vrcp.f32 %v4317_v41  ;;  %v4328_v61 = vsel %vm3555_vm2, %v4323_v58, 0  ;;  %v6995_v53 = vld [vmem:[#allocation14 + $0x2c4] ss:$16 sps:$4 sm:$0xff]  }
 0x50b   : > { %6213 = vmatprep.subr.bf16.mxu1 %v7496_v14  ;;  %v4101_v55 = vpack.c.bf16 %v4100_v54, %v4100_v54  ;;  %5187 = vmatpush1.bf16.msra.mxu0 %v6942_v6  ;;  %v7035_v6 = vld [vmem:[#allocation14 + $0x3e0] ss:$16 sps:$4 sm:$0xff]  }
 0x50c   : > { %5188 = vmatprep.subr.bf16.mxu0 %v6947_v32  ;;  %v7037_v32 = vld [vmem:[#allocation14 + $0x3e4] ss:$16 sps:$4 sm:$0xff]  }
 0x50f   : > { %v7160_v50 = vpop.eup %7159 }
 0x510   : > { %v4208_v15 = vmul.f32 %v7160_v50, %v8068_v16  ;;  %v6953_v16 = vld [vmem:[#allocation14 + $0x64] ss:$16 sps:$4 sm:$0xff]   ;;  %v6999_v50 = vld [vmem:[#allocation14 + $0x2a0] ss:$16 sps:$4 sm:$0xff]  }
 0x511   : > { %6204 = vmatmul.mubr.msk.bf16.vlgmr.msra.gmra.mxu1 %vm3539_vm4, %v4101_v55 }
 0x512   : > { %6214 = vmatpush3.bf16.msra.mxu1 %v4214_v57  ;;  %6215 = vmatprep.mubr.msk.bf16.mxu1 %vm7497_vm0, %v7496_v14  ;;  %v4209_v59 = vpack.c.bf16 %v4208_v15, %v4208_v15  ;;  %v7001_v57 = vld [vmem:[#allocation14 + $0x2a4] ss:$16 sps:$4 sm:$0xff]  }
 0x513   : > { %6225 = vmatprep.subr.bf16.mxu1 %v7496_v14 }
 0x517   : > { %v7162_v60 = vpop.eup %7161 }
 0x518   : > { %v4319_v62 = vmul.f32 %v7162_v60, %v8076_v25  ;;  %v6957_v25 = vld [vmem:[#allocation14 + $0x20] ss:$16 sps:$4 sm:$0xff]   ;;  %v7007_v60 = vld [vmem:[#allocation14 + $0x284] ss:$16 sps:$4 sm:$0xff]  }
 0x519   : > { %6216 = vmatmul.mubr.msk.bf16.vlgmr.msra.gmra.mxu1 %vm3539_vm4, %v4209_v59  ;;  %v7005_v59 = vld [vmem:[#allocation14 + $0x280] ss:$16 sps:$4 sm:$0xff]  }
 0x51a   : > { %6226 = vmatpush3.bf16.msra.mxu1 %v4328_v61  ;;  %6227 = vmatprep.mubr.msk.bf16.mxu1 %vm7497_vm0, %v7496_v14  ;;  %v4320_v63 = vpack.c.bf16 %v4319_v62, %v4319_v62  ;;  %v6945_v14 = vld [vmem:[#allocation14 + $0xa0] ss:$16 sps:$4 sm:$0xff]  }
 0x51b   : > { %5189 = vmatpush1.bf16.msra.mxu0 %v6945_v14  ;;  %5225 = vmatprep.subr.bf16.mxu1 %v6989_v38  ;;  %v7011_v62 = vld [vmem:[#allocation14 + $0x260] ss:$16 sps:$4 sm:$0xff]  }
 0x51c   : > { %5190 = vmatprep.subr.bf16.mxu0 %v6950_v13  ;;  %v7041_v14 = vld [vmem:[#allocation14 + $0x3c0] ss:$16 sps:$4 sm:$0xff]  }
 0x51d   : > { %v7047_v13 = vld [vmem:[#allocation14 + $0x3a0] ss:$16 sps:$4 sm:$0xff]  }
 0x51f   : > { %5191 = vmatpush1.bf16.msra.mxu0 %v6948_v12  ;;  %v7043_v12 = vld [vmem:[#allocation14 + $0x3c4] ss:$16 sps:$4 sm:$0xff]  }
 0x520   : > { %5192 = vmatprep.subr.bf16.mxu0 %v6953_v16  ;;  %v7049_v16 = vld [vmem:[#allocation14 + $0x3a4] ss:$16 sps:$4 sm:$0xff]  }
 0x521   : > { %6228 = vmatmul.mubr.msk.bf16.vlgmr.msra.gmra.mxu1 %vm3539_vm4, %v4320_v63  ;;  %v7013_v63 = vld [vmem:[#allocation14 + $0x264] ss:$16 sps:$4 sm:$0xff]  }
 0x522   : > { %5226 = vmatpush1.bf16.msra.mxu1 %v6987_v45 }
 0x523   : > { %5193 = vmatpush1.bf16.msra.mxu0 %v6951_v17  ;;  %5227 = vmatprep.subr.bf16.mxu1 %v6995_v53  ;;  %v7053_v17 = vld [vmem:[#allocation14 + $0x380] ss:$16 sps:$4 sm:$0xff]  }
 0x524   : > { %5194 = vmatprep.subr.bf16.mxu0 %v6956_v7  ;;  %v7055_v7 = vld [vmem:[#allocation14 + $0x384] ss:$16 sps:$4 sm:$0xff]  }
 0x526   : > { %5228 = vmatpush1.bf16.msra.mxu1 %v6993_v51 }
 0x527   : > { %5195 = vmatpush1.bf16.msra.mxu0 %v6954_v22  ;;  %5229 = vmatprep.subr.bf16.mxu1 %v7001_v57  ;;  %v7004_v57 = vld [vmem:[#allocation14 + $0xac] ss:$16 sps:$4 sm:$0xff]  }
 0x528   : > { %5196 = vmatprep.subr.bf16.mxu0 %v6959_v23 }
 0x52a   : > { %5230 = vmatpush1.bf16.msra.mxu1 %v6999_v50  ;;  %v6996_v50 = vld [vmem:[#allocation14 + $0xc8] ss:$16 sps:$4 sm:$0xff]  }
 0x52b   : > { %5197 = vmatpush1.bf16.msra.mxu0 %v6957_v25  ;;  %5231 = vmatprep.subr.bf16.mxu1 %v7007_v60  ;;  %v7059_v25 = vld [vmem:[#allocation14 + $0x360] ss:$16 sps:$4 sm:$0xff]   ;;  %v7022_v60 = vld [vmem:[#allocation14 + $0x4c] ss:$16 sps:$4 sm:$0xff]  }
 0x52c   : > { %5198 = vmatprep.subr.bf16.mxu0 %v6962_v26  ;;  %v7061_v26 = vld [vmem:[#allocation14 + $0x364] ss:$16 sps:$4 sm:$0xff]  }
 0x52e   : > { %5232 = vmatpush1.bf16.msra.mxu1 %v7005_v59  ;;  %v7014_v59 = vld [vmem:[#allocation14 + $0x68] ss:$16 sps:$4 sm:$0xff]  }
 0x52f   : > { %5199 = vmatpush1.bf16.msra.mxu0 %v6960_v8  ;;  %5233 = vmatprep.subr.bf16.mxu1 %v7013_v63  ;;  %v7026_v63 = vld [vmem:[#allocation14 + $0x28] ss:$16 sps:$4 sm:$0xff]  }
 0x530   : > { %5200 = vmatprep.subr.bf16.mxu0 %v6965_v28 }
 0x532   : > { %5234 = vmatpush1.bf16.msra.mxu1 %v7011_v62  ;;  %v7028_v62 = vld [vmem:[#allocation14 + $0x2c] ss:$16 sps:$4 sm:$0xff]  }
 0x533   : > { %5201 = vmatpush2.bf16.msra.mxu0 %v6963_v29  ;;  %v7065_v29 = vld [vmem:[#allocation14 + $0x340] ss:$16 sps:$4 sm:$0xff]  }
 0x534   : > { %5202 = vmatprep.subr.bf16.mxu0 %v6968_v52  ;;  %v7067_v52 = vld [vmem:[#allocation14 + $0x344] ss:$16 sps:$4 sm:$0xff]  }
 0x537   : > { %5203 = vmatpush2.bf16.msra.mxu0 %v6966_v30 }
 0x538   : > { %5204 = vmatprep.subr.bf16.mxu0 %v6971_v31 }
 0x53b   : > { %5205 = vmatpush2.bf16.msra.mxu0 %v6969_v33  ;;  %v7071_v33 = vld [vmem:[#allocation14 + $0x320] ss:$16 sps:$4 sm:$0xff]  }
 0x53c   : > { %v8124_v0 = vpop.f32.mrf.mxu1  ;;  %5206 = vmatprep.subr.bf16.mxu0 %v6974_v34  ;;  %v7073_v34 = vld [vmem:[#allocation14 + $0x324] ss:$16 sps:$4 sm:$0xff]  }
 0x53e   : > { %v6145_v1 = vpop.f32.mrf.mxu1 }
 0x53f   : > { %5207 = vmatpush2.bf16.msra.mxu0 %v6972_v35  ;;  %v7017_v1 = vld [vmem:[#allocation14 + $0x240] ss:$16 sps:$4 sm:$0xff]  }
 0x540   : > { %v3596_v24 = vpop.f32.mrf.mxu1  ;;  %5208 = vmatprep.subr.bf16.mxu0 %v6977_v18 }
 0x541   : > { %v7019_v24 = vld [vmem:[#allocation14 + $0x244] ss:$16 sps:$4 sm:$0xff]  }
 0x542   : > { %v6146_v3 = vpop.f32.mrf.mxu1  ;;  %5235 = vmatprep.subr.bf16.mxu1 %v7019_v24  ;;  %v7032_v24 = vld [vmem:[#allocation14 + $0x8] ss:$16 sps:$4 sm:$0xff]  }
 0x543   : > { %5209 = vmatpush2.bf16.msra.mxu0 %v6975_v36  ;;  %5236 = vmatpush1.bf16.msra.mxu1 %v7017_v1  ;;  %v7023_v3 = vld [vmem:[#allocation14 + $0x220] ss:$16 sps:$4 sm:$0xff]   ;;  %v7079_v36 = vld [vmem:[#allocation14 + $0x304] ss:$16 sps:$4 sm:$0xff]   ;;  %v7034_v1 = vld [vmem:[#allocation14 + $0xc] ss:$16 sps:$4 sm:$0xff]  }
 0x544   : > { %5210 = vmatprep.subr.bf16.mxu0 %v6980_v42  ;;  %5237 = vmatprep.subr.bf16.mxu1 %v7025_v4  ;;  %v7077_v42 = vld [vmem:[#allocation14 + $0x300] ss:$16 sps:$4 sm:$0xff]   ;;  %v7038_v4 = vld [vmem:[#allocation14 + $0x1e8] ss:$16 sps:$4 sm:$0xff]  }
 0x547   : > { %5211 = vmatpush2.bf16.msra.mxu0 %v6978_v56  ;;  %5238 = vmatpush1.bf16.msra.mxu1 %v7023_v3  ;;  %v7040_v3 = vld [vmem:[#allocation14 + $0x1ec] ss:$16 sps:$4 sm:$0xff]  }
 0x548   : > { %5212 = vmatprep.subr.bf16.mxu0 %v6983_v19  ;;  %5239 = vmatprep.subr.bf16.mxu1 %v7031_v5  ;;  %v7044_v5 = vld [vmem:[#allocation14 + $0x1c8] ss:$16 sps:$4 sm:$0xff]  }
 0x54b   : > { %5213 = vmatpush2.bf16.msra.mxu0 %v6981_v37  ;;  %5240 = vmatpush1.bf16.msra.mxu1 %v7029_v11  ;;  %v7046_v11 = vld [vmem:[#allocation14 + $0x1cc] ss:$16 sps:$4 sm:$0xff]  }
 0x54c   : > { %5214 = vmatprep.subr.bf16.mxu0 %v6986_v10  ;;  %5241 = vmatprep.subr.bf16.mxu1 %v7037_v32  ;;  %v7050_v32 = vld [vmem:[#allocation14 + $0x1a8] ss:$16 sps:$4 sm:$0xff]  }
 0x54f   : > { %5215 = vmatpush2.bf16.msra.mxu0 %v6984_v43  ;;  %5242 = vmatpush2.bf16.msra.mxu1 %v7035_v6  ;;  %v7052_v6 = vld [vmem:[#allocation14 + $0x1ac] ss:$16 sps:$4 sm:$0xff]  }
 0x550   : > { %5266 = vmatprep.subr.bf16.mxu0 %v6992_v46  ;;  %5243 = vmatprep.subr.bf16.mxu1 %v7043_v12  ;;  %v7056_v12 = vld [vmem:[#allocation14 + $0x188] ss:$16 sps:$4 sm:$0xff]  }
 0x553   : > { %5244 = vmatpush2.bf16.msra.mxu1 %v7041_v14  ;;  %v7058_v14 = vld [vmem:[#allocation14 + $0x18c] ss:$16 sps:$4 sm:$0xff]  }
 0x554   : > { %5245 = vmatprep.subr.bf16.mxu1 %v7049_v16  ;;  %v7062_v16 = vld [vmem:[#allocation14 + $0x168] ss:$16 sps:$4 sm:$0xff]  }
 0x557   : > { %5246 = vmatpush2.bf16.msra.mxu1 %v7047_v13  ;;  %v7064_v13 = vld [vmem:[#allocation14 + $0x16c] ss:$16 sps:$4 sm:$0xff]  }
 0x558   : > { %5247 = vmatprep.subr.bf16.mxu1 %v7055_v7  ;;  %v7068_v7 = vld [vmem:[#allocation14 + $0x148] ss:$16 sps:$4 sm:$0xff]  }
 0x55b   : > { %5248 = vmatpush2.bf16.msra.mxu1 %v7053_v17  ;;  %v7070_v17 = vld [vmem:[#allocation14 + $0x14c] ss:$16 sps:$4 sm:$0xff]  }
 0x55c   : > { %5249 = vmatprep.subr.bf16.mxu1 %v7061_v26  ;;  %v7082_v26 = vld [vmem:[#allocation14 + $0x10c] ss:$16 sps:$4 sm:$0xff]  }
 0x55f   : > { %5250 = vmatpush2.bf16.msra.mxu1 %v7059_v25  ;;  %v7074_v25 = vld [vmem:[#allocation14 + $0x128] ss:$16 sps:$4 sm:$0xff]  }
 0x560   : > { %5251 = vmatprep.subr.bf16.mxu1 %v7067_v52  ;;  %v7080_v52 = vld [vmem:[#allocation14 + $0x108] ss:$16 sps:$4 sm:$0xff]  }
 0x563   : > { %5252 = vmatpush2.bf16.msra.mxu1 %v7065_v29 }
 0x564   : > { %5253 = vmatprep.subr.bf16.mxu1 %v7073_v34 }
 0x567   : > { %5254 = vmatpush2.bf16.msra.mxu1 %v7071_v33 }
 0x568   : > { %5255 = vmatprep.subr.bf16.mxu1 %v7079_v36  ;;  %v7086_v36 = vld [vmem:[#allocation14 + $0x2c8] ss:$16 sps:$4 sm:$0xff]  }
 0x56b   : > { %5256 = vmatpush2.bf16.msra.mxu1 %v7077_v42  ;;  %v7091_v42 = vld [vmem:[#allocation14 + $0x2ac] ss:$16 sps:$4 sm:$0xff]  }
 0x592   : > { %v3707_v47 = vpop.f32.mrf.mxu1 }
 0x594   : > { %v6157_v2 = vpop.f32.mrf.mxu1 }
 0x596   : > { %v3710_v39 = vpop.f32.mrf.mxu1 }
 0x598   : > { %v6158_v40 = vpop.f32.mrf.mxu1 }
 0x59a   : > { %v8126_v44 = vpop.f32.mrf.mxu1 }
 0x59c   : > { %v6169_v21 = vpop.f32.mrf.mxu1 }
 0x59e   : > { %v3815_v48 = vpop.f32.mrf.mxu1 }
 0x5a0   : > { %v6170_v41 = vpop.f32.mrf.mxu1 }
 0x5a2   : > { %v3926_v54 = vpop.f32.mrf.mxu1 }
 0x5a3   : > { %v6353_v55 = vpack.i.bf16 %v3707_v47, %v3926_v54  ;;  %v7085_v47 = vld [vmem:[#allocation14 + $0x2ec] ss:$16 sps:$4 sm:$0xff]   ;;  %v6990_v54 = vld [vmem:[#allocation14 + $0xe8] ss:$16 sps:$4 sm:$0xff]  }
 0x5a4   : > { %v6181_v15 = vpop.f32.mrf.mxu1  ;;  %5307 = vmatprep.subr.bf16.mxu1 %v7085_v47  ;;  %v7097_v47 = vld [vmem:[#allocation14 + $0x26c] ss:$16 sps:$4 sm:$0xff]  }
 0x5a5   : > { %6354 = vrot.lane.b32.xlu1 %v6353_v55, %s7498_s6  ;;  %v6998_v55 = vld [vmem:[#allocation14 + $0xcc] ss:$16 sps:$4 sm:$0xff]   ;;  %v7002_v15 = vld [vmem:[#allocation14 + $0xa8] ss:$16 sps:$4 sm:$0xff]  }
 0x5a6   : > { %v3929_v58 = vpop.f32.mrf.mxu1 }
 0x5a7   : > { %v7008_v58 = vld [vmem:[#allocation14 + $0x88] ss:$16 sps:$4 sm:$0xff]  }
 0x5a8   : > { %v6182_v61 = vpop.f32.mrf.mxu1 }
 0x5a9   : > { %v7020_v61 = vld [vmem:[#allocation14 + $0x48] ss:$16 sps:$4 sm:$0xff]  }
 0x5c9   : > { %v8129_v22 = vpop.f32.mrf.mxu1 }
 0x5cb   : > { %v6193_v23 = vpop.f32.mrf.mxu1 }
 0x5cc   : > { %v7076_v23 = vld [vmem:[#allocation14 + $0x12c] ss:$16 sps:$4 sm:$0xff]  }
 0x5cd   : > { %v4034_v8 = vpop.f32.mrf.mxu1 }
 0x5cf   : > { %v6194_v28 = vpop.f32.mrf.mxu1 }
 0x5d1   : > { %v4145_v30 = vpop.f32.mrf.mxu1 }
 0x5d3   : > { %v6205_v31 = vpop.f32.mrf.mxu1 }
 0x5d5   : > { %v4148_v35 = vpop.f32.mrf.mxu1 }
 0x5d6   : > { %v7083_v35 = vld [vmem:[#allocation14 + $0x2e8] ss:$16 sps:$4 sm:$0xff]  }
 0x5d7   : > { %v6206_v18 = vpop.f32.mrf.mxu1 }
 0x5d8   : > { %v7088_v18 = vld [vmem:[#allocation14 + $0x2cc] ss:$16 sps:$4 sm:$0xff]  }
 0x5d9   : > { %v8131_v56 = vpop.f32.mrf.mxu1 }
 0x5db   : > { %v6217_v19 = vpop.f32.mrf.mxu1 }
 0x5dc   : > { %v7092_v19 = vld [vmem:[#allocation14 + $0x288] ss:$16 sps:$4 sm:$0xff]  }
 0x5dd   : > { %v4253_v37 = vpop.f32.mrf.mxu1 }
 0x5de   : > { %v7095_v37 = vld [vmem:[#allocation14 + $0x268] ss:$16 sps:$4 sm:$0xff]  }
 0x5df   : > { %v6218_v2 = vpop.f32.mrf.mxu1 }
 0x5e0   : > { %v7100_v2 = vld [vmem:[#allocation14 + $0x24c] ss:$16 sps:$4 sm:$0xff]  }
 0x5e1   : > { %v4364_v39 = vpop.f32.mrf.mxu1 }
 0x5e2   : > { %v6358_v40 = vpack.i.bf16 %v4145_v30, %v4364_v39  ;;  %v7098_v39 = vld [vmem:[#allocation14 + $0x248] ss:$16 sps:$4 sm:$0xff]  }
 0x5e3   : > { %v6229_v10 = vpop.f32.mrf.mxu1 }
 0x5e4   : > { %6359 = vrot.lane.b32.xlu1 %v6358_v40, %s7498_s6  ;;  %v7103_v40 = vld [vmem:[#allocation14 + $0x22c] ss:$16 sps:$4 sm:$0xff]   ;;  %v7101_v10 = vld [vmem:[#allocation14 + $0x228] ss:$16 sps:$4 sm:$0xff]  }
 0x5e5   : > { %v4367_v43 = vpop.f32.mrf.mxu1 }
 0x5e6   : > { %v7106_v43 = vld [vmem:[#allocation14 + $0x20c] ss:$16 sps:$4 sm:$0xff]  }
 0x5e7   : > { %v6230_v45 = vpop.f32.mrf.mxu1 }
 0x5e8   : > { %v7104_v45 = vld [vmem:[#allocation14 + $0x208] ss:$16 sps:$4 sm:$0xff]  }
 0x617   : > { %v6355_v38 = vpop.permute.xlu1 %6354 }
 0x618   : > { %v6357_v21 = vunpack.i.h.bf16 %v6355_v38  ;;  %v6356_v46 = vunpack.i.l.bf16 %v6355_v38  ;;  %v7109_v38 = vld [vmem:[#allocation14 + $0x3ec] ss:$16 sps:$4 sm:$0xff]  }
 0x61a   : > { %v4386_v48 = vsel %vm3491_vm1, %v8124_v0, %v6357_v21  ;;  %v4387_v51 = vsel %vm3491_vm1, %v8126_v44, %v6356_v46  ;;  %v7010_v0 = vld [vmem:[#allocation14 + $0x8c] ss:$16 sps:$4 sm:$0xff]   ;;  %v7107_v21 = vld [vmem:[#allocation14 + $0x3e8] ss:$16 sps:$4 sm:$0xff]  }
 0x61b   : > { %v8138_v53 = vpack.c.bf16 %v4386_v48, %v4386_v48  ;;  %v4391_v41 = vpack.c.bf16 %v4387_v51, %v4387_v51  ;;  %v7016_v44 = vld [vmem:[#allocation14 + $0x6c] ss:$16 sps:$4 sm:$0xff]   ;;  %v7110_v48 = vld [vmem:[#allocation14 + $0x3c8] ss:$16 sps:$4 sm:$0xff]  }
 0x61c   : > { %v7112_v46 = vld [vmem:[#allocation14 + $0x3cc] ss:$16 sps:$4 sm:$0xff]  }
 0x61d   : > { %5216 = vmatprep.mubr.bf16.mxu0 %v4391_v41  ;;  %v7115_v51 = vld [vmem:[#allocation14 + $0x3ac] ss:$16 sps:$4 sm:$0xff]  }
 0x61e   : > { %5217 = vmatmul.mubr.bf16.vlgmr.msra.gmra.mxu0 %v8138_v53 }
 0x61f   : > { %5267 = vmatpush1.bf16.msra.mxu0 %v6990_v54  ;;  %5298 = vmatprep.mubr.bf16.mxu0 %v4391_v41  ;;  %v7118_v41 = vld [vmem:[#allocation14 + $0x38c] ss:$16 sps:$4 sm:$0xff]   ;;  %v7116_v54 = vld [vmem:[#allocation14 + $0x388] ss:$16 sps:$4 sm:$0xff]  }
 0x620   : > { %5268 = vmatprep.subr.bf16.mxu0 %v6998_v55  ;;  %v7121_v55 = vld [vmem:[#allocation14 + $0x36c] ss:$16 sps:$4 sm:$0xff]  }
 0x623   : > { %5269 = vmatpush1.bf16.msra.mxu0 %v6996_v50  ;;  %v7119_v50 = vld [vmem:[#allocation14 + $0x368] ss:$16 sps:$4 sm:$0xff]  }
 0x624   : > { %5270 = vmatprep.subr.bf16.mxu0 %v7004_v57  ;;  %v7124_v57 = vld [vmem:[#allocation14 + $0x34c] ss:$16 sps:$4 sm:$0xff]  }
 0x627   : > { %5271 = vmatpush1.bf16.msra.mxu0 %v7002_v15  ;;  %v7122_v15 = vld [vmem:[#allocation14 + $0x348] ss:$16 sps:$4 sm:$0xff]  }
 0x628   : > { %5272 = vmatprep.subr.bf16.mxu0 %v7010_v0  ;;  %v7127_v0 = vld [vmem:[#allocation14 + $0x32c] ss:$16 sps:$4 sm:$0xff]  }
 0x62b   : > { %5273 = vmatpush1.bf16.msra.mxu0 %v7008_v58  ;;  %v7125_v58 = vld [vmem:[#allocation14 + $0x328] ss:$16 sps:$4 sm:$0xff]  }
 0x62c   : > { %5274 = vmatprep.subr.bf16.mxu0 %v7016_v44  ;;  %v7130_v44 = vld [vmem:[#allocation14 + $0x30c] ss:$16 sps:$4 sm:$0xff]  }
 0x62f   : > { %5275 = vmatpush1.bf16.msra.mxu0 %v7014_v59  ;;  %v7128_v59 = vld [vmem:[#allocation14 + $0x308] ss:$16 sps:$4 sm:$0xff]  }
 0x630   : > { %5276 = vmatprep.subr.bf16.mxu0 %v7022_v60 }
 0x633   : > { %5277 = vmatpush1.bf16.msra.mxu0 %v7020_v61 }
 0x634   : > { %5278 = vmatprep.subr.bf16.mxu0 %v7028_v62 }
 0x637   : > { %5279 = vmatpush1.bf16.msra.mxu0 %v7026_v63 }
 0x638   : > { %5280 = vmatprep.subr.bf16.mxu0 %v7034_v1  ;;  %v4522_v1 = vld [vmem:[#allocation16] sm:$0xf] }
 0x63b   : > { %5281 = vmatpush1.bf16.msra.mxu0 %v7032_v24  ;;  %v4527_v24 = vrot.slane %v4522_v1, %v7879_v9  ;;  %v4535_v9 = vrot.slane %v4522_v1, %v7902_v20 }
 0x63c   : > { %5282 = vmatprep.subr.bf16.mxu0 %v7040_v3  ;;  %v4531_v3 = vrot.slane %v4522_v1, %v7882_v27  ;;  %v4539_v27 = vrot.slane %v4522_v1, %v7906_v49 }
 0x63f   : > { %5283 = vmatpush2.bf16.msra.mxu0 %v7038_v4 }
 0x640   : > { %5284 = vmatprep.subr.bf16.mxu0 %v7046_v11 }
 0x643   : > { %5285 = vmatpush2.bf16.msra.mxu0 %v7044_v5 }
 0x644   : > { %5286 = vmatprep.subr.bf16.mxu0 %v7052_v6 }
 0x647   : > { %5287 = vmatpush2.bf16.msra.mxu0 %v7050_v32 }
 0x648   : > { %5288 = vmatprep.subr.bf16.mxu0 %v7058_v14 }
 0x64b   : > { %5289 = vmatpush2.bf16.msra.mxu0 %v7056_v12 }
 0x64c   : > { %5290 = vmatprep.subr.bf16.mxu0 %v7064_v13 }
 0x64f   : > { %5291 = vmatpush2.bf16.msra.mxu0 %v7062_v16 }
 0x650   : > { %5292 = vmatprep.subr.bf16.mxu0 %v7070_v17 }
 0x653   : > { %5293 = vmatpush2.bf16.msra.mxu0 %v7068_v7 }
 0x654   : > { %5294 = vmatprep.subr.bf16.mxu0 %v7076_v23 }
 0x656   : > { %v6360_v8 = vpop.permute.xlu1 %6359 }
 0x657   : > { %5295 = vmatpush2.bf16.msra.mxu0 %v7074_v25  ;;  %v6362_v28 = vunpack.i.h.bf16 %v6360_v8  ;;  %v6361_v29 = vunpack.i.l.bf16 %v6360_v8 }
 0x658   : > { %5296 = vmatprep.subr.bf16.mxu0 %v7082_v26 }
 0x659   : > { %v4388_v30 = vsel %vm3491_vm1, %v8129_v22, %v6362_v28  ;;  %v4389_v31 = vsel %vm3491_vm1, %v8131_v56, %v6361_v29  ;;  %v7089_v22 = vld [vmem:[#allocation14 + $0x2a8] ss:$16 sps:$4 sm:$0xff]   ;;  %v7094_v56 = vld [vmem:[#allocation14 + $0x28c] ss:$16 sps:$4 sm:$0xff]  }
 0x65a   : > { %v8145_v33 = vpack.c.bf16 %v4388_v30, %v4388_v30  ;;  %v4393_v34 = vpack.c.bf16 %v4389_v31, %v4389_v31 }
 0x65b   : > { %5297 = vmatpush2.bf16.msra.mxu0 %v7080_v52 }
 0x65c   : > { %5257 = vmatprep.mubr.bf16.mxu1 %v4393_v34 }
 0x65d   : > { %5258 = vmatmul.mubr.bf16.vlgmr.msra.gmra.mxu1 %v8145_v33 }
 0x65e   : > { %5299 = vmatmul.mubr.bf16.vlgmr.msra.gmra.mxu0 %v8138_v53  ;;  %5308 = vmatpush1.bf16.msra.mxu1 %v7083_v35  ;;  %v7113_v53 = vld [vmem:[#allocation14 + $0x3a8] ss:$16 sps:$4 sm:$0xff]  }
 0x65f   : > { %5339 = vmatprep.mubr.bf16.mxu1 %v4393_v34  ;;  %5309 = vmatprep.subr.bf16.mxu1 %v7088_v18 }
 0x662   : > { %5310 = vmatpush1.bf16.msra.mxu1 %v7086_v36 }
 0x663   : > { %5311 = vmatprep.subr.bf16.mxu1 %v7091_v42 }
 0x666   : > { %5312 = vmatpush1.bf16.msra.mxu1 %v7089_v22 }
 0x667   : > { %5313 = vmatprep.subr.bf16.mxu1 %v7094_v56 }
 0x66a   : > { %5314 = vmatpush1.bf16.msra.mxu1 %v7092_v19 }
 0x66b   : > { %5315 = vmatprep.subr.bf16.mxu1 %v7097_v47 }
 0x66e   : > { %5316 = vmatpush1.bf16.msra.mxu1 %v7095_v37 }
 0x66f   : > { %5317 = vmatprep.subr.bf16.mxu1 %v7100_v2 }
 0x672   : > { %5318 = vmatpush1.bf16.msra.mxu1 %v7098_v39 }
 0x673   : > { %5319 = vmatprep.subr.bf16.mxu1 %v7103_v40 }
 0x676   : > { %5320 = vmatpush1.bf16.msra.mxu1 %v7101_v10 }
 0x677   : > { %5321 = vmatprep.subr.bf16.mxu1 %v7106_v43 }
 0x67a   : > { %5322 = vmatpush1.bf16.msra.mxu1 %v7104_v45 }
 0x67b   : > { %5323 = vmatprep.subr.bf16.mxu1 %v7109_v38 }
 0x67e   : > { %5324 = vmatpush2.bf16.msra.mxu1 %v7107_v21 }
 0x67f   : > { %5325 = vmatprep.subr.bf16.mxu1 %v7112_v46 }
 0x682   : > { %5326 = vmatpush2.bf16.msra.mxu1 %v7110_v48 }
 0x683   : > { %5327 = vmatprep.subr.bf16.mxu1 %v7115_v51 }
 0x686   : > { %5328 = vmatpush2.bf16.msra.mxu1 %v7113_v53 }
 0x687   : > { %5329 = vmatprep.subr.bf16.mxu1 %v7118_v41 }
 0x68a   : > { %5330 = vmatpush2.bf16.msra.mxu1 %v7116_v54 }
 0x68b   : > { %5331 = vmatprep.subr.bf16.mxu1 %v7121_v55 }
 0x68e   : > { %5332 = vmatpush2.bf16.msra.mxu1 %v7119_v50 }
 0x68f   : > { %5333 = vmatprep.subr.bf16.mxu1 %v7124_v57 }
 0x692   : > { %5334 = vmatpush2.bf16.msra.mxu1 %v7122_v15 }
 0x693   : > { %5335 = vmatprep.subr.bf16.mxu1 %v7127_v0 }
 0x696   : > { %5336 = vmatpush2.bf16.msra.mxu1 %v7125_v58 }
 0x697   : > { %5337 = vmatprep.subr.bf16.mxu1 %v7130_v44 }
 0x69a   : > { %5338 = vmatpush2.bf16.msra.mxu1 %v7128_v59 }
 0x69d   : > { %5340 = vmatmul.mubr.bf16.vlgmr.msra.gmra.mxu1 %v8145_v33 }
 0x6de   : > { %v5218_v60 = vpop.f32.mrf.mxu0 }
 0x6df   : > { %v5219_v4 = vadd.f32 %v5218_v60, %v4527_v24 }
 0x6e0   : > { %v5220_v61 = vpop.f32.mrf.mxu0 }
 0x6e1   : > { %v5221_v5 = vadd.f32 %v5220_v61, %v4531_v3 }
 0x6e2   : > { %v5222_v62 = vpop.f32.mrf.mxu0 }
 0x6e4   : > { %v5223_v63 = vpop.f32.mrf.mxu0 }
 0x71d   : > { %v5259_v11 = vpop.f32.mrf.mxu1 }
 0x71e   : > { %v5260_v6 = vadd.f32 %v5259_v11, %v5219_v4  ;;  %v5300_v32 = vpop.f32.mrf.mxu0 }
 0x71f   : > { %v5261_v14 = vpop.f32.mrf.mxu1  ;;  %v5301_v25 = vadd.f32 %v5300_v32, %v4535_v9 }
 0x720   : > { %5348 = vst [vmem:[%s585_s18] sm:$0xff] %v5260_v6  ;;  %v5262_v12 = vadd.f32 %v5261_v14, %v5221_v5  ;;  %v5302_v13 = vpop.f32.mrf.mxu0 }
 0x721   : > { %v5263_v16 = vpop.f32.mrf.mxu1  ;;  %v5303_v8 = vadd.f32 %v5302_v13, %v4539_v27 }
 0x722   : > { %5349 = vst [vmem:[%s585_s18 + $0x8] sm:$0xff] %v5262_v12  ;;  %v5304_v17 = vpop.f32.mrf.mxu0 }
 0x723   : > { %v5264_v7 = vpop.f32.mrf.mxu1 }
 0x724   : > { %v5305_v23 = vpop.f32.mrf.mxu0 }
 0x75d   : > { %v5341_v26 = vpop.f32.mrf.mxu1 }
 0x75e   : > { %v5342_v28 = vadd.f32 %v5341_v26, %v5301_v25 }
 0x75f   : > { %v5343_v29 = vpop.f32.mrf.mxu1 }
 0x760   : > { %5350 = vst [vmem:[%s585_s18 + $0x10] sm:$0xff] %v5342_v28  ;;  %v5344_v52 = vadd.f32 %v5343_v29, %v5303_v8 }
 0x761   : > { %v5345_v20 = vpop.f32.mrf.mxu1 }
 0x762   : > { %5351 = vst [vmem:[%s585_s18 + $0x18] sm:$0xff] %v5344_v52 }
 0x763   : > { %v5346_v49 = vpop.f32.mrf.mxu1 }
 0x764   : > { %7416 = shalt.err (!%p7413_p11)
}
 0x765   : > { %s7417_s12 = scalar_lea.hbm %s8159_s28, 512  ;;  %s7421_s17 = scalar_lea.hbm %s8273_s25, 1024 }
 0x766   : > { %p7418_p12 = scmp.ne.s32.totalorder %s8159_s28, %s7417_s12  ;;  %p7422_p7 = scmp.lt.s32.totalorder %s8159_s28, %s8273_s25 }
 0x767   : > { %p7423_p10 = scmp.lt.s32.totalorder %s7421_s17, %s7417_s12 }
 0x768   : > { %p7419_p5 = pnand %p7418_p12, %p8274_p13 }
 0x769   : > { %p7424_p4 = por %p7423_p10, %p7422_p7 }
 0x76a   : > { %p7420_p6 = pneg %p7419_p5 }
 0x76c   : > { %p7425_p1 = pnand %p7424_p4, %p7420_p6 }
 0x76e   : > { %7428 = shalt.err (!%p7425_p1)
}
 0x76f   : > { %6261 = dma.vmem_to_hbm [thread:$0]  (%p8274_p13), %s8161_s26, 512, %s8159_s28, %s5353_s27  }
 0x770 PF: > { %s8275_s7 = sld [smem:[#allocation24_spill]] }
 0x771   : > { %s8276_s11 = sld [smem:[#allocation29_spill]] }
 0x772   : > { %s8277_s9 = sld [smem:[#allocation25_spill]] }
 0x776   : > { %s5379_s18 = sand.u32 1, %s8275_s7  }
 0x777   : > { %p8278_p3 = scmp.ne.s32.totalorder %s8276_s11, 0  ;;  %s5380_s16 = scalar_lea.sflag [#allocation4], %s5379_s18 }
 0x778   : > { %p8279_p9 = scmp.ge.s32.totalorder %s8277_s9, 2 }
 0x77a   : > { %p6293_p0 = pnand %p8279_p9, %p8278_p3 }
 0x77c   : > { %p6294_p8 = pneg %p6293_p0 }
 0x77e   : > { %7466 = dma.done.wait (%p6294_p8), %s5380_s16, 512  }
 0x77f   : > { %7468 = vsyncadd (%p6294_p8), %s5380_s16, 4294966784  ;;  %s8280_s24 = sld [smem:[#allocation26_spill]]  ;;  %s8282_s21 = smov %s7475_s22 }
 0x780   : > { %s8281_s20 = sld [smem:[#allocation27_spill]]  ;;  %s8283_s22 = smov %s7479_s23 }
 0x785   : > { %p31_p2 = scmp.ge.s32.totalorder %s8280_s24, 4  }
 0x786   : > { %s8284_s23 = smov %s8281_s20 }
 0x787   :  { %33 = sbr.rel (!%p31_p2) target bundleno = 17 (0x11), region = 161 }
 0x78c   :  { %5385 = vsyncpa [#allocation3], 1 }
 0x78d   :  { %5387 = vsyncpa [#allocation3 + $0x1], 1 }
 0x78e   :  { %5388 = vsyncpa [#allocation6], 1 }
 0x78f   :  { %5390 = vsyncpa [#allocation6 + $0x1], 1 }
 0x790   :  { %5391 = vsyncpa [#allocation9], 1 }
 0x791   :  { %5392 = vsyncpa [#allocation12], 1 }
 0x792   :  { %5393 = vsyncpa [#allocation15], 1 }
 0x793   :  { %5394 = vsyncpa [#allocation4], 1 }
 0x794   :  { %5396 = vsyncpa [#allocation4 + $0x1], 1 }

</bundles_post_ra>
